<compile_context>
chip_gen: v7x
topology: tpu7x:2x2x1
jax: 0.10.0
libtpu: 0.0.40
codegen_flags: <defaults>
</compile_context>

<pallas_src>
import functools
import math

import numpy as np
import jax
import jax.numpy as jnp
from jax import lax
from jax.experimental import pallas as pl
from jax.experimental.pallas import tpu as pltpu


# ----------------------------------------------------------------------------
# small numpy helpers (trace-time only)
# ----------------------------------------------------------------------------

def _interp_matrix(n_in, n_out):
    """UpsamplingBilinear2d (align_corners=True) 1-D interpolation matrix."""
    A = np.zeros((n_out, n_in), np.float32)
    if n_in == 1 or n_out == 1:
        A[:, 0] = 1.0
        return A
    scale = (n_in - 1) / (n_out - 1)
    for o in range(n_out):
        src = o * scale
        i0 = min(int(math.floor(src)), n_in - 1)
        i1 = min(i0 + 1, n_in - 1)
        f = src - i0
        A[o, i0] += 1.0 - f
        A[o, i1] += f
    return A


def _grouped_conv_full(w, cout, cin, groups, identity=False):
    """Torch Conv2d weight (Cout, Cin/g, 3, 3) -> block-diagonal (Cout, Cin, 3, 3)."""
    full = np.zeros((cout, cin, 3, 3), np.float32)
    if identity:
        for c in range(cout):
            full[c, c, 1, 1] = 1.0          # conv skipped in the module
        return full
    cout_g, cin_g = cout // groups, cin // groups
    for co in range(cout):
        g = co // cout_g
        full[co, g * cin_g:(g + 1) * cin_g] = w[co]
    return full


def _shift_matrix(rows, cols, off):
    """S[r, c] = 1 iff r == c + off (rows outside [0, rows) dropped)."""
    s = np.zeros((rows, cols), np.float32)
    c = np.arange(cols)
    r = c + off
    m = (r >= 0) & (r < rows)
    s[r[m], c[m]] = 1.0
    return s


def _sel_vec(parity, n_in, lo_full, hi_full):
    """Indicator over m of  lo_full <= 2*m + parity <= hi_full."""
    lo = max(0, (lo_full - parity + 1) // 2)
    hi = min(n_in - 1, (hi_full - parity) // 2)
    v = np.zeros((n_in,), np.float32)
    if lo <= hi:
        v[lo:hi + 1] = 1.0
    return v


def _label_pad(W, L):
    """Pad the label count so the CAM slab's last dim (W*L_pad) is lane-dense."""
    return max(L, int(math.ceil(128.0 / W)))


# ----------------------------------------------------------------------------
# Fused Pallas kernel (one batch TILE per grid step)
# ----------------------------------------------------------------------------

def fsr_fused_kernel(xcol_ref, ucol_ref, w1cat_ref, awb_ref, wdcat_ref,
                     dbias_ref, fcbd_ref, fcfold_ref, fcb_ref, mask_ref,
                     x1_ref, cams_ref, y_ref, r1pad_ref,
                     *, B, H, WC, inv_area):
    """FSR_SHUFFLE_MODULE_X2 forward for a tile of B batch elements.

    Every activation is a lane-dense 2-D (B*H, lanes) slab; every op is a
    K-stacked MXU matmul, a static slice or a VPU/XLU elementwise op.
    """
    f32 = jnp.float32

    # ---- conv1 (grouped 3x3, pad=1) + ReLU: one K-stacked matmul, M = B*H ----
    xcol = xcol_ref[...].reshape(B * H, -1)                       # (B*H, 3*W*Cin)
    r1 = jnp.maximum(
        jnp.dot(xcol, w1cat_ref[...], preferred_element_type=f32), 0.0)
    r1 = r1.reshape(B, H, WC)

    # ---- pre-zeroed scratch holding the deconv's 2 row taps K-stacked along
    #      lanes: block 0 = r1p[row], block 1 = r1p[row + 1]
    #      (r1p = r1 with one zero row top/bottom).  Replaces the old padh matmul.
    r1pad_ref[...] = jnp.zeros_like(r1pad_ref)
    r1pad_ref[:, 1:H + 1, 0:WC] = r1
    r1pad_ref[:, 0:H, WC:2 * WC] = r1
    r1cols = [r1pad_ref[:, ph:ph + H, :].reshape(B * H, 2 * WC)
              for ph in range(2)]

    db = dbias_ref[0]                          # (WC,): hoisted bias broadcast
    fcbd = fcbd_ref[...]
    ucol = ucol_ref[...].reshape(B * 2 * H, -1)                   # (B*2H, 3*W*Cin)
    pooled = jnp.zeros((B, WC), f32)

    for pw in range(2):                        # output column parity (lazy up branch)
        # bilinear-W x2 composed with the (optional) grouped 3x3 conv, both row
        # parities at once: M = B*2H, K = 3*W*Cin.
        up_pw = jnp.dot(ucol, awb_ref[pw], preferred_element_type=f32)
        up_pw = up_pw.reshape(B, 2, H, WC)
        for ph in range(2):                    # output row parity
            # residual: polyphase ConvTranspose2d(4, stride=2, pad=1) with both
            # channel_shuffle's folded in; K = 2*W*Cd.
            res = jnp.dot(r1cols[ph], wdcat_ref[ph, pw],
                          preferred_element_type=f32)             # (B*H, WC)
            x1 = up_pw[:, ph].reshape(B * H, WC) + res + db
            cam = jnp.dot(x1, fcbd, preferred_element_type=f32)   # (B*H, W*Lp)

            x1_3 = x1.reshape(B, H, WC)
            x1_ref[:, ph, pw] = x1_3.astype(x1_ref.dtype)
            cams_ref[:, ph, pw] = cam.reshape(B, H, -1).astype(cams_ref.dtype)

            # trimmed avg-pool: VPU mask + sublane reduction (no M=1 matmuls)
            pooled = pooled + jnp.sum(x1_3 * mask_ref[ph, pw], axis=1)

    # head: fold the W-sum and the fc layer into one (W*Cd, L_pad) matmul
    y = (jnp.dot(pooled * inv_area, fcfold_ref[...],
                 preferred_element_type=f32) + fcb_ref[0])
    y_ref[:, 0, :] = y.astype(y_ref.dtype)


# ----------------------------------------------------------------------------
# Wrapper-side constant construction (numpy, trace-time only)
# ----------------------------------------------------------------------------

def build_constants(params, *, in_planes, out_planes, groups, H, W, feat_trim,
                    num_labels, label_pad):
    Cin, Cd, L, Lp = in_planes, out_planes, num_labels, label_pad
    t0, t1 = feat_trim
    Ho, Wo = 2 * H, 2 * W

    w1 = np.asarray(params["w_c1"], np.float32)     # (Cd, Cin/g, 3, 3)
    wu = np.asarray(params["w_up"], np.float32)     # (Cd, Cin/g, 3, 3)
    wd = np.asarray(params["w_dc"], np.float32)     # (Cd, Cd/g, 4, 4) ConvT layout
    bd = np.asarray(params["b_dc"], np.float32)     # (Cd,)
    fcw = np.asarray(params["fc_w"], np.float32)    # (L, Cd)
    fcb = np.asarray(params["fc_b"], np.float32)    # (L,)

    w1_full = _grouped_conv_full(w1, Cd, Cin, groups)
    wu_full = _grouped_conv_full(wu, Cd, Cin, groups, identity=(Cin == Cd))

    # deconv dense block-diagonal weight [ci, co, kh, kw]
    cd_g = Cd // groups
    wd_full = np.zeros((Cd, Cd, 4, 4), np.float32)
    for ci in range(Cd):
        g = ci // cd_g
        wd_full[ci, g * cd_g:(g + 1) * cd_g] = wd[ci]

    # fold BOTH channel_shuffle's into the deconv weights / bias
    P = np.array([(c % groups) * cd_g + (c // groups) for c in range(Cd)])
    Pinv = np.argsort(P)
    w_eff = wd_full[Pinv][:, P]
    b_eff = bd[P]

    # conv1: kh-stacked banded weight (3*W*Cin, W*Cd); W zero-pad folded in
    def conv_band(wfull, kh):
        Bm = np.zeros((W * Cin, W * Cd), np.float32)
        for kw in range(3):
            Bm += np.kron(_shift_matrix(W, W, kw - 1), wfull[:, :, kh, kw].T)
        return Bm
    w1cat = np.concatenate([conv_band(w1_full, kh) for kh in range(3)], axis=0)

    # up branch: bilinear x2 along W composed with the (optional) conv kw taps,
    # kh-stacked, per output column parity pw.  Input row = H-upsampled (W*Cin).
    Aw = _interp_matrix(W, Wo)
    awb = np.zeros((2, 3 * W * Cin, W * Cd), np.float32)
    for pw in range(2):
        for kh in range(3):
            core = np.zeros((W * Cin, W * Cd), np.float32)
            for kw in range(3):
                awx = np.zeros((W, W), np.float32)  # awx[j, n] = Aw[2n+pw-1+kw, j]
                for n in range(W):
                    s = 2 * n + pw - 1 + kw
                    if 0 <= s < Wo:
                        awx[:, n] = Aw[s]
                core += np.kron(awx, wu_full[:, :, kh, kw].T)
            awb[pw, kh * (W * Cin):(kh + 1) * (W * Cin)] = core

    # deconv: per (row parity ph, col parity pw) a K-stacked weight (2*W*Cd, W*Cd)
    #   tap 0 multiplies r1p[m+ph]   -> kernel row 3-ph
    #   tap 1 multiplies r1p[m+ph+1] -> kernel row 1-ph
    def deconv_band(kh, pw):
        Bm = np.zeros((W * Cd, W * Cd), np.float32)
        pairs = ((-1, 3), (0, 1)) if pw == 0 else ((0, 2), (1, 0))  # (iw-n, kw)
        for off, kw in pairs:
            Bm += np.kron(_shift_matrix(W, W, off), w_eff[:, :, kh, kw])
        return Bm
    wdcat = np.zeros((2, 2, 2 * W * Cd, W * Cd), np.float32)
    for ph in range(2):
        for pw in range(2):
            wdcat[ph, pw, :W * Cd] = deconv_band(3 - ph, pw)
            wdcat[ph, pw, W * Cd:] = deconv_band(1 - ph, pw)

    dbias = np.tile(b_eff, W)[None, :].astype(np.float32)           # (1, W*Cd)

    # head constants (labels zero-padded for lane-dense CAM stores)
    fcw_p = np.zeros((Lp, Cd), np.float32); fcw_p[:L] = fcw
    fcb_p = np.zeros((1, Lp), np.float32);  fcb_p[0, :L] = fcb
    fcbd = np.kron(np.eye(W, dtype=np.float32), fcw_p.T)            # (W*Cd, W*Lp)
    fcfold = np.kron(np.ones((W, 1), np.float32), fcw_p.T)          # (W*Cd, Lp)

    # trimmed avg-pool mask per (row parity, col parity)
    mask = np.zeros((2, 2, H, W * Cd), np.float32)
    for ph in range(2):
        rv = _sel_vec(ph, H, t0, Ho - t1 - 1)
        for pw in range(2):
            cv = _sel_vec(pw, W, t0, Wo - t1 - 1)
            mask[ph, pw] = np.outer(rv, np.kron(cv, np.ones((Cd,), np.float32)))

    to_j = lambda a: jnp.asarray(a, jnp.float32)
    return dict(w1cat=to_j(w1cat), awb=to_j(awb), wdcat=to_j(wdcat),
                dbias=to_j(dbias), fcbd=to_j(fcbd), fcfold=to_j(fcfold),
                fcb=to_j(fcb_p), mask=to_j(mask))


# ----------------------------------------------------------------------------
# Forward wrapper
# ----------------------------------------------------------------------------

def fsr_shuffle_x2_forward(x_nchw, params, *, in_planes, out_planes, feat_trim,
                           num_labels, groups):
    N, _, H, W = x_nchw.shape
    Cin, Cd, L = in_planes, out_planes, num_labels
    t0, t1 = feat_trim
    Ho, Wo = 2 * H, 2 * W
    Ht, Wt = Ho - t0 - t1, Wo - t0 - t1
    WC = W * Cd
    Lp = _label_pad(W, L)
    WLp = W * Lp
    K1 = 3 * W * Cin

    consts = build_constants(params, in_planes=Cin, out_planes=Cd, groups=groups,
                             H=H, W=W, feat_trim=feat_trim, num_labels=L,
                             label_pad=Lp)

    # ---- wrapper-side input prep (tiny XLA ops) -------------------------------
    x_nhwc = jnp.transpose(x_nchw, (0, 2, 3, 1)).astype(jnp.float32)

    # conv1 operand: im2col over the 3 kernel rows (K-stacking)
    x_hpad = jnp.pad(x_nhwc, ((0, 0), (1, 1), (0, 0), (0, 0)))
    xcol = jnp.stack([x_hpad[:, kh:kh + H] for kh in range(3)], axis=2)
    xcol = xcol.reshape(N, H, K1)

    # up-branch operand: H-direction bilinear x2 (align_corners) hoisted here,
    # then kh-stacked rows grouped by output-row parity
    Ah = jnp.asarray(_interp_matrix(H, Ho))
    uh = jnp.einsum('rh,nhwc->nrwc', Ah, x_nhwc,
                    precision=lax.Precision.HIGHEST)              # (N, 2H, W, Cin)
    uh_pad = jnp.pad(uh, ((0, 0), (1, 1), (0, 0), (0, 0)))
    ucol = jnp.stack([uh_pad[:, kh:kh + Ho] for kh in range(3)], axis=2)
    ucol = ucol.reshape(N, H, 2, 3, W, Cin).transpose(0, 2, 1, 3, 4, 5)
    ucol = ucol.reshape(N, 2, H, K1)

    # ---- batch tiling ---------------------------------------------------------
    B_tile = 8
    while B_tile > 1 and N % B_tile:
        B_tile //= 2
    steps = N // B_tile

    kern = functools.partial(fsr_fused_kernel, B=B_tile, H=H, WC=WC,
                             inv_area=1.0 / float(Ht * Wt))

    # ---- generation-aware VMEM budget & cost estimate -------------------------
    const_bytes = sum(int(np.prod(v.shape)) * 4 for v in consts.values())
    step_bytes = 4 * (B_tile * H * K1 + B_tile * 2 * H * K1          # inputs
                      + B_tile * 4 * H * (WC + WLp) + B_tile * Lp    # outputs
                      + B_tile * (H + 2) * 2 * WC)                   # scratch
    try:
        vmem_cap = int(pltpu.get_tpu_info().vmem_capacity_bytes)
    except Exception:
        vmem_cap = 64 * 2 ** 20                                      # v7x floor
    vmem_limit = int(min(int(0.75 * vmem_cap),
                         max(16 * 2 ** 20, 3 * (const_bytes + step_bytes))))

    m1 = B_tile * H
    flops = 2 * steps * (m1 * K1 * WC                  # conv1
                         + 2 * (2 * m1) * K1 * WC      # up branch
                         + 4 * m1 * (2 * WC) * WC      # deconv
                         + 4 * m1 * WC * WLp           # CAMs
                         + B_tile * WC * Lp)           # head
    cost = pl.CostEstimate(flops=int(flops), transcendentals=0,
                           bytes_accessed=int(steps * step_bytes + const_bytes))

    out_shape = (
        jax.ShapeDtypeStruct((N, 2, 2, H, WC), jnp.float32),    # x1 phase slabs
        jax.ShapeDtypeStruct((N, 2, 2, H, WLp), jnp.float32),   # CAM phase slabs
        jax.ShapeDtypeStruct((N, 1, Lp), jnp.float32),          # padded logits
    )
    out_specs = (
        pl.BlockSpec((B_tile, 2, 2, H, WC), lambda n: (n, 0, 0, 0, 0)),
        pl.BlockSpec((B_tile, 2, 2, H, WLp), lambda n: (n, 0, 0, 0, 0)),
        pl.BlockSpec((B_tile, 1, Lp), lambda n: (n, 0, 0)),
    )
    const_order = ("w1cat", "awb", "wdcat", "dbias", "fcbd", "fcfold", "fcb",
                   "mask")
    args = (xcol, ucol) + tuple(consts[k] for k in const_order)

    def run(use_buffered):
        def const_spec(shape):
            nd = len(shape)
            imap = lambda n, _nd=nd: (0,) * _nd
            if use_buffered:
                # constant index_map -> single buffer (halves their VMEM)
                return pl.BlockSpec(shape, imap, pipeline_mode=pl.Buffered(1))
            return pl.BlockSpec(shape, imap)

        in_specs = [
            pl.BlockSpec((B_tile, H, K1), lambda n: (n, 0, 0)),
            pl.BlockSpec((B_tile, 2, H, K1), lambda n: (n, 0, 0, 0)),
        ] + [const_spec(tuple(consts[k].shape)) for k in const_order]

        call = pl.pallas_call(
            kern,
            out_shape=out_shape,
            grid=(steps,),
            in_specs=in_specs,
            out_specs=out_specs,
            scratch_shapes=[pltpu.VMEM((B_tile, H + 2, 2 * WC), jnp.float32)],
            compiler_params=pltpu.CompilerParams(
                dimension_semantics=("parallel",),     # shard batch tiles on v7x
                vmem_limit_bytes=vmem_limit,
            ),
            cost_estimate=cost,
        )
        return jax.block_until_ready(call(*args))

    try:
        x1ph, camsph, ypad = run(True)
    except Exception:
        # pipeline_mode=pl.Buffered(1) unsupported on this jax version -> plain specs
        x1ph, camsph, ypad = run(False)

    # ---- phase slabs -> interleave + trim + NCHW (single wrapper-side copy) ---
    # TODO(synk): verify in HLO that this fuses into one copy; otherwise move the
    # row-parity interleave into the kernel with strided stores.
    def to_nchw(ph_arr, C):
        a = ph_arr.reshape(N, 2, 2, H, W, C)
        a = jnp.transpose(a, (0, 5, 3, 1, 4, 2)).reshape(N, C, Ho, Wo)
        return a[:, :, t0:Ho - t1, t0:Wo - t1]

    x1 = to_nchw(x1ph, Cd)
    cams = to_nchw(camsph, Lp)[:, :L]
    y = ypad[:, 0, :L]
    return y, x1, cams


# ----------------------------------------------------------------------------
# Pure-JAX/XLA reference of the PyTorch forward (for correctness checking)
# ----------------------------------------------------------------------------

def channel_shuffle_ref(x, groups):
    N, C, H, W = x.shape
    return (x.reshape(N, groups, C // groups, H, W)
             .transpose(0, 2, 1, 3, 4).reshape(N, C, H, W))


def ref_forward(x, params, *, in_planes, out_planes, feat_trim, num_labels,
                groups):
    N, Cin, H, W = x.shape
    Cd = out_planes
    t0, t1 = feat_trim
    hi = lax.Precision.HIGHEST
    dn = ('NCHW', 'OIHW', 'NCHW')

    Ah = jnp.asarray(_interp_matrix(H, 2 * H))
    Aw = jnp.asarray(_interp_matrix(W, 2 * W))
    up = jnp.einsum('rh,nchw->ncrw', Ah, x, precision=hi)
    up = jnp.einsum('sw,ncrw->ncrs', Aw, up, precision=hi)
    if Cin != Cd:
        up = lax.conv_general_dilated(up, params['w_up'], (1, 1),
                                      ((1, 1), (1, 1)), dimension_numbers=dn,
                                      feature_group_count=groups, precision=hi)

    r = lax.conv_general_dilated(x, params['w_c1'], (1, 1), ((1, 1), (1, 1)),
                                 dimension_numbers=dn,
                                 feature_group_count=groups, precision=hi)
    r = jnp.maximum(r, 0.0)
    r = channel_shuffle_ref(r, groups)

    # ConvTranspose2d(Cd, Cd, 4, stride=2, padding=1, groups) as a dilated conv
    wd = np.asarray(params['w_dc'], np.float32)        # (Cd, Cd/g, 4, 4)
    cd_g = Cd // groups
    w_conv = np.zeros((Cd, cd_g, 4, 4), np.float32)
    for g in range(groups):
        for co in range(cd_g):
            for ci in range(cd_g):
                w_conv[g * cd_g + co, ci] = wd[g * cd_g + ci, co, ::-1, ::-1]
    d = lax.conv_general_dilated(r, jnp.asarray(w_conv), (1, 1),
                                 ((2, 2), (2, 2)), lhs_dilation=(2, 2),
                                 dimension_numbers=dn,
                                 feature_group_count=groups, precision=hi)
    d = d + params['b_dc'][None, :, None, None]
    d = channel_shuffle_ref(d, groups)

    x1 = up + d
    x1 = x1[:, :, t0:2 * H - t1, t0:2 * W - t1]
    y = x1.mean(axis=(2, 3)) @ params['fc_w'].T + params['fc_b']
    cams = jnp.einsum('nchw,lc->nlhw', x1, params['fc_w'], precision=hi)
    return y, x1, cams


# ----------------------------------------------------------------------------
# Parameter init (matches the PyTorch module's layouts)
# ----------------------------------------------------------------------------

def init_params(key, in_planes, out_planes, num_labels, groups):
    ks = jax.random.split(key, 6)
    n = 3 * 3 * out_planes
    std = math.sqrt(2.0 / n)
    w_up = jax.random.normal(ks[0], (out_planes, in_planes // groups, 3, 3), jnp.float32) * std
    w_c1 = jax.random.normal(ks[1], (out_planes, in_planes // groups, 3, 3), jnp.float32) * std
    w_dc = jax.random.normal(ks[2], (out_planes, out_planes // groups, 4, 4), jnp.float32) * 0.1
    b_dc = jax.random.normal(ks[3], (out_planes,), jnp.float32) * 0.1
    fc_w = jax.random.normal(ks[4], (num_labels, out_planes), jnp.float32) * 0.1
    fc_b = jax.random.normal(ks[5], (num_labels,), jnp.float32) * 0.1
    return dict(w_up=w_up, w_c1=w_c1, w_dc=w_dc, b_dc=b_dc, fc_w=fc_w, fc_b=fc_b)


# ----------------------------------------------------------------------------
# Demo
# ----------------------------------------------------------------------------

if __name__ == "__main__":
    in_planes, out_planes = 4, 8
    groups = 2
    num_labels = 3
    feat_trim = (1, 1)
    N, H, W = 2, 16, 16

    key = jax.random.PRNGKey(0)
    x = jax.random.normal(key, (N, in_planes, H, W), jnp.float32)
    params = init_params(jax.random.PRNGKey(42), in_planes, out_planes,
                         num_labels, groups)

    y, x1, cams = fsr_shuffle_x2_forward(
        x, params,
        in_planes=in_planes, out_planes=out_planes,
        feat_trim=feat_trim, num_labels=num_labels, groups=groups)
    y, x1, cams = jax.block_until_ready((y, x1, cams))

    Ht = 2 * H - feat_trim[0] - feat_trim[1]
    Wt = 2 * W - feat_trim[0] - feat_trim[1]
    assert y.shape == (N, num_labels)
    assert x1.shape == (N, out_planes, Ht, Wt)
    assert cams.shape == (N, num_labels, Ht, Wt)

    # correctness check vs a pure-JAX/XLA reference of the PyTorch forward
    y_r, x1_r, cams_r = ref_forward(
        x, params, in_planes=in_planes, out_planes=out_planes,
        feat_trim=feat_trim, num_labels=num_labels, groups=groups)
    np.testing.assert_allclose(np.asarray(y), np.asarray(y_r), rtol=2e-2, atol=2e-2)
    np.testing.assert_allclose(np.asarray(x1), np.asarray(x1_r), rtol=2e-2, atol=2e-2)
    np.testing.assert_allclose(np.asarray(cams), np.asarray(cams_r), rtol=2e-2, atol=2e-2)

    print("KERNEL_OK")
</pallas_src>

<mosaic_0001>
module attributes {stable_mosaic.version = 11 : i64} {
  func.func @fsr_fused_kernel(%arg0: i32, %arg1: memref<2x16x192xf32, #tpu.memory_space<vmem>>, %arg2: memref<2x2x16x192xf32, #tpu.memory_space<vmem>>, %arg3: memref<192x128xf32, #tpu.memory_space<vmem>>, %arg4: memref<2x192x128xf32, #tpu.memory_space<vmem>>, %arg5: memref<2x2x256x128xf32, #tpu.memory_space<vmem>>, %arg6: memref<1x128xf32, #tpu.memory_space<vmem>>, %arg7: memref<128x128xf32, #tpu.memory_space<vmem>>, %arg8: memref<128x8xf32, #tpu.memory_space<vmem>>, %arg9: memref<1x8xf32, #tpu.memory_space<vmem>>, %arg10: memref<2x2x16x128xf32, #tpu.memory_space<vmem>>, %arg11: memref<2x2x2x16x128xf32, #tpu.memory_space<vmem>>, %arg12: memref<2x2x2x16x128xf32, #tpu.memory_space<vmem>>, %arg13: memref<2x1x8xf32, #tpu.memory_space<vmem>>, %arg14: memref<2x18x256xf32, #tpu.memory_space<vmem>>) attributes {dimension_semantics = [#tpu.dimension_semantics<parallel>], iteration_bounds = array<i64: 1>, scalar_prefetch = 0 : i64, scratch_operands = 1 : i64, tpu.core_type = #tpu.core_type<tc>, window_params = [{transform_indices = @transform_0, window_bounds = array<i64: 2, 16, 192>}, {transform_indices = @transform_1, window_bounds = array<i64: 2, 2, 16, 192>}, {pipeline_mode = #tpu.pipeline_mode<synchronous>, transform_indices = @transform_2, window_bounds = array<i64: 192, 128>}, {pipeline_mode = #tpu.pipeline_mode<synchronous>, transform_indices = @transform_3, window_bounds = array<i64: 2, 192, 128>}, {pipeline_mode = #tpu.pipeline_mode<synchronous>, transform_indices = @transform_4, window_bounds = array<i64: 2, 2, 256, 128>}, {pipeline_mode = #tpu.pipeline_mode<synchronous>, transform_indices = @transform_5, window_bounds = array<i64: 1, 128>}, {pipeline_mode = #tpu.pipeline_mode<synchronous>, transform_indices = @transform_6, window_bounds = array<i64: 128, 128>}, {pipeline_mode = #tpu.pipeline_mode<synchronous>, transform_indices = @transform_7, window_bounds = array<i64: 128, 8>}, {pipeline_mode = #tpu.pipeline_mode<synchronous>, transform_indices = @transform_8, window_bounds = array<i64: 1, 8>}, {pipeline_mode = #tpu.pipeline_mode<synchronous>, transform_indices = @transform_9, window_bounds = array<i64: 2, 2, 16, 128>}, {transform_indices = @transform_10, window_bounds = array<i64: 2, 2, 2, 16, 128>}, {transform_indices = @transform_11, window_bounds = array<i64: 2, 2, 2, 16, 128>}, {transform_indices = @transform_12, window_bounds = array<i64: 2, 1, 8>}]} {
    %c0 = arith.constant 0 : index
    %c0_0 = arith.constant 0 : index
    %c0_1 = arith.constant 0 : index
    %0 = vector.load %arg1[%c0, %c0_0, %c0_1] : memref<2x16x192xf32, #tpu.memory_space<vmem>>, vector<2x16x192xf32>
    %1 = vector.shape_cast %0 : vector<2x16x192xf32> to vector<32x192xf32>
    %c0_2 = arith.constant 0 : index
    %c0_3 = arith.constant 0 : index
    %2 = vector.load %arg3[%c0_2, %c0_3] : memref<192x128xf32, #tpu.memory_space<vmem>>, vector<192x128xf32>
    %cst = arith.constant dense<0.000000e+00> : vector<32x128xf32>
    %3 = tpu.matmul %1, %2, %cst {dimension_numbers = #tpu.dot_dimension_numbers<[1], [0], [0], [1], [0, 0, 1, 1], [], []>} : vector<32x192xf32>, vector<192x128xf32>, vector<32x128xf32> -> vector<32x128xf32>
    %cst_4 = arith.constant 0.000000e+00 : f32
    %4 = vector.broadcast %cst_4 : f32 to vector<32x128xf32>
    %5 = arith.maximumf %3, %4 : vector<32x128xf32>
    %6 = vector.shape_cast %5 : vector<32x128xf32> to vector<2x16x128xf32>
    %cst_5 = arith.constant 0.000000e+00 : f32
    %7 = vector.broadcast %cst_5 : f32 to vector<2x18x256xf32>
    %c0_6 = arith.constant 0 : index
    %c0_7 = arith.constant 0 : index
    %c0_8 = arith.constant 0 : index
    %8 = vector.load %arg14[%c0_6, %c0_7, %c0_8] : memref<2x18x256xf32, #tpu.memory_space<vmem>>, vector<2x18x256xf32>
    tpu.vector_store %arg14[%c0_6, %c0_7, %c0_8], %7 {strides = array<i32>} : memref<2x18x256xf32, #tpu.memory_space<vmem>>, vector<2x18x256xf32>,
    %c0_9 = arith.constant 0 : index
    %c1 = arith.constant 1 : index
    %c0_10 = arith.constant 0 : index
    %9 = vector.load %arg14[%c0_9, %c1, %c0_10] : memref<2x18x256xf32, #tpu.memory_space<vmem>>, vector<2x16x128xf32>
    tpu.vector_store %arg14[%c0_9, %c1, %c0_10], %6 {strides = array<i32>} : memref<2x18x256xf32, #tpu.memory_space<vmem>>, vector<2x16x128xf32>,
    %c0_11 = arith.constant 0 : index
    %c0_12 = arith.constant 0 : index
    %c128 = arith.constant 128 : index
    %10 = vector.load %arg14[%c0_11, %c0_12, %c128] : memref<2x18x256xf32, #tpu.memory_space<vmem>>, vector<2x16x128xf32>
    tpu.vector_store %arg14[%c0_11, %c0_12, %c128], %6 {strides = array<i32>} : memref<2x18x256xf32, #tpu.memory_space<vmem>>, vector<2x16x128xf32>,
    %c0_13 = arith.constant 0 : index
    %c0_14 = arith.constant 0 : index
    %c0_15 = arith.constant 0 : index
    %11 = vector.load %arg14[%c0_13, %c0_14, %c0_15] : memref<2x18x256xf32, #tpu.memory_space<vmem>>, vector<2x16x256xf32>
    %12 = vector.shape_cast %11 : vector<2x16x256xf32> to vector<32x256xf32>
    %c0_16 = arith.constant 0 : index
    %c1_17 = arith.constant 1 : index
    %c0_18 = arith.constant 0 : index
    %13 = vector.load %arg14[%c0_16, %c1_17, %c0_18] : memref<2x18x256xf32, #tpu.memory_space<vmem>>, vector<2x16x256xf32>
    %14 = vector.shape_cast %13 : vector<2x16x256xf32> to vector<32x256xf32>
    %c0_19 = arith.constant 0 : index
    %c0_20 = arith.constant 0 : index
    %15 = vector.load %arg6[%c0_19, %c0_20] : memref<1x128xf32, #tpu.memory_space<vmem>>, vector<1x128xf32>
    %16 = vector.shape_cast %15 : vector<1x128xf32> to vector<128xf32>
    %c0_21 = arith.constant 0 : index
    %c0_22 = arith.constant 0 : index
    %17 = vector.load %arg7[%c0_21, %c0_22] : memref<128x128xf32, #tpu.memory_space<vmem>>, vector<128x128xf32>
    %c0_23 = arith.constant 0 : index
    %c0_24 = arith.constant 0 : index
    %c0_25 = arith.constant 0 : index
    %c0_26 = arith.constant 0 : index
    %18 = vector.load %arg2[%c0_23, %c0_24, %c0_25, %c0_26] : memref<2x2x16x192xf32, #tpu.memory_space<vmem>>, vector<2x2x16x192xf32>
    %19 = vector.shape_cast %18 : vector<2x2x16x192xf32> to vector<64x192xf32>
    %cst_27 = arith.constant 0.000000e+00 : f32
    %20 = vector.broadcast %cst_27 : f32 to vector<2x128xf32>
    %c0_28 = arith.constant 0 : index
    %c0_29 = arith.constant 0 : index
    %c0_30 = arith.constant 0 : index
    %21 = vector.load %arg4[%c0_28, %c0_29, %c0_30] : memref<2x192x128xf32, #tpu.memory_space<vmem>>, vector<1x192x128xf32>
    %22 = vector.shape_cast %21 : vector<1x192x128xf32> to vector<192x128xf32>
    %cst_31 = arith.constant dense<0.000000e+00> : vector<64x128xf32>
    %23 = tpu.matmul %19, %22, %cst_31 {dimension_numbers = #tpu.dot_dimension_numbers<[1], [0], [0], [1], [0, 0, 1, 1], [], []>} : vector<64x192xf32>, vector<192x128xf32>, vector<64x128xf32> -> vector<64x128xf32>
    %24 = vector.shape_cast %23 : vector<64x128xf32> to vector<2x2x16x128xf32>
    %c0_32 = arith.constant 0 : index
    %c0_33 = arith.constant 0 : index
    %c0_34 = arith.constant 0 : index
    %c0_35 = arith.constant 0 : index
    %25 = vector.load %arg5[%c0_32, %c0_33, %c0_34, %c0_35] : memref<2x2x256x128xf32, #tpu.memory_space<vmem>>, vector<1x1x256x128xf32>
    %26 = vector.shape_cast %25 : vector<1x1x256x128xf32> to vector<256x128xf32>
    %cst_36 = arith.constant dense<0.000000e+00> : vector<32x128xf32>
    %27 = tpu.matmul %12, %26, %cst_36 {dimension_numbers = #tpu.dot_dimension_numbers<[1], [0], [0], [1], [0, 0, 1, 1], [], []>} : vector<32x256xf32>, vector<256x128xf32>, vector<32x128xf32> -> vector<32x128xf32>
    %28 = vector.extract_strided_slice %24 {offsets = [0, 0, 0, 0], sizes = [2, 1, 16, 128], strides = [1, 1, 1, 1]} : vector<2x2x16x128xf32> to vector<2x1x16x128xf32>
    %29 = vector.shape_cast %28 : vector<2x1x16x128xf32> to vector<2x16x128xf32>
    %30 = vector.shape_cast %29 : vector<2x16x128xf32> to vector<32x128xf32>
    %31 = arith.addf %30, %27 : vector<32x128xf32>
    %32 = vector.shape_cast %16 : vector<128xf32> to vector<1x128xf32>
    %33 = vector.broadcast %32 : vector<1x128xf32> to vector<32x128xf32>
    %34 = arith.addf %31, %33 : vector<32x128xf32>
    %cst_37 = arith.constant dense<0.000000e+00> : vector<32x128xf32>
    %35 = tpu.matmul %34, %17, %cst_37 {dimension_numbers = #tpu.dot_dimension_numbers<[1], [0], [0], [1], [0, 0, 1, 1], [], []>} : vector<32x128xf32>, vector<128x128xf32>, vector<32x128xf32> -> vector<32x128xf32>
    %36 = vector.shape_cast %34 : vector<32x128xf32> to vector<2x16x128xf32>
    %c0_38 = arith.constant 0 : index
    %c0_39 = arith.constant 0 : index
    %c0_40 = arith.constant 0 : index
    %c0_41 = arith.constant 0 : index
    %c0_42 = arith.constant 0 : index
    %37 = vector.load %arg11[%c0_38, %c0_39, %c0_40, %c0_41, %c0_42] : memref<2x2x2x16x128xf32, #tpu.memory_space<vmem>>, vector<2x1x1x16x128xf32>
    %38 = vector.shape_cast %37 : vector<2x1x1x16x128xf32> to vector<2x16x128xf32>
    %39 = vector.shape_cast %36 : vector<2x16x128xf32> to vector<2x1x1x16x128xf32>
    tpu.vector_store %arg11[%c0_38, %c0_39, %c0_40, %c0_41, %c0_42], %39 {strides = array<i32>} : memref<2x2x2x16x128xf32, #tpu.memory_space<vmem>>, vector<2x1x1x16x128xf32>,
    %40 = vector.shape_cast %35 : vector<32x128xf32> to vector<2x16x128xf32>
    %c0_43 = arith.constant 0 : index
    %c0_44 = arith.constant 0 : index
    %c0_45 = arith.constant 0 : index
    %c0_46 = arith.constant 0 : index
    %c0_47 = arith.constant 0 : index
    %41 = vector.load %arg12[%c0_43, %c0_44, %c0_45, %c0_46, %c0_47] : memref<2x2x2x16x128xf32, #tpu.memory_space<vmem>>, vector<2x1x1x16x128xf32>
    %42 = vector.shape_cast %41 : vector<2x1x1x16x128xf32> to vector<2x16x128xf32>
    %43 = vector.shape_cast %40 : vector<2x16x128xf32> to vector<2x1x1x16x128xf32>
    tpu.vector_store %arg12[%c0_43, %c0_44, %c0_45, %c0_46, %c0_47], %43 {strides = array<i32>} : memref<2x2x2x16x128xf32, #tpu.memory_space<vmem>>, vector<2x1x1x16x128xf32>,
    %c0_48 = arith.constant 0 : index
    %c0_49 = arith.constant 0 : index
    %c0_50 = arith.constant 0 : index
    %c0_51 = arith.constant 0 : index
    %44 = vector.load %arg10[%c0_48, %c0_49, %c0_50, %c0_51] : memref<2x2x16x128xf32, #tpu.memory_space<vmem>>, vector<1x1x16x128xf32>
    %45 = vector.shape_cast %44 : vector<1x1x16x128xf32> to vector<16x128xf32>
    %46 = vector.shape_cast %45 : vector<16x128xf32> to vector<1x16x128xf32>
    %47 = vector.broadcast %46 : vector<1x16x128xf32> to vector<2x16x128xf32>
    %48 = arith.mulf %36, %47 : vector<2x16x128xf32>
    %cst_52 = arith.constant dense<0.000000e+00> : vector<2x128xf32>
    %49 = vector.multi_reduction <add>, %48, %cst_52 [1] : vector<2x16x128xf32> to vector<2x128xf32>
    %50 = arith.addf %20, %49 : vector<2x128xf32>
    %c1_53 = arith.constant 1 : index
    %c0_54 = arith.constant 0 : index
    %c0_55 = arith.constant 0 : index
    %c0_56 = arith.constant 0 : index
    %51 = vector.load %arg5[%c1_53, %c0_54, %c0_55, %c0_56] : memref<2x2x256x128xf32, #tpu.memory_space<vmem>>, vector<1x1x256x128xf32>
    %52 = vector.shape_cast %51 : vector<1x1x256x128xf32> to vector<256x128xf32>
    %cst_57 = arith.constant dense<0.000000e+00> : vector<32x128xf32>
    %53 = tpu.matmul %14, %52, %cst_57 {dimension_numbers = #tpu.dot_dimension_numbers<[1], [0], [0], [1], [0, 0, 1, 1], [], []>} : vector<32x256xf32>, vector<256x128xf32>, vector<32x128xf32> -> vector<32x128xf32>
    %54 = vector.extract_strided_slice %24 {offsets = [0, 1, 0, 0], sizes = [2, 1, 16, 128], strides = [1, 1, 1, 1]} : vector<2x2x16x128xf32> to vector<2x1x16x128xf32>
    %55 = vector.shape_cast %54 : vector<2x1x16x128xf32> to vector<2x16x128xf32>
    %56 = vector.shape_cast %55 : vector<2x16x128xf32> to vector<32x128xf32>
    %57 = arith.addf %56, %53 : vector<32x128xf32>
    %58 = vector.shape_cast %16 : vector<128xf32> to vector<1x128xf32>
    %59 = vector.broadcast %58 : vector<1x128xf32> to vector<32x128xf32>
    %60 = arith.addf %57, %59 : vector<32x128xf32>
    %cst_58 = arith.constant dense<0.000000e+00> : vector<32x128xf32>
    %61 = tpu.matmul %60, %17, %cst_58 {dimension_numbers = #tpu.dot_dimension_numbers<[1], [0], [0], [1], [0, 0, 1, 1], [], []>} : vector<32x128xf32>, vector<128x128xf32>, vector<32x128xf32> -> vector<32x128xf32>
    %62 = vector.shape_cast %60 : vector<32x128xf32> to vector<2x16x128xf32>
    %c0_59 = arith.constant 0 : index
    %c1_60 = arith.constant 1 : index
    %c0_61 = arith.constant 0 : index
    %c0_62 = arith.constant 0 : index
    %c0_63 = arith.constant 0 : index
    %63 = vector.load %arg11[%c0_59, %c1_60, %c0_61, %c0_62, %c0_63] : memref<2x2x2x16x128xf32, #tpu.memory_space<vmem>>, vector<2x1x1x16x128xf32>
    %64 = vector.shape_cast %63 : vector<2x1x1x16x128xf32> to vector<2x16x128xf32>
    %65 = vector.shape_cast %62 : vector<2x16x128xf32> to vector<2x1x1x16x128xf32>
    tpu.vector_store %arg11[%c0_59, %c1_60, %c0_61, %c0_62, %c0_63], %65 {strides = array<i32>} : memref<2x2x2x16x128xf32, #tpu.memory_space<vmem>>, vector<2x1x1x16x128xf32>,
    %66 = vector.shape_cast %61 : vector<32x128xf32> to vector<2x16x128xf32>
    %c0_64 = arith.constant 0 : index
    %c1_65 = arith.constant 1 : index
    %c0_66 = arith.constant 0 : index
    %c0_67 = arith.constant 0 : index
    %c0_68 = arith.constant 0 : index
    %67 = vector.load %arg12[%c0_64, %c1_65, %c0_66, %c0_67, %c0_68] : memref<2x2x2x16x128xf32, #tpu.memory_space<vmem>>, vector<2x1x1x16x128xf32>
    %68 = vector.shape_cast %67 : vector<2x1x1x16x128xf32> to vector<2x16x128xf32>
    %69 = vector.shape_cast %66 : vector<2x16x128xf32> to vector<2x1x1x16x128xf32>
    tpu.vector_store %arg12[%c0_64, %c1_65, %c0_66, %c0_67, %c0_68], %69 {strides = array<i32>} : memref<2x2x2x16x128xf32, #tpu.memory_space<vmem>>, vector<2x1x1x16x128xf32>,
    %c1_69 = arith.constant 1 : index
    %c0_70 = arith.constant 0 : index
    %c0_71 = arith.constant 0 : index
    %c0_72 = arith.constant 0 : index
    %70 = vector.load %arg10[%c1_69, %c0_70, %c0_71, %c0_72] : memref<2x2x16x128xf32, #tpu.memory_space<vmem>>, vector<1x1x16x128xf32>
    %71 = vector.shape_cast %70 : vector<1x1x16x128xf32> to vector<16x128xf32>
    %72 = vector.shape_cast %71 : vector<16x128xf32> to vector<1x16x128xf32>
    %73 = vector.broadcast %72 : vector<1x16x128xf32> to vector<2x16x128xf32>
    %74 = arith.mulf %62, %73 : vector<2x16x128xf32>
    %cst_73 = arith.constant dense<0.000000e+00> : vector<2x128xf32>
    %75 = vector.multi_reduction <add>, %74, %cst_73 [1] : vector<2x16x128xf32> to vector<2x128xf32>
    %76 = arith.addf %50, %75 : vector<2x128xf32>
    %c1_74 = arith.constant 1 : index
    %c0_75 = arith.constant 0 : index
    %c0_76 = arith.constant 0 : index
    %77 = vector.load %arg4[%c1_74, %c0_75, %c0_76] : memref<2x192x128xf32, #tpu.memory_space<vmem>>, vector<1x192x128xf32>
    %78 = vector.shape_cast %77 : vector<1x192x128xf32> to vector<192x128xf32>
    %cst_77 = arith.constant dense<0.000000e+00> : vector<64x128xf32>
    %79 = tpu.matmul %19, %78, %cst_77 {dimension_numbers = #tpu.dot_dimension_numbers<[1], [0], [0], [1], [0, 0, 1, 1], [], []>} : vector<64x192xf32>, vector<192x128xf32>, vector<64x128xf32> -> vector<64x128xf32>
    %80 = vector.shape_cast %79 : vector<64x128xf32> to vector<2x2x16x128xf32>
    %c0_78 = arith.constant 0 : index
    %c1_79 = arith.constant 1 : index
    %c0_80 = arith.constant 0 : index
    %c0_81 = arith.constant 0 : index
    %81 = vector.load %arg5[%c0_78, %c1_79, %c0_80, %c0_81] : memref<2x2x256x128xf32, #tpu.memory_space<vmem>>, vector<1x1x256x128xf32>
    %82 = vector.shape_cast %81 : vector<1x1x256x128xf32> to vector<256x128xf32>
    %cst_82 = arith.constant dense<0.000000e+00> : vector<32x128xf32>
    %83 = tpu.matmul %12, %82, %cst_82 {dimension_numbers = #tpu.dot_dimension_numbers<[1], [0], [0], [1], [0, 0, 1, 1], [], []>} : vector<32x256xf32>, vector<256x128xf32>, vector<32x128xf32> -> vector<32x128xf32>
    %84 = vector.extract_strided_slice %80 {offsets = [0, 0, 0, 0], sizes = [2, 1, 16, 128], strides = [1, 1, 1, 1]} : vector<2x2x16x128xf32> to vector<2x1x16x128xf32>
    %85 = vector.shape_cast %84 : vector<2x1x16x128xf32> to vector<2x16x128xf32>
    %86 = vector.shape_cast %85 : vector<2x16x128xf32> to vector<32x128xf32>
    %87 = arith.addf %86, %83 : vector<32x128xf32>
    %88 = vector.shape_cast %16 : vector<128xf32> to vector<1x128xf32>
    %89 = vector.broadcast %88 : vector<1x128xf32> to vector<32x128xf32>
    %90 = arith.addf %87, %89 : vector<32x128xf32>
    %cst_83 = arith.constant dense<0.000000e+00> : vector<32x128xf32>
    %91 = tpu.matmul %90, %17, %cst_83 {dimension_numbers = #tpu.dot_dimension_numbers<[1], [0], [0], [1], [0, 0, 1, 1], [], []>} : vector<32x128xf32>, vector<128x128xf32>, vector<32x128xf32> -> vector<32x128xf32>
    %92 = vector.shape_cast %90 : vector<32x128xf32> to vector<2x16x128xf32>
    %c0_84 = arith.constant 0 : index
    %c0_85 = arith.constant 0 : index
    %c1_86 = arith.constant 1 : index
    %c0_87 = arith.constant 0 : index
    %c0_88 = arith.constant 0 : index
    %93 = vector.load %arg11[%c0_84, %c0_85, %c1_86, %c0_87, %c0_88] : memref<2x2x2x16x128xf32, #tpu.memory_space<vmem>>, vector<2x1x1x16x128xf32>
    %94 = vector.shape_cast %93 : vector<2x1x1x16x128xf32> to vector<2x16x128xf32>
    %95 = vector.shape_cast %92 : vector<2x16x128xf32> to vector<2x1x1x16x128xf32>
    tpu.vector_store %arg11[%c0_84, %c0_85, %c1_86, %c0_87, %c0_88], %95 {strides = array<i32>} : memref<2x2x2x16x128xf32, #tpu.memory_space<vmem>>, vector<2x1x1x16x128xf32>,
    %96 = vector.shape_cast %91 : vector<32x128xf32> to vector<2x16x128xf32>
    %c0_89 = arith.constant 0 : index
    %c0_90 = arith.constant 0 : index
    %c1_91 = arith.constant 1 : index
    %c0_92 = arith.constant 0 : index
    %c0_93 = arith.constant 0 : index
    %97 = vector.load %arg12[%c0_89, %c0_90, %c1_91, %c0_92, %c0_93] : memref<2x2x2x16x128xf32, #tpu.memory_space<vmem>>, vector<2x1x1x16x128xf32>
    %98 = vector.shape_cast %97 : vector<2x1x1x16x128xf32> to vector<2x16x128xf32>
    %99 = vector.shape_cast %96 : vector<2x16x128xf32> to vector<2x1x1x16x128xf32>
    tpu.vector_store %arg12[%c0_89, %c0_90, %c1_91, %c0_92, %c0_93], %99 {strides = array<i32>} : memref<2x2x2x16x128xf32, #tpu.memory_space<vmem>>, vector<2x1x1x16x128xf32>,
    %c0_94 = arith.constant 0 : index
    %c1_95 = arith.constant 1 : index
    %c0_96 = arith.constant 0 : index
    %c0_97 = arith.constant 0 : index
    %100 = vector.load %arg10[%c0_94, %c1_95, %c0_96, %c0_97] : memref<2x2x16x128xf32, #tpu.memory_space<vmem>>, vector<1x1x16x128xf32>
    %101 = vector.shape_cast %100 : vector<1x1x16x128xf32> to vector<16x128xf32>
    %102 = vector.shape_cast %101 : vector<16x128xf32> to vector<1x16x128xf32>
    %103 = vector.broadcast %102 : vector<1x16x128xf32> to vector<2x16x128xf32>
    %104 = arith.mulf %92, %103 : vector<2x16x128xf32>
    %cst_98 = arith.constant dense<0.000000e+00> : vector<2x128xf32>
    %105 = vector.multi_reduction <add>, %104, %cst_98 [1] : vector<2x16x128xf32> to vector<2x128xf32>
    %106 = arith.addf %76, %105 : vector<2x128xf32>
    %c1_99 = arith.constant 1 : index
    %c1_100 = arith.constant 1 : index
    %c0_101 = arith.constant 0 : index
    %c0_102 = arith.constant 0 : index
    %107 = vector.load %arg5[%c1_99, %c1_100, %c0_101, %c0_102] : memref<2x2x256x128xf32, #tpu.memory_space<vmem>>, vector<1x1x256x128xf32>
    %108 = vector.shape_cast %107 : vector<1x1x256x128xf32> to vector<256x128xf32>
    %cst_103 = arith.constant dense<0.000000e+00> : vector<32x128xf32>
    %109 = tpu.matmul %14, %108, %cst_103 {dimension_numbers = #tpu.dot_dimension_numbers<[1], [0], [0], [1], [0, 0, 1, 1], [], []>} : vector<32x256xf32>, vector<256x128xf32>, vector<32x128xf32> -> vector<32x128xf32>
    %110 = vector.extract_strided_slice %80 {offsets = [0, 1, 0, 0], sizes = [2, 1, 16, 128], strides = [1, 1, 1, 1]} : vector<2x2x16x128xf32> to vector<2x1x16x128xf32>
    %111 = vector.shape_cast %110 : vector<2x1x16x128xf32> to vector<2x16x128xf32>
    %112 = vector.shape_cast %111 : vector<2x16x128xf32> to vector<32x128xf32>
    %113 = arith.addf %112, %109 : vector<32x128xf32>
    %114 = vector.shape_cast %16 : vector<128xf32> to vector<1x128xf32>
    %115 = vector.broadcast %114 : vector<1x128xf32> to vector<32x128xf32>
    %116 = arith.addf %113, %115 : vector<32x128xf32>
    %cst_104 = arith.constant dense<0.000000e+00> : vector<32x128xf32>
    %117 = tpu.matmul %116, %17, %cst_104 {dimension_numbers = #tpu.dot_dimension_numbers<[1], [0], [0], [1], [0, 0, 1, 1], [], []>} : vector<32x128xf32>, vector<128x128xf32>, vector<32x128xf32> -> vector<32x128xf32>
    %118 = vector.shape_cast %116 : vector<32x128xf32> to vector<2x16x128xf32>
    %c0_105 = arith.constant 0 : index
    %c1_106 = arith.constant 1 : index
    %c1_107 = arith.constant 1 : index
    %c0_108 = arith.constant 0 : index
    %c0_109 = arith.constant 0 : index
    %119 = vector.load %arg11[%c0_105, %c1_106, %c1_107, %c0_108, %c0_109] : memref<2x2x2x16x128xf32, #tpu.memory_space<vmem>>, vector<2x1x1x16x128xf32>
    %120 = vector.shape_cast %119 : vector<2x1x1x16x128xf32> to vector<2x16x128xf32>
    %121 = vector.shape_cast %118 : vector<2x16x128xf32> to vector<2x1x1x16x128xf32>
    tpu.vector_store %arg11[%c0_105, %c1_106, %c1_107, %c0_108, %c0_109], %121 {strides = array<i32>} : memref<2x2x2x16x128xf32, #tpu.memory_space<vmem>>, vector<2x1x1x16x128xf32>,
    %122 = vector.shape_cast %117 : vector<32x128xf32> to vector<2x16x128xf32>
    %c0_110 = arith.constant 0 : index
    %c1_111 = arith.constant 1 : index
    %c1_112 = arith.constant 1 : index
    %c0_113 = arith.constant 0 : index
    %c0_114 = arith.constant 0 : index
    %123 = vector.load %arg12[%c0_110, %c1_111, %c1_112, %c0_113, %c0_114] : memref<2x2x2x16x128xf32, #tpu.memory_space<vmem>>, vector<2x1x1x16x128xf32>
    %124 = vector.shape_cast %123 : vector<2x1x1x16x128xf32> to vector<2x16x128xf32>
    %125 = vector.shape_cast %122 : vector<2x16x128xf32> to vector<2x1x1x16x128xf32>
    tpu.vector_store %arg12[%c0_110, %c1_111, %c1_112, %c0_113, %c0_114], %125 {strides = array<i32>} : memref<2x2x2x16x128xf32, #tpu.memory_space<vmem>>, vector<2x1x1x16x128xf32>,
    %c1_115 = arith.constant 1 : index
    %c1_116 = arith.constant 1 : index
    %c0_117 = arith.constant 0 : index
    %c0_118 = arith.constant 0 : index
    %126 = vector.load %arg10[%c1_115, %c1_116, %c0_117, %c0_118] : memref<2x2x16x128xf32, #tpu.memory_space<vmem>>, vector<1x1x16x128xf32>
    %127 = vector.shape_cast %126 : vector<1x1x16x128xf32> to vector<16x128xf32>
    %128 = vector.shape_cast %127 : vector<16x128xf32> to vector<1x16x128xf32>
    %129 = vector.broadcast %128 : vector<1x16x128xf32> to vector<2x16x128xf32>
    %130 = arith.mulf %118, %129 : vector<2x16x128xf32>
    %cst_119 = arith.constant dense<0.000000e+00> : vector<2x128xf32>
    %131 = vector.multi_reduction <add>, %130, %cst_119 [1] : vector<2x16x128xf32> to vector<2x128xf32>
    %132 = arith.addf %106, %131 : vector<2x128xf32>
    %cst_120 = arith.constant 0.00111111114 : f32
    %133 = vector.broadcast %cst_120 : f32 to vector<2x128xf32>
    %134 = arith.mulf %132, %133 : vector<2x128xf32>
    %c0_121 = arith.constant 0 : index
    %c0_122 = arith.constant 0 : index
    %135 = vector.load %arg8[%c0_121, %c0_122] : memref<128x8xf32, #tpu.memory_space<vmem>>, vector<128x8xf32>
    %cst_123 = arith.constant dense<0.000000e+00> : vector<2x8xf32>
    %136 = tpu.matmul %134, %135, %cst_123 {dimension_numbers = #tpu.dot_dimension_numbers<[1], [0], [0], [1], [0, 0, 1, 1], [], []>} : vector<2x128xf32>, vector<128x8xf32>, vector<2x8xf32> -> vector<2x8xf32>
    %c0_124 = arith.constant 0 : index
    %c0_125 = arith.constant 0 : index
    %137 = vector.load %arg9[%c0_124, %c0_125] : memref<1x8xf32, #tpu.memory_space<vmem>>, vector<1x8xf32>
    %138 = vector.shape_cast %137 : vector<1x8xf32> to vector<8xf32>
    %139 = vector.shape_cast %138 : vector<8xf32> to vector<1x8xf32>
    %140 = vector.broadcast %139 : vector<1x8xf32> to vector<2x8xf32>
    %141 = arith.addf %136, %140 : vector<2x8xf32>
    %c0_126 = arith.constant 0 : index
    %c0_127 = arith.constant 0 : index
    %c0_128 = arith.constant 0 : index
    %142 = vector.load %arg13[%c0_126, %c0_127, %c0_128] : memref<2x1x8xf32, #tpu.memory_space<vmem>>, vector<2x1x8xf32>
    %143 = vector.shape_cast %142 : vector<2x1x8xf32> to vector<2x8xf32>
    %144 = vector.shape_cast %141 : vector<2x8xf32> to vector<2x1x8xf32>
    tpu.vector_store %arg13[%c0_126, %c0_127, %c0_128], %144 {strides = array<i32>} : memref<2x1x8xf32, #tpu.memory_space<vmem>>, vector<2x1x8xf32>,
    return
  }
  func.func @transform_0(%arg0: i32) -> (i32, i32, i32) {
    %c0_i32 = arith.constant 0 : i32
    %c0_i32_0 = arith.constant 0 : i32
    %c0_i32_1 = arith.constant 0 : i32
    return %arg0, %c0_i32, %c0_i32_0 : i32, i32, i32
  }
  func.func @transform_1(%arg0: i32) -> (i32, i32, i32, i32) {
    %c0_i32 = arith.constant 0 : i32
    %c0_i32_0 = arith.constant 0 : i32
    %c0_i32_1 = arith.constant 0 : i32
    %c0_i32_2 = arith.constant 0 : i32
    return %arg0, %c0_i32, %c0_i32_0, %c0_i32_1 : i32, i32, i32, i32
  }
  func.func @transform_2(%arg0: i32) -> (i32, i32) {
    %c0_i32 = arith.constant 0 : i32
    %c0_i32_0 = arith.constant 0 : i32
    %c0_i32_1 = arith.constant 0 : i32
    return %c0_i32, %c0_i32_0 : i32, i32
  }
  func.func @transform_3(%arg0: i32) -> (i32, i32, i32) {
    %c0_i32 = arith.constant 0 : i32
    %c0_i32_0 = arith.constant 0 : i32
    %c0_i32_1 = arith.constant 0 : i32
    %c0_i32_2 = arith.constant 0 : i32
    return %c0_i32, %c0_i32_0, %c0_i32_1 : i32, i32, i32
  }
  func.func @transform_4(%arg0: i32) -> (i32, i32, i32, i32) {
    %c0_i32 = arith.constant 0 : i32
    %c0_i32_0 = arith.constant 0 : i32
    %c0_i32_1 = arith.constant 0 : i32
    %c0_i32_2 = arith.constant 0 : i32
    %c0_i32_3 = arith.constant 0 : i32
    return %c0_i32, %c0_i32_0, %c0_i32_1, %c0_i32_2 : i32, i32, i32, i32
  }
  func.func @transform_5(%arg0: i32) -> (i32, i32) {
    %c0_i32 = arith.constant 0 : i32
    %c0_i32_0 = arith.constant 0 : i32
    %c0_i32_1 = arith.constant 0 : i32
    return %c0_i32, %c0_i32_0 : i32, i32
  }
  func.func @transform_6(%arg0: i32) -> (i32, i32) {
    %c0_i32 = arith.constant 0 : i32
    %c0_i32_0 = arith.constant 0 : i32
    %c0_i32_1 = arith.constant 0 : i32
    return %c0_i32, %c0_i32_0 : i32, i32
  }
  func.func @transform_7(%arg0: i32) -> (i32, i32) {
    %c0_i32 = arith.constant 0 : i32
    %c0_i32_0 = arith.constant 0 : i32
    %c0_i32_1 = arith.constant 0 : i32
    return %c0_i32, %c0_i32_0 : i32, i32
  }
  func.func @transform_8(%arg0: i32) -> (i32, i32) {
    %c0_i32 = arith.constant 0 : i32
    %c0_i32_0 = arith.constant 0 : i32
    %c0_i32_1 = arith.constant 0 : i32
    return %c0_i32, %c0_i32_0 : i32, i32
  }
  func.func @transform_9(%arg0: i32) -> (i32, i32, i32, i32) {
    %c0_i32 = arith.constant 0 : i32
    %c0_i32_0 = arith.constant 0 : i32
    %c0_i32_1 = arith.constant 0 : i32
    %c0_i32_2 = arith.constant 0 : i32
    %c0_i32_3 = arith.constant 0 : i32
    return %c0_i32, %c0_i32_0, %c0_i32_1, %c0_i32_2 : i32, i32, i32, i32
  }
  func.func @transform_10(%arg0: i32) -> (i32, i32, i32, i32, i32) {
    %c0_i32 = arith.constant 0 : i32
    %c0_i32_0 = arith.constant 0 : i32
    %c0_i32_1 = arith.constant 0 : i32
    %c0_i32_2 = arith.constant 0 : i32
    %c0_i32_3 = arith.constant 0 : i32
    return %arg0, %c0_i32, %c0_i32_0, %c0_i32_1, %c0_i32_2 : i32, i32, i32, i32, i32
  }
  func.func @transform_11(%arg0: i32) -> (i32, i32, i32, i32, i32) {
    %c0_i32 = arith.constant 0 : i32
    %c0_i32_0 = arith.constant 0 : i32
    %c0_i32_1 = arith.constant 0 : i32
    %c0_i32_2 = arith.constant 0 : i32
    %c0_i32_3 = arith.constant 0 : i32
    return %arg0, %c0_i32, %c0_i32_0, %c0_i32_1, %c0_i32_2 : i32, i32, i32, i32, i32
  }
  func.func @transform_12(%arg0: i32) -> (i32, i32, i32) {
    %c0_i32 = arith.constant 0 : i32
    %c0_i32_0 = arith.constant 0 : i32
    %c0_i32_1 = arith.constant 0 : i32
    return %arg0, %c0_i32, %c0_i32_0 : i32, i32, i32
  }
}

module attributes {stable_mosaic.version = 11 : i64} {
  func.func @fsr_fused_kernel(%arg0: i32, %arg1: memref<2x16x192xf32, #tpu.memory_space<vmem>>, %arg2: memref<2x2x16x192xf32, #tpu.memory_space<vmem>>, %arg3: memref<192x128xf32, #tpu.memory_space<vmem>>, %arg4: memref<2x192x128xf32, #tpu.memory_space<vmem>>, %arg5: memref<2x2x256x128xf32, #tpu.memory_space<vmem>>, %arg6: memref<1x128xf32, #tpu.memory_space<vmem>>, %arg7: memref<128x128xf32, #tpu.memory_space<vmem>>, %arg8: memref<128x8xf32, #tpu.memory_space<vmem>>, %arg9: memref<1x8xf32, #tpu.memory_space<vmem>>, %arg10: memref<2x2x16x128xf32, #tpu.memory_space<vmem>>, %arg11: memref<2x2x2x16x128xf32, #tpu.memory_space<vmem>>, %arg12: memref<2x2x2x16x128xf32, #tpu.memory_space<vmem>>, %arg13: memref<2x1x8xf32, #tpu.memory_space<vmem>>, %arg14: memref<2x18x256xf32, #tpu.memory_space<vmem>>) attributes {dimension_semantics = [#tpu.dimension_semantics<parallel>], iteration_bounds = array<i64: 1>, scalar_prefetch = 0 : i64, scratch_operands = 1 : i64, tpu.core_type = #tpu.core_type<tc>, window_params = [{transform_indices = @transform_0, window_bounds = array<i64: 2, 16, 192>}, {transform_indices = @transform_1, window_bounds = array<i64: 2, 2, 16, 192>}, {pipeline_mode = #tpu.pipeline_mode<synchronous>, transform_indices = @transform_2, window_bounds = array<i64: 192, 128>}, {pipeline_mode = #tpu.pipeline_mode<synchronous>, transform_indices = @transform_3, window_bounds = array<i64: 2, 192, 128>}, {pipeline_mode = #tpu.pipeline_mode<synchronous>, transform_indices = @transform_4, window_bounds = array<i64: 2, 2, 256, 128>}, {pipeline_mode = #tpu.pipeline_mode<synchronous>, transform_indices = @transform_5, window_bounds = array<i64: 1, 128>}, {pipeline_mode = #tpu.pipeline_mode<synchronous>, transform_indices = @transform_6, window_bounds = array<i64: 128, 128>}, {pipeline_mode = #tpu.pipeline_mode<synchronous>, transform_indices = @transform_7, window_bounds = array<i64: 128, 8>}, {pipeline_mode = #tpu.pipeline_mode<synchronous>, transform_indices = @transform_8, window_bounds = array<i64: 1, 8>}, {pipeline_mode = #tpu.pipeline_mode<synchronous>, transform_indices = @transform_9, window_bounds = array<i64: 2, 2, 16, 128>}, {transform_indices = @transform_10, window_bounds = array<i64: 2, 2, 2, 16, 128>}, {transform_indices = @transform_11, window_bounds = array<i64: 2, 2, 2, 16, 128>}, {transform_indices = @transform_12, window_bounds = array<i64: 2, 1, 8>}]} {
    %c0 = arith.constant 0 : index
    %c0_0 = arith.constant 0 : index
    %c0_1 = arith.constant 0 : index
    %0 = vector.load %arg1[%c0, %c0_0, %c0_1] : memref<2x16x192xf32, #tpu.memory_space<vmem>>, vector<2x16x192xf32>
    %1 = vector.shape_cast %0 : vector<2x16x192xf32> to vector<32x192xf32>
    %c0_2 = arith.constant 0 : index
    %c0_3 = arith.constant 0 : index
    %2 = vector.load %arg3[%c0_2, %c0_3] : memref<192x128xf32, #tpu.memory_space<vmem>>, vector<192x128xf32>
    %cst = arith.constant dense<0.000000e+00> : vector<32x128xf32>
    %3 = tpu.matmul %1, %2, %cst {dimension_numbers = #tpu.dot_dimension_numbers<[1], [0], [0], [1], [0, 0, 1, 1], [], []>} : vector<32x192xf32>, vector<192x128xf32>, vector<32x128xf32> -> vector<32x128xf32>
    %cst_4 = arith.constant 0.000000e+00 : f32
    %4 = vector.broadcast %cst_4 : f32 to vector<32x128xf32>
    %5 = arith.maximumf %3, %4 : vector<32x128xf32>
    %6 = vector.shape_cast %5 : vector<32x128xf32> to vector<2x16x128xf32>
    %cst_5 = arith.constant 0.000000e+00 : f32
    %7 = vector.broadcast %cst_5 : f32 to vector<2x18x256xf32>
    %c0_6 = arith.constant 0 : index
    %c0_7 = arith.constant 0 : index
    %c0_8 = arith.constant 0 : index
    %8 = vector.load %arg14[%c0_6, %c0_7, %c0_8] : memref<2x18x256xf32, #tpu.memory_space<vmem>>, vector<2x18x256xf32>
    tpu.vector_store %arg14[%c0_6, %c0_7, %c0_8], %7 {strides = array<i32>} : memref<2x18x256xf32, #tpu.memory_space<vmem>>, vector<2x18x256xf32>,
    %c0_9 = arith.constant 0 : index
    %c1 = arith.constant 1 : index
    %c0_10 = arith.constant 0 : index
    %9 = vector.load %arg14[%c0_9, %c1, %c0_10] : memref<2x18x256xf32, #tpu.memory_space<vmem>>, vector<2x16x128xf32>
    tpu.vector_store %arg14[%c0_9, %c1, %c0_10], %6 {strides = array<i32>} : memref<2x18x256xf32, #tpu.memory_space<vmem>>, vector<2x16x128xf32>,
    %c0_11 = arith.constant 0 : index
    %c0_12 = arith.constant 0 : index
    %c128 = arith.constant 128 : index
    %10 = vector.load %arg14[%c0_11, %c0_12, %c128] : memref<2x18x256xf32, #tpu.memory_space<vmem>>, vector<2x16x128xf32>
    tpu.vector_store %arg14[%c0_11, %c0_12, %c128], %6 {strides = array<i32>} : memref<2x18x256xf32, #tpu.memory_space<vmem>>, vector<2x16x128xf32>,
    %c0_13 = arith.constant 0 : index
    %c0_14 = arith.constant 0 : index
    %c0_15 = arith.constant 0 : index
    %11 = vector.load %arg14[%c0_13, %c0_14, %c0_15] : memref<2x18x256xf32, #tpu.memory_space<vmem>>, vector<2x16x256xf32>
    %12 = vector.shape_cast %11 : vector<2x16x256xf32> to vector<32x256xf32>
    %c0_16 = arith.constant 0 : index
    %c1_17 = arith.constant 1 : index
    %c0_18 = arith.constant 0 : index
    %13 = vector.load %arg14[%c0_16, %c1_17, %c0_18] : memref<2x18x256xf32, #tpu.memory_space<vmem>>, vector<2x16x256xf32>
    %14 = vector.shape_cast %13 : vector<2x16x256xf32> to vector<32x256xf32>
    %c0_19 = arith.constant 0 : index
    %c0_20 = arith.constant 0 : index
    %15 = vector.load %arg6[%c0_19, %c0_20] : memref<1x128xf32, #tpu.memory_space<vmem>>, vector<1x128xf32>
    %16 = vector.shape_cast %15 : vector<1x128xf32> to vector<128xf32>
    %c0_21 = arith.constant 0 : index
    %c0_22 = arith.constant 0 : index
    %17 = vector.load %arg7[%c0_21, %c0_22] : memref<128x128xf32, #tpu.memory_space<vmem>>, vector<128x128xf32>
    %c0_23 = arith.constant 0 : index
    %c0_24 = arith.constant 0 : index
    %c0_25 = arith.constant 0 : index
    %c0_26 = arith.constant 0 : index
    %18 = vector.load %arg2[%c0_23, %c0_24, %c0_25, %c0_26] : memref<2x2x16x192xf32, #tpu.memory_space<vmem>>, vector<2x2x16x192xf32>
    %19 = vector.shape_cast %18 : vector<2x2x16x192xf32> to vector<64x192xf32>
    %cst_27 = arith.constant 0.000000e+00 : f32
    %20 = vector.broadcast %cst_27 : f32 to vector<2x128xf32>
    %c0_28 = arith.constant 0 : index
    %c0_29 = arith.constant 0 : index
    %c0_30 = arith.constant 0 : index
    %21 = vector.load %arg4[%c0_28, %c0_29, %c0_30] : memref<2x192x128xf32, #tpu.memory_space<vmem>>, vector<1x192x128xf32>
    %22 = vector.shape_cast %21 : vector<1x192x128xf32> to vector<192x128xf32>
    %cst_31 = arith.constant dense<0.000000e+00> : vector<64x128xf32>
    %23 = tpu.matmul %19, %22, %cst_31 {dimension_numbers = #tpu.dot_dimension_numbers<[1], [0], [0], [1], [0, 0, 1, 1], [], []>} : vector<64x192xf32>, vector<192x128xf32>, vector<64x128xf32> -> vector<64x128xf32>
    %24 = vector.shape_cast %23 : vector<64x128xf32> to vector<2x2x16x128xf32>
    %c0_32 = arith.constant 0 : index
    %c0_33 = arith.constant 0 : index
    %c0_34 = arith.constant 0 : index
    %c0_35 = arith.constant 0 : index
    %25 = vector.load %arg5[%c0_32, %c0_33, %c0_34, %c0_35] : memref<2x2x256x128xf32, #tpu.memory_space<vmem>>, vector<1x1x256x128xf32>
    %26 = vector.shape_cast %25 : vector<1x1x256x128xf32> to vector<256x128xf32>
    %cst_36 = arith.constant dense<0.000000e+00> : vector<32x128xf32>
    %27 = tpu.matmul %12, %26, %cst_36 {dimension_numbers = #tpu.dot_dimension_numbers<[1], [0], [0], [1], [0, 0, 1, 1], [], []>} : vector<32x256xf32>, vector<256x128xf32>, vector<32x128xf32> -> vector<32x128xf32>
    %28 = vector.extract_strided_slice %24 {offsets = [0, 0, 0, 0], sizes = [2, 1, 16, 128], strides = [1, 1, 1, 1]} : vector<2x2x16x128xf32> to vector<2x1x16x128xf32>
    %29 = vector.shape_cast %28 : vector<2x1x16x128xf32> to vector<2x16x128xf32>
    %30 = vector.shape_cast %29 : vector<2x16x128xf32> to vector<32x128xf32>
    %31 = arith.addf %30, %27 : vector<32x128xf32>
    %32 = vector.shape_cast %16 : vector<128xf32> to vector<1x128xf32>
    %33 = vector.broadcast %32 : vector<1x128xf32> to vector<32x128xf32>
    %34 = arith.addf %31, %33 : vector<32x128xf32>
    %cst_37 = arith.constant dense<0.000000e+00> : vector<32x128xf32>
    %35 = tpu.matmul %34, %17, %cst_37 {dimension_numbers = #tpu.dot_dimension_numbers<[1], [0], [0], [1], [0, 0, 1, 1], [], []>} : vector<32x128xf32>, vector<128x128xf32>, vector<32x128xf32> -> vector<32x128xf32>
    %36 = vector.shape_cast %34 : vector<32x128xf32> to vector<2x16x128xf32>
    %c0_38 = arith.constant 0 : index
    %c0_39 = arith.constant 0 : index
    %c0_40 = arith.constant 0 : index
    %c0_41 = arith.constant 0 : index
    %c0_42 = arith.constant 0 : index
    %37 = vector.load %arg11[%c0_38, %c0_39, %c0_40, %c0_41, %c0_42] : memref<2x2x2x16x128xf32, #tpu.memory_space<vmem>>, vector<2x1x1x16x128xf32>
    %38 = vector.shape_cast %37 : vector<2x1x1x16x128xf32> to vector<2x16x128xf32>
    %39 = vector.shape_cast %36 : vector<2x16x128xf32> to vector<2x1x1x16x128xf32>
    tpu.vector_store %arg11[%c0_38, %c0_39, %c0_40, %c0_41, %c0_42], %39 {strides = array<i32>} : memref<2x2x2x16x128xf32, #tpu.memory_space<vmem>>, vector<2x1x1x16x128xf32>,
    %40 = vector.shape_cast %35 : vector<32x128xf32> to vector<2x16x128xf32>
    %c0_43 = arith.constant 0 : index
    %c0_44 = arith.constant 0 : index
    %c0_45 = arith.constant 0 : index
    %c0_46 = arith.constant 0 : index
    %c0_47 = arith.constant 0 : index
    %41 = vector.load %arg12[%c0_43, %c0_44, %c0_45, %c0_46, %c0_47] : memref<2x2x2x16x128xf32, #tpu.memory_space<vmem>>, vector<2x1x1x16x128xf32>
    %42 = vector.shape_cast %41 : vector<2x1x1x16x128xf32> to vector<2x16x128xf32>
    %43 = vector.shape_cast %40 : vector<2x16x128xf32> to vector<2x1x1x16x128xf32>
    tpu.vector_store %arg12[%c0_43, %c0_44, %c0_45, %c0_46, %c0_47], %43 {strides = array<i32>} : memref<2x2x2x16x128xf32, #tpu.memory_space<vmem>>, vector<2x1x1x16x128xf32>,
    %c0_48 = arith.constant 0 : index
    %c0_49 = arith.constant 0 : index
    %c0_50 = arith.constant 0 : index
    %c0_51 = arith.constant 0 : index
    %44 = vector.load %arg10[%c0_48, %c0_49, %c0_50, %c0_51] : memref<2x2x16x128xf32, #tpu.memory_space<vmem>>, vector<1x1x16x128xf32>
    %45 = vector.shape_cast %44 : vector<1x1x16x128xf32> to vector<16x128xf32>
    %46 = vector.shape_cast %45 : vector<16x128xf32> to vector<1x16x128xf32>
    %47 = vector.broadcast %46 : vector<1x16x128xf32> to vector<2x16x128xf32>
    %48 = arith.mulf %36, %47 : vector<2x16x128xf32>
    %cst_52 = arith.constant dense<0.000000e+00> : vector<2x128xf32>
    %49 = vector.multi_reduction <add>, %48, %cst_52 [1] : vector<2x16x128xf32> to vector<2x128xf32>
    %50 = arith.addf %20, %49 : vector<2x128xf32>
    %c1_53 = arith.constant 1 : index
    %c0_54 = arith.constant 0 : index
    %c0_55 = arith.constant 0 : index
    %c0_56 = arith.constant 0 : index
    %51 = vector.load %arg5[%c1_53, %c0_54, %c0_55, %c0_56] : memref<2x2x256x128xf32, #tpu.memory_space<vmem>>, vector<1x1x256x128xf32>
    %52 = vector.shape_cast %51 : vector<1x1x256x128xf32> to vector<256x128xf32>
    %cst_57 = arith.constant dense<0.000000e+00> : vector<32x128xf32>
    %53 = tpu.matmul %14, %52, %cst_57 {dimension_numbers = #tpu.dot_dimension_numbers<[1], [0], [0], [1], [0, 0, 1, 1], [], []>} : vector<32x256xf32>, vector<256x128xf32>, vector<32x128xf32> -> vector<32x128xf32>
    %54 = vector.extract_strided_slice %24 {offsets = [0, 1, 0, 0], sizes = [2, 1, 16, 128], strides = [1, 1, 1, 1]} : vector<2x2x16x128xf32> to vector<2x1x16x128xf32>
    %55 = vector.shape_cast %54 : vector<2x1x16x128xf32> to vector<2x16x128xf32>
    %56 = vector.shape_cast %55 : vector<2x16x128xf32> to vector<32x128xf32>
    %57 = arith.addf %56, %53 : vector<32x128xf32>
    %58 = vector.shape_cast %16 : vector<128xf32> to vector<1x128xf32>
    %59 = vector.broadcast %58 : vector<1x128xf32> to vector<32x128xf32>
    %60 = arith.addf %57, %59 : vector<32x128xf32>
    %cst_58 = arith.constant dense<0.000000e+00> : vector<32x128xf32>
    %61 = tpu.matmul %60, %17, %cst_58 {dimension_numbers = #tpu.dot_dimension_numbers<[1], [0], [0], [1], [0, 0, 1, 1], [], []>} : vector<32x128xf32>, vector<128x128xf32>, vector<32x128xf32> -> vector<32x128xf32>
    %62 = vector.shape_cast %60 : vector<32x128xf32> to vector<2x16x128xf32>
    %c0_59 = arith.constant 0 : index
    %c1_60 = arith.constant 1 : index
    %c0_61 = arith.constant 0 : index
    %c0_62 = arith.constant 0 : index
    %c0_63 = arith.constant 0 : index
    %63 = vector.load %arg11[%c0_59, %c1_60, %c0_61, %c0_62, %c0_63] : memref<2x2x2x16x128xf32, #tpu.memory_space<vmem>>, vector<2x1x1x16x128xf32>
    %64 = vector.shape_cast %63 : vector<2x1x1x16x128xf32> to vector<2x16x128xf32>
    %65 = vector.shape_cast %62 : vector<2x16x128xf32> to vector<2x1x1x16x128xf32>
    tpu.vector_store %arg11[%c0_59, %c1_60, %c0_61, %c0_62, %c0_63], %65 {strides = array<i32>} : memref<2x2x2x16x128xf32, #tpu.memory_space<vmem>>, vector<2x1x1x16x128xf32>,
    %66 = vector.shape_cast %61 : vector<32x128xf32> to vector<2x16x128xf32>
    %c0_64 = arith.constant 0 : index
    %c1_65 = arith.constant 1 : index
    %c0_66 = arith.constant 0 : index
    %c0_67 = arith.constant 0 : index
    %c0_68 = arith.constant 0 : index
    %67 = vector.load %arg12[%c0_64, %c1_65, %c0_66, %c0_67, %c0_68] : memref<2x2x2x16x128xf32, #tpu.memory_space<vmem>>, vector<2x1x1x16x128xf32>
    %68 = vector.shape_cast %67 : vector<2x1x1x16x128xf32> to vector<2x16x128xf32>
    %69 = vector.shape_cast %66 : vector<2x16x128xf32> to vector<2x1x1x16x128xf32>
    tpu.vector_store %arg12[%c0_64, %c1_65, %c0_66, %c0_67, %c0_68], %69 {strides = array<i32>} : memref<2x2x2x16x128xf32, #tpu.memory_space<vmem>>, vector<2x1x1x16x128xf32>,
    %c1_69 = arith.constant 1 : index
    %c0_70 = arith.constant 0 : index
    %c0_71 = arith.constant 0 : index
    %c0_72 = arith.constant 0 : index
    %70 = vector.load %arg10[%c1_69, %c0_70, %c0_71, %c0_72] : memref<2x2x16x128xf32, #tpu.memory_space<vmem>>, vector<1x1x16x128xf32>
    %71 = vector.shape_cast %70 : vector<1x1x16x128xf32> to vector<16x128xf32>
    %72 = vector.shape_cast %71 : vector<16x128xf32> to vector<1x16x128xf32>
    %73 = vector.broadcast %72 : vector<1x16x128xf32> to vector<2x16x128xf32>
    %74 = arith.mulf %62, %73 : vector<2x16x128xf32>
    %cst_73 = arith.constant dense<0.000000e+00> : vector<2x128xf32>
    %75 = vector.multi_reduction <add>, %74, %cst_73 [1] : vector<2x16x128xf32> to vector<2x128xf32>
    %76 = arith.addf %50, %75 : vector<2x128xf32>
    %c1_74 = arith.constant 1 : index
    %c0_75 = arith.constant 0 : index
    %c0_76 = arith.constant 0 : index
    %77 = vector.load %arg4[%c1_74, %c0_75, %c0_76] : memref<2x192x128xf32, #tpu.memory_space<vmem>>, vector<1x192x128xf32>
    %78 = vector.shape_cast %77 : vector<1x192x128xf32> to vector<192x128xf32>
    %cst_77 = arith.constant dense<0.000000e+00> : vector<64x128xf32>
    %79 = tpu.matmul %19, %78, %cst_77 {dimension_numbers = #tpu.dot_dimension_numbers<[1], [0], [0], [1], [0, 0, 1, 1], [], []>} : vector<64x192xf32>, vector<192x128xf32>, vector<64x128xf32> -> vector<64x128xf32>
    %80 = vector.shape_cast %79 : vector<64x128xf32> to vector<2x2x16x128xf32>
    %c0_78 = arith.constant 0 : index
    %c1_79 = arith.constant 1 : index
    %c0_80 = arith.constant 0 : index
    %c0_81 = arith.constant 0 : index
    %81 = vector.load %arg5[%c0_78, %c1_79, %c0_80, %c0_81] : memref<2x2x256x128xf32, #tpu.memory_space<vmem>>, vector<1x1x256x128xf32>
    %82 = vector.shape_cast %81 : vector<1x1x256x128xf32> to vector<256x128xf32>
    %cst_82 = arith.constant dense<0.000000e+00> : vector<32x128xf32>
    %83 = tpu.matmul %12, %82, %cst_82 {dimension_numbers = #tpu.dot_dimension_numbers<[1], [0], [0], [1], [0, 0, 1, 1], [], []>} : vector<32x256xf32>, vector<256x128xf32>, vector<32x128xf32> -> vector<32x128xf32>
    %84 = vector.extract_strided_slice %80 {offsets = [0, 0, 0, 0], sizes = [2, 1, 16, 128], strides = [1, 1, 1, 1]} : vector<2x2x16x128xf32> to vector<2x1x16x128xf32>
    %85 = vector.shape_cast %84 : vector<2x1x16x128xf32> to vector<2x16x128xf32>
    %86 = vector.shape_cast %85 : vector<2x16x128xf32> to vector<32x128xf32>
    %87 = arith.addf %86, %83 : vector<32x128xf32>
    %88 = vector.shape_cast %16 : vector<128xf32> to vector<1x128xf32>
    %89 = vector.broadcast %88 : vector<1x128xf32> to vector<32x128xf32>
    %90 = arith.addf %87, %89 : vector<32x128xf32>
    %cst_83 = arith.constant dense<0.000000e+00> : vector<32x128xf32>
    %91 = tpu.matmul %90, %17, %cst_83 {dimension_numbers = #tpu.dot_dimension_numbers<[1], [0], [0], [1], [0, 0, 1, 1], [], []>} : vector<32x128xf32>, vector<128x128xf32>, vector<32x128xf32> -> vector<32x128xf32>
    %92 = vector.shape_cast %90 : vector<32x128xf32> to vector<2x16x128xf32>
    %c0_84 = arith.constant 0 : index
    %c0_85 = arith.constant 0 : index
    %c1_86 = arith.constant 1 : index
    %c0_87 = arith.constant 0 : index
    %c0_88 = arith.constant 0 : index
    %93 = vector.load %arg11[%c0_84, %c0_85, %c1_86, %c0_87, %c0_88] : memref<2x2x2x16x128xf32, #tpu.memory_space<vmem>>, vector<2x1x1x16x128xf32>
    %94 = vector.shape_cast %93 : vector<2x1x1x16x128xf32> to vector<2x16x128xf32>
    %95 = vector.shape_cast %92 : vector<2x16x128xf32> to vector<2x1x1x16x128xf32>
    tpu.vector_store %arg11[%c0_84, %c0_85, %c1_86, %c0_87, %c0_88], %95 {strides = array<i32>} : memref<2x2x2x16x128xf32, #tpu.memory_space<vmem>>, vector<2x1x1x16x128xf32>,
    %96 = vector.shape_cast %91 : vector<32x128xf32> to vector<2x16x128xf32>
    %c0_89 = arith.constant 0 : index
    %c0_90 = arith.constant 0 : index
    %c1_91 = arith.constant 1 : index
    %c0_92 = arith.constant 0 : index
    %c0_93 = arith.constant 0 : index
    %97 = vector.load %arg12[%c0_89, %c0_90, %c1_91, %c0_92, %c0_93] : memref<2x2x2x16x128xf32, #tpu.memory_space<vmem>>, vector<2x1x1x16x128xf32>
    %98 = vector.shape_cast %97 : vector<2x1x1x16x128xf32> to vector<2x16x128xf32>
    %99 = vector.shape_cast %96 : vector<2x16x128xf32> to vector<2x1x1x16x128xf32>
    tpu.vector_store %arg12[%c0_89, %c0_90, %c1_91, %c0_92, %c0_93], %99 {strides = array<i32>} : memref<2x2x2x16x128xf32, #tpu.memory_space<vmem>>, vector<2x1x1x16x128xf32>,
    %c0_94 = arith.constant 0 : index
    %c1_95 = arith.constant 1 : index
    %c0_96 = arith.constant 0 : index
    %c0_97 = arith.constant 0 : index
    %100 = vector.load %arg10[%c0_94, %c1_95, %c0_96, %c0_97] : memref<2x2x16x128xf32, #tpu.memory_space<vmem>>, vector<1x1x16x128xf32>
    %101 = vector.shape_cast %100 : vector<1x1x16x128xf32> to vector<16x128xf32>
    %102 = vector.shape_cast %101 : vector<16x128xf32> to vector<1x16x128xf32>
    %103 = vector.broadcast %102 : vector<1x16x128xf32> to vector<2x16x128xf32>
    %104 = arith.mulf %92, %103 : vector<2x16x128xf32>
    %cst_98 = arith.constant dense<0.000000e+00> : vector<2x128xf32>
    %105 = vector.multi_reduction <add>, %104, %cst_98 [1] : vector<2x16x128xf32> to vector<2x128xf32>
    %106 = arith.addf %76, %105 : vector<2x128xf32>
    %c1_99 = arith.constant 1 : index
    %c1_100 = arith.constant 1 : index
    %c0_101 = arith.constant 0 : index
    %c0_102 = arith.constant 0 : index
    %107 = vector.load %arg5[%c1_99, %c1_100, %c0_101, %c0_102] : memref<2x2x256x128xf32, #tpu.memory_space<vmem>>, vector<1x1x256x128xf32>
    %108 = vector.shape_cast %107 : vector<1x1x256x128xf32> to vector<256x128xf32>
    %cst_103 = arith.constant dense<0.000000e+00> : vector<32x128xf32>
    %109 = tpu.matmul %14, %108, %cst_103 {dimension_numbers = #tpu.dot_dimension_numbers<[1], [0], [0], [1], [0, 0, 1, 1], [], []>} : vector<32x256xf32>, vector<256x128xf32>, vector<32x128xf32> -> vector<32x128xf32>
    %110 = vector.extract_strided_slice %80 {offsets = [0, 1, 0, 0], sizes = [2, 1, 16, 128], strides = [1, 1, 1, 1]} : vector<2x2x16x128xf32> to vector<2x1x16x128xf32>
    %111 = vector.shape_cast %110 : vector<2x1x16x128xf32> to vector<2x16x128xf32>
    %112 = vector.shape_cast %111 : vector<2x16x128xf32> to vector<32x128xf32>
    %113 = arith.addf %112, %109 : vector<32x128xf32>
    %114 = vector.shape_cast %16 : vector<128xf32> to vector<1x128xf32>
    %115 = vector.broadcast %114 : vector<1x128xf32> to vector<32x128xf32>
    %116 = arith.addf %113, %115 : vector<32x128xf32>
    %cst_104 = arith.constant dense<0.000000e+00> : vector<32x128xf32>
    %117 = tpu.matmul %116, %17, %cst_104 {dimension_numbers = #tpu.dot_dimension_numbers<[1], [0], [0], [1], [0, 0, 1, 1], [], []>} : vector<32x128xf32>, vector<128x128xf32>, vector<32x128xf32> -> vector<32x128xf32>
    %118 = vector.shape_cast %116 : vector<32x128xf32> to vector<2x16x128xf32>
    %c0_105 = arith.constant 0 : index
    %c1_106 = arith.constant 1 : index
    %c1_107 = arith.constant 1 : index
    %c0_108 = arith.constant 0 : index
    %c0_109 = arith.constant 0 : index
    %119 = vector.load %arg11[%c0_105, %c1_106, %c1_107, %c0_108, %c0_109] : memref<2x2x2x16x128xf32, #tpu.memory_space<vmem>>, vector<2x1x1x16x128xf32>
    %120 = vector.shape_cast %119 : vector<2x1x1x16x128xf32> to vector<2x16x128xf32>
    %121 = vector.shape_cast %118 : vector<2x16x128xf32> to vector<2x1x1x16x128xf32>
    tpu.vector_store %arg11[%c0_105, %c1_106, %c1_107, %c0_108, %c0_109], %121 {strides = array<i32>} : memref<2x2x2x16x128xf32, #tpu.memory_space<vmem>>, vector<2x1x1x16x128xf32>,
    %122 = vector.shape_cast %117 : vector<32x128xf32> to vector<2x16x128xf32>
    %c0_110 = arith.constant 0 : index
    %c1_111 = arith.constant 1 : index
    %c1_112 = arith.constant 1 : index
    %c0_113 = arith.constant 0 : index
    %c0_114 = arith.constant 0 : index
    %123 = vector.load %arg12[%c0_110, %c1_111, %c1_112, %c0_113, %c0_114] : memref<2x2x2x16x128xf32, #tpu.memory_space<vmem>>, vector<2x1x1x16x128xf32>
    %124 = vector.shape_cast %123 : vector<2x1x1x16x128xf32> to vector<2x16x128xf32>
    %125 = vector.shape_cast %122 : vector<2x16x128xf32> to vector<2x1x1x16x128xf32>
    tpu.vector_store %arg12[%c0_110, %c1_111, %c1_112, %c0_113, %c0_114], %125 {strides = array<i32>} : memref<2x2x2x16x128xf32, #tpu.memory_space<vmem>>, vector<2x1x1x16x128xf32>,
    %c1_115 = arith.constant 1 : index
    %c1_116 = arith.constant 1 : index
    %c0_117 = arith.constant 0 : index
    %c0_118 = arith.constant 0 : index
    %126 = vector.load %arg10[%c1_115, %c1_116, %c0_117, %c0_118] : memref<2x2x16x128xf32, #tpu.memory_space<vmem>>, vector<1x1x16x128xf32>
    %127 = vector.shape_cast %126 : vector<1x1x16x128xf32> to vector<16x128xf32>
    %128 = vector.shape_cast %127 : vector<16x128xf32> to vector<1x16x128xf32>
    %129 = vector.broadcast %128 : vector<1x16x128xf32> to vector<2x16x128xf32>
    %130 = arith.mulf %118, %129 : vector<2x16x128xf32>
    %cst_119 = arith.constant dense<0.000000e+00> : vector<2x128xf32>
    %131 = vector.multi_reduction <add>, %130, %cst_119 [1] : vector<2x16x128xf32> to vector<2x128xf32>
    %132 = arith.addf %106, %131 : vector<2x128xf32>
    %cst_120 = arith.constant 0.00111111114 : f32
    %133 = vector.broadcast %cst_120 : f32 to vector<2x128xf32>
    %134 = arith.mulf %132, %133 : vector<2x128xf32>
    %c0_121 = arith.constant 0 : index
    %c0_122 = arith.constant 0 : index
    %135 = vector.load %arg8[%c0_121, %c0_122] : memref<128x8xf32, #tpu.memory_space<vmem>>, vector<128x8xf32>
    %cst_123 = arith.constant dense<0.000000e+00> : vector<2x8xf32>
    %136 = tpu.matmul %134, %135, %cst_123 {dimension_numbers = #tpu.dot_dimension_numbers<[1], [0], [0], [1], [0, 0, 1, 1], [], []>} : vector<2x128xf32>, vector<128x8xf32>, vector<2x8xf32> -> vector<2x8xf32>
    %c0_124 = arith.constant 0 : index
    %c0_125 = arith.constant 0 : index
    %137 = vector.load %arg9[%c0_124, %c0_125] : memref<1x8xf32, #tpu.memory_space<vmem>>, vector<1x8xf32>
    %138 = vector.shape_cast %137 : vector<1x8xf32> to vector<8xf32>
    %139 = vector.shape_cast %138 : vector<8xf32> to vector<1x8xf32>
    %140 = vector.broadcast %139 : vector<1x8xf32> to vector<2x8xf32>
    %141 = arith.addf %136, %140 : vector<2x8xf32>
    %c0_126 = arith.constant 0 : index
    %c0_127 = arith.constant 0 : index
    %c0_128 = arith.constant 0 : index
    %142 = vector.load %arg13[%c0_126, %c0_127, %c0_128] : memref<2x1x8xf32, #tpu.memory_space<vmem>>, vector<2x1x8xf32>
    %143 = vector.shape_cast %142 : vector<2x1x8xf32> to vector<2x8xf32>
    %144 = vector.shape_cast %141 : vector<2x8xf32> to vector<2x1x8xf32>
    tpu.vector_store %arg13[%c0_126, %c0_127, %c0_128], %144 {strides = array<i32>} : memref<2x1x8xf32, #tpu.memory_space<vmem>>, vector<2x1x8xf32>,
    return
  }
  func.func @transform_0(%arg0: i32) -> (i32, i32, i32) {
    %c0_i32 = arith.constant 0 : i32
    %c0_i32_0 = arith.constant 0 : i32
    %c0_i32_1 = arith.constant 0 : i32
    return %arg0, %c0_i32, %c0_i32_0 : i32, i32, i32
  }
  func.func @transform_1(%arg0: i32) -> (i32, i32, i32, i32) {
    %c0_i32 = arith.constant 0 : i32
    %c0_i32_0 = arith.constant 0 : i32
    %c0_i32_1 = arith.constant 0 : i32
    %c0_i32_2 = arith.constant 0 : i32
    return %arg0, %c0_i32, %c0_i32_0, %c0_i32_1 : i32, i32, i32, i32
  }
  func.func @transform_2(%arg0: i32) -> (i32, i32) {
    %c0_i32 = arith.constant 0 : i32
    %c0_i32_0 = arith.constant 0 : i32
    %c0_i32_1 = arith.constant 0 : i32
    return %c0_i32, %c0_i32_0 : i32, i32
  }
  func.func @transform_3(%arg0: i32) -> (i32, i32, i32) {
    %c0_i32 = arith.constant 0 : i32
    %c0_i32_0 = arith.constant 0 : i32
    %c0_i32_1 = arith.constant 0 : i32
    %c0_i32_2 = arith.constant 0 : i32
    return %c0_i32, %c0_i32_0, %c0_i32_1 : i32, i32, i32
  }
  func.func @transform_4(%arg0: i32) -> (i32, i32, i32, i32) {
    %c0_i32 = arith.constant 0 : i32
    %c0_i32_0 = arith.constant 0 : i32
    %c0_i32_1 = arith.constant 0 : i32
    %c0_i32_2 = arith.constant 0 : i32
    %c0_i32_3 = arith.constant 0 : i32
    return %c0_i32, %c0_i32_0, %c0_i32_1, %c0_i32_2 : i32, i32, i32, i32
  }
  func.func @transform_5(%arg0: i32) -> (i32, i32) {
    %c0_i32 = arith.constant 0 : i32
    %c0_i32_0 = arith.constant 0 : i32
    %c0_i32_1 = arith.constant 0 : i32
    return %c0_i32, %c0_i32_0 : i32, i32
  }
  func.func @transform_6(%arg0: i32) -> (i32, i32) {
    %c0_i32 = arith.constant 0 : i32
    %c0_i32_0 = arith.constant 0 : i32
    %c0_i32_1 = arith.constant 0 : i32
    return %c0_i32, %c0_i32_0 : i32, i32
  }
  func.func @transform_7(%arg0: i32) -> (i32, i32) {
    %c0_i32 = arith.constant 0 : i32
    %c0_i32_0 = arith.constant 0 : i32
    %c0_i32_1 = arith.constant 0 : i32
    return %c0_i32, %c0_i32_0 : i32, i32
  }
  func.func @transform_8(%arg0: i32) -> (i32, i32) {
    %c0_i32 = arith.constant 0 : i32
    %c0_i32_0 = arith.constant 0 : i32
    %c0_i32_1 = arith.constant 0 : i32
    return %c0_i32, %c0_i32_0 : i32, i32
  }
  func.func @transform_9(%arg0: i32) -> (i32, i32, i32, i32) {
    %c0_i32 = arith.constant 0 : i32
    %c0_i32_0 = arith.constant 0 : i32
    %c0_i32_1 = arith.constant 0 : i32
    %c0_i32_2 = arith.constant 0 : i32
    %c0_i32_3 = arith.constant 0 : i32
    return %c0_i32, %c0_i32_0, %c0_i32_1, %c0_i32_2 : i32, i32, i32, i32
  }
  func.func @transform_10(%arg0: i32) -> (i32, i32, i32, i32, i32) {
    %c0_i32 = arith.constant 0 : i32
    %c0_i32_0 = arith.constant 0 : i32
    %c0_i32_1 = arith.constant 0 : i32
    %c0_i32_2 = arith.constant 0 : i32
    %c0_i32_3 = arith.constant 0 : i32
    return %arg0, %c0_i32, %c0_i32_0, %c0_i32_1, %c0_i32_2 : i32, i32, i32, i32, i32
  }
  func.func @transform_11(%arg0: i32) -> (i32, i32, i32, i32, i32) {
    %c0_i32 = arith.constant 0 : i32
    %c0_i32_0 = arith.constant 0 : i32
    %c0_i32_1 = arith.constant 0 : i32
    %c0_i32_2 = arith.constant 0 : i32
    %c0_i32_3 = arith.constant 0 : i32
    return %arg0, %c0_i32, %c0_i32_0, %c0_i32_1, %c0_i32_2 : i32, i32, i32, i32, i32
  }
  func.func @transform_12(%arg0: i32) -> (i32, i32, i32) {
    %c0_i32 = arith.constant 0 : i32
    %c0_i32_0 = arith.constant 0 : i32
    %c0_i32_1 = arith.constant 0 : i32
    return %arg0, %c0_i32, %c0_i32_0 : i32, i32, i32
  }
}

</mosaic_0001>

<bundles_post_ra>
// kernel: tpu_custom_call.1
= control target key start
LH: loop header
LB: loop body
LE: loop exit
PB: predicated region body
PF: predicated region fallthrough
CT: control target
= control target key end

     0   :  { %18 = vsyncpa [#allocation4], 0  ;;  %s3630_s0 = inlined_call_operand.hbm [shape: f32[2,16,192], index: 0, kind: input, shape index: {}]   ;;  %s3631_s1 = inlined_call_operand.vmem [shape: f32[2,2,16,192], index: 1, kind: input, shape index: {}]   ;;  %s3632_s2 = inlined_call_operand.hbm [shape: f32[192,128], index: 2, kind: input, shape index: {}]   ;;  %s3633_s3 = inlined_call_operand.hbm [shape: f32[2,192,128], index: 3, kind: input, shape index: {}]   ;;  %s3634_s4 = inlined_call_operand.hbm [shape: f32[2,2,256,128], index: 4, kind: input, shape index: {}]   ;;  %s3635_s5 = inlined_call_operand.vmem [shape: f32[1,128], index: 5, kind: input, shape index: {}]   ;;  %s3636_s6 = inlined_call_operand.hbm [shape: f32[128,128], index: 6, kind: input, shape index: {}]   ;;  %s3637_s7 = inlined_call_operand.vmem [shape: f32[128,8], index: 7, kind: input, shape index: {}]   ;;  %s3638_s8 = inlined_call_operand.vmem [shape: f32[1,8], index: 8, kind: input, shape index: {}]   ;;  %s3639_s9 = inlined_call_operand.hbm [shape: f32[2,2,16,128], index: 9, kind: input, shape index: {}]   ;;  %s3640_s10 = inlined_call_operand.hbm [shape: f32[2,2,2,16,128], index: 10, kind: output, shape index: {0}]   ;;  %s3641_s11 = inlined_call_operand.hbm [shape: f32[2,2,2,16,128], index: 11, kind: output, shape index: {1}]   ;;  %s3642_s12 = inlined_call_operand.hbm [shape: f32[2,1,8], index: 12, kind: output, shape index: {2}]  }
   0x1   :  { %19 = vsyncpa [#allocation7], 0 }
   0x2   :  { %20 = vsyncpa [#allocation10], 0 }
   0x3   :  { %21 = vsyncpa [#allocation13], 0 }
   0x4   :  { %22 = vsyncpa [#allocation5], 0 }
   0x5   :  { %23 = vsyncpa [#allocation16], 0  ;;  %s2923_s21 = smov [#allocation6]   ;;  %s2713_s25 = scalar_lea.hbm %s3632_s2, 3072 }
   0x6   :  { %s43_s22 = sshll.u32 %s2923_s21, 4  ;;  %p2714_p0 = scmp.ne.s32.totalorder %s3632_s2, %s2713_s25  ;;  %s44_s22 = int_to_ptr.vmem [resolvable:$true] %s43_s22 }
   0x7   :  { %p2717_p1 = scmp.lt.u32.totalorder %s2713_s25, %s3632_s2 }
   0x9   :  { %p2719_p2 = pnand %p2717_p1, %p2714_p0 }
   0xb   :  { %2722 = shalt.err (!%p2719_p2)
}
   0xc   :  { %s2723_s30 = scalar_lea.vmem %s44_s22, 3072  ;;  %p2728_p4 = scmp.lt.s32.totalorder %s44_s22, %s44_s22 }
   0xd   :  { %p2724_p3 = scmp.ne.s32.totalorder %s44_s22, %s2723_s30  ;;  %p2729_p5 = scmp.lt.s32.totalorder %s2723_s30, %s2723_s30 }
   0xf   :  { %p2730_p6 = por %p2729_p5, %p2728_p4 }
  0x11   :  { %p2731_p7 = pnand %p2730_p6, %p2724_p3 }
  0x13   :  { %2734 = shalt.err (!%p2731_p7)
}
  0x14   :  { %s2924_s13 = smov 128   ;;  %s2925_s14 = smov 8  }
  0x15   :  { %49 = dma.hbm_to_vmem [thread:$0]  %s3632_s2, 3072, %s44_s22, [#allocation7], %s2924_s13, %s2924_s13, %s2925_s14  }
  0x16   :  { %s2926_s17 = smov [#allocation9]   ;;  %s2927_s19 = smov [#allocation3]  }
  0x17   :  { %s67_s18 = sshll.u32 %s2926_s17, 4  ;;  %s29_s20 = sshll.u32 %s2927_s19, 4  ;;  %s68_s18 = int_to_ptr.vmem [resolvable:$true] %s67_s18  ;;  %s30_s20 = int_to_ptr.vmem [resolvable:$true] %s29_s20 }
  0x18   :  { %s2735_s24 = scalar_lea.hbm %s3634_s4, 16384 }
  0x19   :  { %p2736_p8 = scmp.ne.s32.totalorder %s3634_s4, %s2735_s24  ;;  %p2739_p9 = scmp.lt.u32.totalorder %s2735_s24, %s3634_s4 }
  0x1b   :  { %p2741_p10 = pnand %p2739_p9, %p2736_p8 }
  0x1d   :  { %2744 = shalt.err (!%p2741_p10)
}
  0x1e   :  { %s2745_s2 = scalar_lea.vmem %s68_s18, 16384  ;;  %p2750_p12 = scmp.lt.s32.totalorder %s68_s18, %s68_s18 }
  0x1f   :  { %p2746_p11 = scmp.ne.s32.totalorder %s68_s18, %s2745_s2  ;;  %p2751_p13 = scmp.lt.s32.totalorder %s2745_s2, %s2745_s2 }
  0x21   :  { %p2752_p0 = por %p2751_p13, %p2750_p12 }
  0x23   :  { %p2753_p1 = pnand %p2752_p0, %p2746_p11 }
  0x25   :  { %2756 = shalt.err (!%p2753_p1)
}
  0x26   :  { %73 = dma.hbm_to_vmem [thread:$0]  %s3634_s4, 16384, %s68_s18, [#allocation10], %s2924_s13, %s2924_s13, %s2925_s14  }
  0x27   :  { %s2757_s16 = scalar_lea.hbm %s3630_s0, 1024 }
  0x28   :  { %p2758_p2 = scmp.ne.s32.totalorder %s3630_s0, %s2757_s16  ;;  %p2761_p3 = scmp.lt.u32.totalorder %s2757_s16, %s3630_s0 }
  0x2a   :  { %p2763_p4 = pnand %p2761_p3, %p2758_p2 }
  0x2c   :  { %2766 = shalt.err (!%p2763_p4)
}
  0x2d   :  { %s2767_s24 = scalar_lea.vmem %s30_s20, 1024  ;;  %p2772_p6 = scmp.lt.s32.totalorder %s30_s20, %s30_s20 }
  0x2e   :  { %p2768_p5 = scmp.ne.s32.totalorder %s30_s20, %s2767_s24  ;;  %p2773_p7 = scmp.lt.s32.totalorder %s2767_s24, %s2767_s24 }
  0x30   :  { %p2774_p8 = por %p2773_p7, %p2772_p6 }
  0x32   :  { %p2775_p9 = pnand %p2774_p8, %p2768_p5 }
  0x34   :  { %2778 = shalt.err (!%p2775_p9)
}
  0x35   :  { %s2928_s4 = smov 256   ;;  %s2929_s18 = smov 16  }
  0x36   :  { %35 = dma.hbm_to_vmem [thread:$0]  %s3630_s0, 1024, %s30_s20, [#allocation4], %s2928_s4, %s2928_s4, %s2929_s18  }
  0x37   :  { %s2930_s27 = smov [#allocation8]   ;;  %s2931_s2 = smov [#allocation11]  }
  0x38   :  { %s55_s28 = sshll.u32 %s2930_s27, 4  ;;  %s81_s22 = sshll.u32 %s2931_s2, 4  ;;  %s56_s28 = int_to_ptr.vmem [resolvable:$true] %s55_s28  ;;  %s82_s22 = int_to_ptr.vmem [resolvable:$true] %s81_s22 }
  0x39   :  { %s2779_s15 = scalar_lea.hbm %s3633_s3, 6144 }
  0x3a   :  { %p2780_p10 = scmp.ne.s32.totalorder %s3633_s3, %s2779_s15  ;;  %p2783_p11 = scmp.lt.u32.totalorder %s2779_s15, %s3633_s3 }
  0x3c   :  { %p2785_p12 = pnand %p2783_p11, %p2780_p10 }
  0x3e   :  { %2788 = shalt.err (!%p2785_p12)
}
  0x3f   :  { %s2789_s0 = scalar_lea.vmem %s56_s28, 6144  ;;  %p2794_p0 = scmp.lt.s32.totalorder %s56_s28, %s56_s28 }
  0x40   :  { %p2790_p13 = scmp.ne.s32.totalorder %s56_s28, %s2789_s0  ;;  %p2795_p1 = scmp.lt.s32.totalorder %s2789_s0, %s2789_s0 }
  0x42   :  { %p2796_p2 = por %p2795_p1, %p2794_p0 }
  0x44   :  { %p2797_p3 = pnand %p2796_p2, %p2790_p13 }
  0x46   :  { %2800 = shalt.err (!%p2797_p3)
}
  0x47   :  { %61 = dma.hbm_to_vmem [thread:$0]  %s3633_s3, 6144, %s56_s28, [#allocation7], %s2924_s13, %s2924_s13, %s2925_s14  }
  0x48   :  { %s2801_s25 = scalar_lea.hbm %s3636_s6, 2048 }
  0x49   :  { %p2802_p4 = scmp.ne.s32.totalorder %s3636_s6, %s2801_s25  ;;  %p2805_p5 = scmp.lt.u32.totalorder %s2801_s25, %s3636_s6 }
  0x4b   :  { %p2807_p6 = pnand %p2805_p5, %p2802_p4 }
  0x4d   :  { %2810 = shalt.err (!%p2807_p6)
}
  0x4e   :  { %s2811_s30 = scalar_lea.vmem %s82_s22, 2048  ;;  %p2816_p8 = scmp.lt.s32.totalorder %s82_s22, %s82_s22 }
  0x4f   :  { %p2812_p7 = scmp.ne.s32.totalorder %s82_s22, %s2811_s30  ;;  %p2817_p9 = scmp.lt.s32.totalorder %s2811_s30, %s2811_s30 }
  0x51   :  { %p2818_p10 = por %p2817_p9, %p2816_p8 }
  0x53   :  { %p2819_p11 = pnand %p2818_p10, %p2812_p7 }
  0x55   :  { %2822 = shalt.err (!%p2819_p11)
}
  0x56   :  { %87 = dma.hbm_to_vmem [thread:$0]  %s3636_s6, 2048, %s82_s22, [#allocation10], %s2924_s13, %s2924_s13, %s2925_s14  }
  0x57   :  { %s2932_s15 = smov [#allocation12]   ;;  %s2823_s21 = scalar_lea.hbm %s3639_s9, 1024 }
  0x58   :  { %s97_s16 = sshll.u32 %s2932_s15, 4  ;;  %p2824_p12 = scmp.ne.s32.totalorder %s3639_s9, %s2823_s21  ;;  %s98_s16 = int_to_ptr.vmem [resolvable:$true] %s97_s16 }
  0x59   :  { %p2827_p13 = scmp.lt.u32.totalorder %s2823_s21, %s3639_s9 }
  0x5b   :  { %p2829_p0 = pnand %p2827_p13, %p2824_p12 }
  0x5d   :  { %2832 = shalt.err (!%p2829_p0)
}
  0x5e   :  { %s2833_s4 = scalar_lea.vmem %s98_s16, 1024  ;;  %p2838_p2 = scmp.lt.s32.totalorder %s98_s16, %s98_s16 }
  0x5f   :  { %p2834_p1 = scmp.ne.s32.totalorder %s98_s16, %s2833_s4  ;;  %p2839_p3 = scmp.lt.s32.totalorder %s2833_s4, %s2833_s4 }
  0x61   :  { %p2840_p4 = por %p2839_p3, %p2838_p2 }
  0x63   :  { %p2841_p5 = pnand %p2840_p4, %p2834_p1 }
  0x65   :  { %2844 = shalt.err (!%p2841_p5)
}
  0x66   :  { %103 = dma.hbm_to_vmem [thread:$0]  %s3639_s9, 1024, %s98_s16, [#allocation13], %s2924_s13, %s2924_s13, %s2925_s14  }
  0x67   :  { %2911 = dma.done.wait [#allocation4], 1024  }
  0x68   :  { %2912 = vsyncadd [#allocation4], 4294966272 }
  0x69   :  { %2913 = dma.done.wait [#allocation7], 9216  }
  0x6a   :  { %2914 = vsyncadd [#allocation7], 4294958080 }
  0x6b   :  { %2915 = dma.done.wait [#allocation10], 18432  }
  0x6c   :  { %2916 = vsyncadd [#allocation10], 4294948864 }
  0x6d   :  { %2917 = dma.done.wait [#allocation13], 1024  }
  0x6e   :  { %2918 = vsyncadd [#allocation13], 4294966272  ;;  %v2933_v0 = vmov 0.0|0.0   ;;  %v130_v1 = vld [vmem:[#allocation6] sm:$0xff]  ;;  %v131_v2 = vld [vmem:[#allocation6 + $0x8] sm:$0xff]  ;;  %vm154_vm0 = vcmask 523264  }
  0x6f   :  { %2307 = vmatprep.subr.bf16.mxu0 %v2933_v0  ;;  %2343 = vmatprep.subr.bf16.mxu1 %v2933_v0  ;;  %v132_v3 = vld [vmem:[#allocation6 + $0x10] sm:$0xff]  ;;  %v2308_v4 = vpack.c.bf16 %v131_v2, %v130_v1  ;;  %v133_v5 = vld [vmem:[#allocation6 + $0x18] sm:$0xff]  ;;  %v134_v7 = vld [vmem:[#allocation6 + $0x20] sm:$0xff]  ;;  %vm272_vm1 = vcmask 1040384   ;;  %vm323_vm2 = vcmask 1046528   ;;  %vm2935_vm3 = vmmov 0  }
  0x70   :  { %v2311_v6 = vpack.c.bf16 %v133_v5, %v132_v3  ;;  %v135_v8 = vld [vmem:[#allocation6 + $0x28] sm:$0xff]  ;;  %v136_v10 = vld [vmem:[#allocation6 + $0x30] sm:$0xff]  ;;  %v137_v11 = vld [vmem:[#allocation6 + $0x38] sm:$0xff]  ;;  %vm1673_vm4 = vcmask 1041409  }
  0x71   :  { %2309 = vmatpush1.bf16.msra.mxu0 %v2308_v4  ;;  %v2314_v9 = vpack.c.bf16 %v135_v8, %v134_v7  ;;  %v123_v12 = vld [vmem:[#allocation3 + $0x8] sm:$0xff]  ;;  %v385_v13 = vld [vmem:[#allocation8] sm:$0xff]  ;;  %v2317_v14 = vpack.c.bf16 %v137_v11, %v136_v10  ;;  %v387_v16 = vld [vmem:[#allocation8 + $0x10] sm:$0xff] }
  0x72   :  { %2310 = vmatprep.subr.bf16.mxu0 %v2933_v0  ;;  %1825 = vmatprep.mubr.msk.f32.mxu0 %vm154_vm0, %v123_v12  ;;  %v386_v15 = vld [vmem:[#allocation8 + $0x8] sm:$0xff]  ;;  %v388_v17 = vld [vmem:[#allocation8 + $0x18] sm:$0xff]  ;;  %v138_v18 = vld [vmem:[#allocation6 + $0x40] sm:$0xff] }
  0x73   :  { %v139_v19 = vld [vmem:[#allocation6 + $0x48] sm:$0xff]  ;;  %v2344_v20 = vpack.c.bf16 %v386_v15, %v385_v13  ;;  %v2347_v21 = vpack.c.bf16 %v388_v17, %v387_v16  ;;  %v389_v23 = vld [vmem:[#allocation8 + $0x20] sm:$0xff]  ;;  %v140_v25 = vld [vmem:[#allocation6 + $0x50] sm:$0xff] }
  0x74   :  { %v2320_v22 = vpack.c.bf16 %v139_v19, %v138_v18  ;;  %v390_v24 = vld [vmem:[#allocation8 + $0x28] sm:$0xff]  ;;  %v141_v26 = vld [vmem:[#allocation6 + $0x58] sm:$0xff]  ;;  %v391_v29 = vld [vmem:[#allocation8 + $0x30] sm:$0xff] }
  0x75   :  { %2312 = vmatpush1.bf16.msra.mxu0 %v2311_v6  ;;  %2345 = vmatpush1.bf16.msra.mxu1 %v2344_v20  ;;  %v2350_v27 = vpack.c.bf16 %v390_v24, %v389_v23  ;;  %v2323_v28 = vpack.c.bf16 %v141_v26, %v140_v25  ;;  %v392_v30 = vld [vmem:[#allocation8 + $0x38] sm:$0xff]  ;;  %v142_v31 = vld [vmem:[#allocation6 + $0x60] sm:$0xff]  ;;  %v143_v32 = vld [vmem:[#allocation6 + $0x68] sm:$0xff] }
  0x76   :  { %2313 = vmatprep.subr.bf16.mxu0 %v2933_v0  ;;  %2346 = vmatprep.subr.bf16.mxu1 %v2933_v0  ;;  %v2353_v33 = vpack.c.bf16 %v392_v30, %v391_v29  ;;  %v2326_v34 = vpack.c.bf16 %v143_v32, %v142_v31  ;;  %v393_v35 = vld [vmem:[#allocation8 + $0x40] sm:$0xff]  ;;  %v394_v36 = vld [vmem:[#allocation8 + $0x48] sm:$0xff]  ;;  %v144_v37 = vld [vmem:[#allocation6 + $0x70] sm:$0xff] }
  0x77   :  { %v145_v38 = vld [vmem:[#allocation6 + $0x78] sm:$0xff]  ;;  %v2356_v39 = vpack.c.bf16 %v394_v36, %v393_v35  ;;  %v395_v41 = vld [vmem:[#allocation8 + $0x50] sm:$0xff]  ;;  %v146_v43 = vld [vmem:[#allocation6 + $0x80] sm:$0xff] }
  0x78   :  { %v2329_v40 = vpack.c.bf16 %v145_v38, %v144_v37  ;;  %v396_v42 = vld [vmem:[#allocation8 + $0x58] sm:$0xff]  ;;  %v147_v44 = vld [vmem:[#allocation6 + $0x88] sm:$0xff]  ;;  %v397_v47 = vld [vmem:[#allocation8 + $0x60] sm:$0xff] }
  0x79   :  { %2315 = vmatpush1.bf16.msra.mxu0 %v2314_v9  ;;  %2348 = vmatpush1.bf16.msra.mxu1 %v2347_v21  ;;  %v2359_v45 = vpack.c.bf16 %v396_v42, %v395_v41  ;;  %v2332_v46 = vpack.c.bf16 %v147_v44, %v146_v43  ;;  %v398_v48 = vld [vmem:[#allocation8 + $0x68] sm:$0xff]  ;;  %v148_v49 = vld [vmem:[#allocation6 + $0x90] sm:$0xff]  ;;  %v149_v50 = vld [vmem:[#allocation6 + $0x98] sm:$0xff] }
  0x7a   :  { %2316 = vmatprep.subr.bf16.mxu0 %v2933_v0  ;;  %2349 = vmatprep.subr.bf16.mxu1 %v2933_v0  ;;  %v2362_v51 = vpack.c.bf16 %v398_v48, %v397_v47  ;;  %v2335_v52 = vpack.c.bf16 %v149_v50, %v148_v49  ;;  %v399_v53 = vld [vmem:[#allocation8 + $0x70] sm:$0xff]  ;;  %v400_v54 = vld [vmem:[#allocation8 + $0x78] sm:$0xff]  ;;  %v150_v55 = vld [vmem:[#allocation6 + $0xa0] sm:$0xff] }
  0x7b   :  { %v151_v56 = vld [vmem:[#allocation6 + $0xa8] sm:$0xff]  ;;  %v2365_v57 = vpack.c.bf16 %v400_v54, %v399_v53  ;;  %v401_v59 = vld [vmem:[#allocation8 + $0x80] sm:$0xff]  ;;  %v152_v61 = vld [vmem:[#allocation6 + $0xb0] sm:$0xff]  ;;  %v2934_v53 = vmov 0.0  }
  0x7c   :  { %v2338_v58 = vpack.c.bf16 %v151_v56, %v150_v55  ;;  %v402_v60 = vld [vmem:[#allocation8 + $0x88] sm:$0xff]  ;;  %v153_v62 = vld [vmem:[#allocation6 + $0xb8] sm:$0xff]  ;;  %v554_v63 = vld [vmem:[#allocation9 + $0x80] sm:$0xff]  ;;  %256 = vst [vmem:[#allocation2] sm:$0xff] %v2934_v53 }
  0x7d   :  { %2318 = vmatpush1.bf16.msra.mxu0 %v2317_v14  ;;  %2351 = vmatpush1.bf16.msra.mxu1 %v2350_v27  ;;  %v555_v1 = vld [vmem:[#allocation9 + $0x88] sm:$0xff]  ;;  %v2368_v2 = vpack.c.bf16 %v402_v60, %v401_v59  ;;  %v2341_v3 = vpack.c.bf16 %v153_v62, %v152_v61  ;;  %v538_v5 = vld [vmem:[#allocation9] sm:$0xff]  ;;  %v556_v7 = vld [vmem:[#allocation9 + $0x90] sm:$0xff]  ;;  %260 = vst [vmem:[#allocation2 + $0x20] sm:$0x3] %v2934_v53 }
  0x7e   :  { %2319 = vmatprep.subr.bf16.mxu0 %v2933_v0  ;;  %2352 = vmatprep.subr.bf16.mxu1 %v2933_v0  ;;  %v2379_v4 = vpack.c.bf16 %v555_v1, %v554_v63  ;;  %v539_v6 = vld [vmem:[#allocation9 + $0x8] sm:$0xff]  ;;  %v557_v8 = vld [vmem:[#allocation9 + $0x98] sm:$0xff]  ;;  %v122_v9 = vld [vmem:[#allocation3] sm:$0xff]  ;;  %261 = vst [vmem:[#allocation2 + $0x28] sm:$0x3] %v2934_v53 }
  0x7f   :  { %v2381_v10 = vpack.c.bf16 %v539_v6, %v538_v5  ;;  %v125_v11 = vld [vmem:[#allocation3 + $0x18] sm:$0xff]  ;;  %v2383_v12 = vpack.c.bf16 %v557_v8, %v556_v7  ;;  %v540_v13 = vld [vmem:[#allocation9 + $0x10] sm:$0xff]  ;;  %v558_v15 = vld [vmem:[#allocation9 + $0xa0] sm:$0xff]  ;;  %262 = vst [vmem:[#allocation2 + $0x30] sm:$0xff] %v2934_v53 }
  0x80   :  { %v541_v14 = vld [vmem:[#allocation9 + $0x18] sm:$0xff]  ;;  %v559_v16 = vld [vmem:[#allocation9 + $0xa8] sm:$0xff]  ;;  %v124_v17 = vld [vmem:[#allocation3 + $0x10] sm:$0xff]  ;;  %266 = vst [vmem:[#allocation2 + $0x50] sm:$0x3] %v2934_v53 }
  0x81   :  { %2321 = vmatpush1.bf16.msra.mxu0 %v2320_v22  ;;  %2354 = vmatpush1.bf16.msra.mxu1 %v2353_v33  ;;  %v2385_v18 = vpack.c.bf16 %v541_v14, %v540_v13  ;;  %v127_v19 = vld [vmem:[#allocation3 + $0x28] sm:$0xff]  ;;  %v2387_v20 = vpack.c.bf16 %v559_v16, %v558_v15  ;;  %v542_v21 = vld [vmem:[#allocation9 + $0x20] sm:$0xff]  ;;  %v560_v23 = vld [vmem:[#allocation9 + $0xb0] sm:$0xff]  ;;  %267 = vst [vmem:[#allocation2 + $0x58] sm:$0x3] %v2934_v53 }
  0x82   :  { %2322 = vmatprep.subr.bf16.mxu0 %v2933_v0  ;;  %2355 = vmatprep.subr.bf16.mxu1 %v2933_v0  ;;  %v543_v22 = vld [vmem:[#allocation9 + $0x28] sm:$0xff]  ;;  %v561_v24 = vld [vmem:[#allocation9 + $0xb8] sm:$0xff]  ;;  %v126_v25 = vld [vmem:[#allocation3 + $0x20] sm:$0xff] }
  0x83   :  { %v2389_v26 = vpack.c.bf16 %v543_v22, %v542_v21  ;;  %v129_v27 = vld [vmem:[#allocation3 + $0x38] sm:$0xff]  ;;  %v544_v29 = vld [vmem:[#allocation9 + $0x30] sm:$0xff]  ;;  %v562_v31 = vld [vmem:[#allocation9 + $0xc0] sm:$0xff] }
  0x84   :  { %v545_v30 = vld [vmem:[#allocation9 + $0x38] sm:$0xff]  ;;  %v563_v32 = vld [vmem:[#allocation9 + $0xc8] sm:$0xff]  ;;  %v128_v33 = vld [vmem:[#allocation3 + $0x30] sm:$0xff] }
  0x85   :  { %2324 = vmatpush1.bf16.msra.mxu0 %v2323_v28  ;;  %2357 = vmatpush1.bf16.msra.mxu1 %v2356_v39  ;;  %v2391_v28 = vpack.c.bf16 %v561_v24, %v560_v23  ;;  %v2395_v35 = vpack.c.bf16 %v563_v32, %v562_v31  ;;  %v546_v36 = vld [vmem:[#allocation9 + $0x40] sm:$0xff]  ;;  %v547_v37 = vld [vmem:[#allocation9 + $0x48] sm:$0xff]  ;;  %v403_v39 = vld [vmem:[#allocation8 + $0x90] sm:$0xff] }
  0x86   :  { %2325 = vmatprep.subr.bf16.mxu0 %v2933_v0  ;;  %2358 = vmatprep.subr.bf16.mxu1 %v2933_v0  ;;  %v2397_v38 = vpack.c.bf16 %v547_v37, %v546_v36  ;;  %v564_v42 = vld [vmem:[#allocation9 + $0xd0] sm:$0xff]  ;;  %v565_v43 = vld [vmem:[#allocation9 + $0xd8] sm:$0xff]  ;;  %v405_v47 = vld [vmem:[#allocation8 + $0xa0] sm:$0xff] }
  0x87   :  { %v2399_v44 = vpack.c.bf16 %v565_v43, %v564_v42  ;;  %v406_v49 = vld [vmem:[#allocation8 + $0xa8] sm:$0xff]  ;;  %v550_v55 = vld [vmem:[#allocation9 + $0x60] sm:$0xff]  ;;  %v408_v59 = vld [vmem:[#allocation8 + $0xb8] sm:$0xff] }
  0x88   :  { %v2374_v50 = vpack.c.bf16 %v406_v49, %v405_v47  ;;  %v551_v56 = vld [vmem:[#allocation9 + $0x68] sm:$0xff]  ;;  %v568_v61 = vld [vmem:[#allocation9 + $0xf0] sm:$0xff]  ;;  %v569_v62 = vld [vmem:[#allocation9 + $0xf8] sm:$0xff] }
  0x89   :  { %2327 = vmatpush1.bf16.msra.mxu0 %v2326_v34  ;;  %2360 = vmatpush1.bf16.msra.mxu1 %v2359_v45  ;;  %v2393_v34 = vpack.c.bf16 %v545_v30, %v544_v29  ;;  %v548_v45 = vld [vmem:[#allocation9 + $0x50] sm:$0xff]  ;;  %v2407_v63 = vpack.c.bf16 %v569_v62, %v568_v61  ;;  %v3138_v5 = vld [vmem:[%s3631_s1] sm:$0xff]  ;;  %v802_v7 = vld [vmem:[#allocation9 + $0x288] sm:$0xff] }
  0x8a   :  { %2328 = vmatprep.subr.bf16.mxu0 %v2933_v0  ;;  %2361 = vmatprep.subr.bf16.mxu1 %v2933_v0  ;;  %v552_v1 = vld [vmem:[#allocation9 + $0x70] sm:$0xff]  ;;  %v801_v6 = vld [vmem:[#allocation9 + $0x280] sm:$0xff]  ;;  %v3170_v13 = vld [vmem:[%s3631_s1 + $0x38] sm:$0xff] }
  0x8b   :  { %v2443_v8 = vpack.c.bf16 %v802_v7, %v801_v6  ;;  %v3177_v14 = vld [vmem:[%s3631_s1 + $0x30] sm:$0xff]  ;;  %v3183_v15 = vld [vmem:[%s3631_s1 + $0x48] sm:$0xff]  ;;  %v3190_v16 = vld [vmem:[%s3631_s1 + $0x40] sm:$0xff] }
  0x8c   :  { %v3222_v21 = vld [vmem:[%s3631_s1 + $0x78] sm:$0xff]  ;;  %v3227_v22 = vld [vmem:[%s3631_s1 + $0x70] sm:$0xff]  ;;  %v785_v31 = vld [vmem:[#allocation9 + $0x200] sm:$0xff] }
  0x8d   :  { %2330 = vmatpush1.bf16.msra.mxu0 %v2329_v40  ;;  %2363 = vmatpush1.bf16.msra.mxu1 %v2362_v51  ;;  %v404_v40 = vld [vmem:[#allocation8 + $0x98] sm:$0xff]  ;;  %v566_v51 = vld [vmem:[#allocation9 + $0xe0] sm:$0xff]  ;;  %v786_v32 = vld [vmem:[#allocation9 + $0x208] sm:$0xff] }
  0x8e   :  { %2331 = vmatprep.subr.bf16.mxu0 %v2933_v0  ;;  %2364 = vmatprep.subr.bf16.mxu1 %v2933_v0  ;;  %v2371_v41 = vpack.c.bf16 %v404_v40, %v403_v39  ;;  %v353_v39 = vld [vmem:[#allocation11] sm:$0xff]  ;;  %v354_v40 = vld [vmem:[#allocation11 + $0x8] sm:$0xff]  ;;  %v2445_v42 = vpack.c.bf16 %v786_v32, %v785_v31  ;;  %v787_v43 = vld [vmem:[#allocation9 + $0x210] sm:$0xff] }
  0x8f   :  { %v805_v49 = vld [vmem:[#allocation9 + $0x2a0] sm:$0xff]  ;;  %v359_v6 = vld [vmem:[#allocation11 + $0x30] sm:$0xff]  ;;  %v360_v7 = vld [vmem:[#allocation11 + $0x38] sm:$0xff] }
  0x90   :  { %v789_v62 = vld [vmem:[#allocation9 + $0x220] sm:$0xff]  ;;  %v810_v31 = vld [vmem:[#allocation9 + $0x2c8] sm:$0xff]  ;;  %v3270_v32 = vpack.c.bf16 %v360_v7, %v359_v6  ;;  %v799_v7 = vld [vmem:[#allocation9 + $0x270] sm:$0xff] }
  0x91   :  { %2333 = vmatpush1.bf16.msra.mxu0 %v2332_v46  ;;  %2366 = vmatpush1.bf16.msra.mxu1 %v2365_v57  ;;  %v549_v46 = vld [vmem:[#allocation9 + $0x58] sm:$0xff]  ;;  %v407_v57 = vld [vmem:[#allocation8 + $0xb0] sm:$0xff] }
  0x92   :  { %2334 = vmatprep.subr.bf16.mxu0 %v2933_v0  ;;  %2367 = vmatprep.subr.bf16.mxu1 %v2933_v0  ;;  %v2401_v48 = vpack.c.bf16 %v549_v46, %v548_v45  ;;  %v2377_v60 = vpack.c.bf16 %v408_v59, %v407_v57  ;;  %v356_v45 = vld [vmem:[#allocation11 + $0x18] sm:$0xff] }
  0x95   :  { %2336 = vmatpush1.bf16.msra.mxu0 %v2335_v52  ;;  %2369 = vmatpush1.bf16.msra.mxu1 %v2368_v2  ;;  %v567_v52 = vld [vmem:[#allocation9 + $0xe8] sm:$0xff]  ;;  %v553_v2 = vld [vmem:[#allocation9 + $0x78] sm:$0xff] }
  0x96   :  { %2337 = vmatprep.subr.bf16.mxu0 %v2933_v0  ;;  %2370 = vmatprep.subr.bf16.mxu1 %v2933_v0  ;;  %v2403_v54 = vpack.c.bf16 %v567_v52, %v566_v51 }
  0x99   :  { %2339 = vmatpush1.bf16.msra.mxu0 %v2338_v58  ;;  %2372 = vmatpush1.bf16.msra.mxu1 %v2371_v41  ;;  %v2405_v58 = vpack.c.bf16 %v551_v56, %v550_v55  ;;  %v355_v41 = vld [vmem:[#allocation11 + $0x10] sm:$0xff]  ;;  %v357_v55 = vld [vmem:[#allocation11 + $0x20] sm:$0xff]  ;;  %v358_v56 = vld [vmem:[#allocation11 + $0x28] sm:$0xff] }
  0x9a   :  { %2340 = vmatprep.subr.bf16.mxu0 %v2933_v0  ;;  %2373 = vmatprep.subr.bf16.mxu1 %v2933_v0  ;;  %v3249_v51 = vpack.c.bf16 %v356_v45, %v355_v41 }
  0x9d   :  { %2342 = vmatpush1.bf16.msra.mxu0 %v2341_v3  ;;  %2375 = vmatpush1.bf16.msra.mxu1 %v2374_v50  ;;  %v3131_v3 = vld [vmem:[%s3631_s1 + $0x8] sm:$0xff] }
  0x9e   :  { %2380 = vmatprep.subr.bf16.mxu0 %v2379_v4  ;;  %2376 = vmatprep.subr.bf16.mxu1 %v2933_v0  ;;  %v2409_v4 = vpack.c.bf16 %v553_v2, %v552_v1  ;;  %v806_v50 = vld [vmem:[#allocation9 + $0x2a8] sm:$0xff]  ;;  %v807_v1 = vld [vmem:[#allocation9 + $0x2b0] sm:$0xff]  ;;  %v3261_v2 = vpack.c.bf16 %v358_v56, %v357_v55  ;;  %v796_v55 = vld [vmem:[#allocation9 + $0x258] sm:$0xff] }
  0x9f   :  { %1829 = vmatprep.mubr.msk.f32.mxu1 %vm154_vm0, %v3131_v3  ;;  %v2451_v61 = vpack.c.bf16 %v806_v50, %v805_v49  ;;  %v813_v56 = vld [vmem:[#allocation9 + $0x2e0] sm:$0xff] }
  0xa0   :  { %232 = vmatmul.mubr.f32.vlgmr.msra.gmra.mrb[0].mxu0 %v122_v9  ;;  %v3144_v9 = vld [vmem:[%s3631_s1 + $0x18] sm:$0xff] }
  0xa1   :  { %1826 = vmatprep.mubr.msk.f32.mxu0 %vm154_vm0, %v125_v11  ;;  %2382 = vmatpush3.bf16.msra.mxu0 %v2381_v10  ;;  %v3151_v10 = vld [vmem:[%s3631_s1 + $0x10] sm:$0xff]  ;;  %v3157_v11 = vld [vmem:[%s3631_s1 + $0x28] sm:$0xff] }
  0xa2   :  { %2384 = vmatprep.subr.bf16.mxu0 %v2383_v12  ;;  %2378 = vmatpush1.bf16.msra.mxu1 %v2377_v60  ;;  %v3164_v12 = vld [vmem:[%s3631_s1 + $0x20] sm:$0xff] }
  0xa4   :  { %237 = vmatmul.mubr.f32.gmra.mrb[2].mxu0 %v124_v17  ;;  %v3196_v17 = vld [vmem:[%s3631_s1 + $0x58] sm:$0xff] }
  0xa5   :  { %1827 = vmatprep.mubr.msk.f32.mxu0 %vm154_vm0, %v127_v19  ;;  %2386 = vmatpush3.bf16.msra.mxu0 %v2385_v18  ;;  %v3203_v18 = vld [vmem:[%s3631_s1 + $0x50] sm:$0xff]  ;;  %v3209_v19 = vld [vmem:[%s3631_s1 + $0x68] sm:$0xff] }
  0xa6   :  { %2388 = vmatprep.subr.bf16.mxu0 %v2387_v20  ;;  %498 = vmatmul.mubr.f32.vlgmr.msra.gmra.mrb[0].mxu1 %v3138_v5  ;;  %v3214_v20 = vld [vmem:[%s3631_s1 + $0x60] sm:$0xff] }
  0xa7   :  { %1830 = vmatprep.mubr.msk.f32.mxu1 %vm154_vm0, %v3144_v9 }
  0xa8   :  { %242 = vmatmul.mubr.f32.gmra.mrb[4].mxu0 %v126_v25 }
  0xa9   :  { %1828 = vmatprep.mubr.msk.f32.mxu0 %vm154_vm0, %v129_v27  ;;  %2390 = vmatpush3.bf16.msra.mxu0 %v2389_v26 }
  0xaa   :  { %2392 = vmatprep.subr.bf16.mxu0 %v2391_v28  ;;  %503 = vmatmul.mubr.f32.gmra.mrb[2].mxu1 %v3151_v10 }
  0xab   :  { %1831 = vmatprep.mubr.msk.f32.mxu1 %vm154_vm0, %v3157_v11 }
  0xac   :  { %247 = vmatmul.mubr.f32.gmra.mrb[6].mxu0 %v128_v33 }
  0xad   :  { %2394 = vmatpush3.bf16.msra.mxu0 %v2393_v34  ;;  %v803_v34 = vld [vmem:[#allocation9 + $0x290] sm:$0xff] }
  0xae   :  { %2396 = vmatprep.subr.bf16.mxu0 %v2395_v35  ;;  %508 = vmatmul.mubr.f32.gmra.mrb[4].mxu1 %v3164_v12  ;;  %v804_v35 = vld [vmem:[#allocation9 + $0x298] sm:$0xff] }
  0xaf   :  { %1832 = vmatprep.mubr.msk.f32.mxu1 %vm154_vm0, %v3170_v13  ;;  %v2447_v47 = vpack.c.bf16 %v804_v35, %v803_v34  ;;  %v361_v34 = vld [vmem:[#allocation11 + $0x40] sm:$0xff]  ;;  %v362_v35 = vld [vmem:[#allocation11 + $0x48] sm:$0xff] }
  0xb0   :  { %v3279_v45 = vpack.c.bf16 %v362_v35, %v361_v34 }
  0xb1   :  { %2398 = vmatpush3.bf16.msra.mxu0 %v2397_v38 }
  0xb2   :  { %2400 = vmatprep.subr.bf16.mxu0 %v2399_v44  ;;  %513 = vmatmul.mubr.f32.gmra.mrb[6].mxu1 %v3177_v14  ;;  %v3245_v44 = vpack.c.bf16 %v354_v40, %v353_v39 }
  0xb3   :  { %1833 = vmatprep.mubr.msk.f32.mxu1 %vm154_vm0, %v3183_v15 }
  0xb4   :  { %2412 = vmatprep.subr.bf16.mxu1 %v3245_v44 }
  0xb5   :  { %2402 = vmatpush3.bf16.msra.mxu0 %v2401_v48  ;;  %v788_v48 = vld [vmem:[#allocation9 + $0x218] sm:$0xff]  ;;  %2414 = vmatpush3.bf16.msra.mxu1 %v3245_v44 }
  0xb6   :  { %2404 = vmatprep.subr.bf16.mxu0 %v2403_v54  ;;  %518 = vmatmul.mubr.f32.gmra.mrb[8].mxu1 %v3190_v16  ;;  %v2449_v59 = vpack.c.bf16 %v788_v48, %v787_v43  ;;  %v794_v43 = vld [vmem:[#allocation9 + $0x248] sm:$0xff] }
  0xb7   :  { %1834 = vmatprep.mubr.msk.f32.mxu1 %vm154_vm0, %v3196_v17  ;;  %2416 = vmatprep.subr.bf16.mxu1 %v3249_v51 }
  0xb9   :  { %2406 = vmatpush3.bf16.msra.mxu0 %v2405_v58  ;;  %2418 = vmatpush3.bf16.msra.mxu1 %v3249_v51 }
  0xba   :  { %2408 = vmatprep.subr.bf16.mxu0 %v2407_v63  ;;  %523 = vmatmul.mubr.f32.gmra.mrb[10].mxu1 %v3203_v18  ;;  %v790_v63 = vld [vmem:[#allocation9 + $0x228] sm:$0xff] }
  0xbb   :  { %1835 = vmatprep.mubr.msk.f32.mxu1 %vm154_vm0, %v3209_v19  ;;  %2420 = vmatprep.subr.bf16.mxu1 %v3261_v2 }
  0xbd   :  { %2410 = vmatpush3.bf16.msra.mxu0 %v2409_v4  ;;  %v808_v4 = vld [vmem:[#allocation9 + $0x2b8] sm:$0xff]  ;;  %2422 = vmatpush3.bf16.msra.mxu1 %v3261_v2 }
  0xbe   :  { %2444 = vmatprep.subr.bf16.mxu0 %v2443_v8  ;;  %528 = vmatmul.mubr.f32.gmra.mrb[12].mxu1 %v3214_v20 }
  0xbf   :  { %1836 = vmatprep.mubr.msk.f32.mxu1 %vm154_vm0, %v3222_v21  ;;  %2424 = vmatprep.subr.bf16.mxu1 %v3270_v32 }
  0xc1   :  { %2426 = vmatpush3.bf16.msra.mxu1 %v3270_v32 }
  0xc2   :  { %533 = vmatmul.mubr.f32.gmra.mrb[14].mxu1 %v3227_v22  ;;  %2428 = vmatprep.subr.bf16.mxu1 %v3279_v45 }
  0xc5   :  { %2430 = vmatpush3.bf16.msra.mxu1 %v3279_v45 }
 0x173   :  { %v233_v23 = vpop.f32.mrb[0].mxu0 }
 0x174   :  { %v3232_v24 = vmax.f32 %v233_v23, 0.0  ;;  %v235_v25 = vpop.f32.mrb[1].mxu0  ;;  %v2453_v23 = vpack.c.bf16 %v790_v63, %v789_v62  ;;  %v798_v62 = vld [vmem:[#allocation9 + $0x268] sm:$0xff]  ;;  %v815_v63 = vld [vmem:[#allocation9 + $0x2f0] sm:$0xff] }
 0x175   :  { %v791_v25 = vld [vmem:[#allocation9 + $0x230] sm:$0xff] }
 0x176   :  { %v273_v26 = vrot.slane %v3232_v24, 7  ;;  %291 = vst [vmem:[#allocation2 + $0x8] sm:$0xff] %v3232_v24  ;;  %634 = vmatprep.mubr.f32.mxu0 %v3232_v24 }
 0x177   :  { %v238_v27 = vpop.f32.mrb[2].mxu0 }
 0x178   :  { %285 = vst [vmem:[#allocation2] sm:$0xfe] %v273_v26  ;;  %v3237_v28 = vmax.f32 %v238_v27, 0.0  ;;  %v240_v29 = vpop.f32.mrb[3].mxu0  ;;  %v2455_v27 = vpack.c.bf16 %v808_v4, %v807_v1  ;;  %v816_v1 = vld [vmem:[#allocation9 + $0x2f8] sm:$0xff] }
 0x179   :  { %v792_v29 = vld [vmem:[#allocation9 + $0x238] sm:$0xff]  ;;  %v2471_v6 = vpack.c.bf16 %v816_v1, %v815_v63 }
 0x17a   :  { %v274_v30 = vrot.slane %v3237_v28, 7  ;;  %v2457_v40 = vpack.c.bf16 %v792_v29, %v791_v25  ;;  %v1029_v29 = vld [vmem:[#allocation8 + $0xc0] sm:$0xff] }
 0x17b   :  { %v243_v33 = vpop.f32.mrb[4].mxu0 }
 0x17c   :  { %v3241_v36 = vsel %vm272_vm1, %v273_v26, %v274_v30  ;;  %287 = vst [vmem:[#allocation2 + $0x20] sm:$0x1] %v274_v30  ;;  %v3243_v37 = vmax.f32 %v243_v33, 0.0  ;;  %v245_v38 = vpop.f32.mrb[5].mxu0  ;;  %v809_v30 = vld [vmem:[#allocation9 + $0x2c0] sm:$0xff] }
 0x17d   :  { %v304_v26 = vld [vmem:[#allocation2 + $0x8] sm:$0xfe]  ;;  %v328_v38 = vrot.slane %v3237_v28, 1  ;;  %v2459_v41 = vpack.c.bf16 %v810_v31, %v809_v30 }
 0x17e   :  { %v276_v46 = vrot.slane %v3243_v37, 7  ;;  %293 = vst [vmem:[#allocation2 + $0x38] sm:$0xff] %v3243_v37  ;;  %v327_v39 = vrot.slane %v304_v26, 1  ;;  %v1030_v30 = vld [vmem:[#allocation8 + $0xc8] sm:$0xff] }
 0x17f   :  { %v248_v52 = vpop.f32.mrb[6].mxu0  ;;  %v3251_v54 = vld [vmem:[#allocation2] sm:$0xff] }
 0x180   :  { %288 = vst [vmem:[#allocation2 + $0x30] sm:$0xfe] %v276_v46  ;;  %v3254_v57 = vmax.f32 %v248_v52, 0.0  ;;  %635 = vmatmul.mubr.f32.vlgmr.msra.gmra.mrb[8].mxu0 %v3251_v54  ;;  %v250_v58 = vpop.f32.mrb[7].mxu0  ;;  %v3285_v48 = vsel %vm323_vm2, %v327_v39, %v328_v38  ;;  %v795_v52 = vld [vmem:[#allocation9 + $0x250] sm:$0xff]  ;;  %v325_v39 = vrot.slane %v3241_v36, 1 }
 0x181   :  { %2446 = vmatpush3.bf16.msra.mxu0 %v2445_v42  ;;  %639 = vmatprep.mubr.f32.mxu0 %v3237_v28  ;;  %v793_v42 = vld [vmem:[#allocation9 + $0x240] sm:$0xff]  ;;  %v814_v58 = vld [vmem:[#allocation9 + $0x2e8] sm:$0xff] }
 0x182   :  { %v277_v60 = vrot.slane %v3254_v57, 7  ;;  %2448 = vmatprep.subr.bf16.mxu0 %v2447_v47  ;;  %v812_v47 = vld [vmem:[#allocation9 + $0x2d8] sm:$0xff]  ;;  %v2461_v49 = vpack.c.bf16 %v794_v43, %v793_v42  ;;  %v303_v25 = vld [vmem:[#allocation2] sm:$0xfe]  ;;  %v1031_v42 = vld [vmem:[#allocation8 + $0xd0] sm:$0xff] }
 0x183   :  { %v324_v31 = vrot.slane %v303_v25, 1  ;;  %v305_v35 = vld [vmem:[#allocation2 + $0x20] sm:$0x1]  ;;  %v1032_v43 = vld [vmem:[#allocation8 + $0xd8] sm:$0xff] }
 0x184   :  { %v3264_v8 = vsel %vm272_vm1, %v276_v46, %v277_v60  ;;  %290 = vst [vmem:[#allocation2 + $0x50] sm:$0x1] %v277_v60  ;;  %640 = vmatmul.mubr.f32.gmra.mrb[10].mxu0 %v3241_v36  ;;  %v811_v46 = vld [vmem:[#allocation9 + $0x2d0] sm:$0xff]  ;;  %v2467_v60 = vpack.c.bf16 %v814_v58, %v813_v56  ;;  %v2511_v56 = vpack.c.bf16 %v1032_v43, %v1031_v42  ;;  %v310_v58 = vld [vmem:[#allocation2 + $0x58] sm:$0x1]  ;;  %v1041_v42 = vld [vmem:[#allocation8 + $0x120] sm:$0xff] }
 0x185   :  { %2450 = vmatpush3.bf16.msra.mxu0 %v2449_v59  ;;  %644 = vmatprep.mubr.f32.mxu0 %v3243_v37  ;;  %v2463_v50 = vpack.c.bf16 %v812_v47, %v811_v46  ;;  %v2465_v59 = vpack.c.bf16 %v796_v55, %v795_v52  ;;  %v3294_v46 = vsel %vm323_vm2, %v324_v31, %v325_v39  ;;  %v330_v47 = vrot.slane %v305_v35, 1  ;;  %v1038_v31 = vld [vmem:[#allocation8 + $0x108] sm:$0xff] }
 0x186   :  { %2452 = vmatprep.subr.bf16.mxu0 %v2451_v61  ;;  %v797_v61 = vld [vmem:[#allocation9 + $0x260] sm:$0xff]  ;;  %v342_v1 = vrot.slane %v310_v58, 1  ;;  %v1042_v43 = vld [vmem:[#allocation8 + $0x128] sm:$0xff] }
 0x187   :  { %v3272_v33 = vld [vmem:[#allocation2 + $0x30] sm:$0xff]  ;;  %v2469_v4 = vpack.c.bf16 %v798_v62, %v797_v61  ;;  %v335_v61 = vrot.slane %v3264_v8, 1  ;;  %v3307_v62 = vsel %vm323_vm2, %v325_v39, %v330_v47  ;;  %v2526_v47 = vpack.c.bf16 %v1042_v43, %v1041_v42 }
 0x188   :  { %645 = vmatmul.mubr.f32.gmra.mrb[12].mxu0 %v3272_v33  ;;  %v307_v55 = vld [vmem:[#allocation2 + $0x30] sm:$0xfe] }
 0x189   :  { %2454 = vmatpush3.bf16.msra.mxu0 %v2453_v23  ;;  %649 = vmatprep.mubr.f32.mxu0 %v3254_v57  ;;  %v800_v23 = vld [vmem:[#allocation9 + $0x278] sm:$0xff]  ;;  %v334_v63 = vrot.slane %v307_v55, 1  ;;  %v1039_v39 = vld [vmem:[#allocation8 + $0x110] sm:$0xff] }
 0x18a   :  { %2456 = vmatprep.subr.bf16.mxu0 %v2455_v27  ;;  %v2473_v26 = vpack.c.bf16 %v800_v23, %v799_v7  ;;  %v306_v27 = vld [vmem:[#allocation2 + $0x28] sm:$0x1]  ;;  %v1035_v7 = vld [vmem:[#allocation8 + $0xf0] sm:$0xff]  ;;  %v1036_v23 = vld [vmem:[#allocation8 + $0xf8] sm:$0xff] }
 0x18b   :  { %v332_v34 = vrot.slane %v306_v27, 1  ;;  %v3316_v25 = vsel %vm323_vm2, %v334_v63, %v335_v61  ;;  %v1049_v63 = vld [vmem:[#allocation8 + $0x160] sm:$0xff]  ;;  %v1405_v43 = vld [vmem:[#allocation9 + $0x310] sm:$0xff] }
 0x18c   :  { %650 = vmatmul.mubr.f32.gmra.mrb[14].mxu0 %v3264_v8 }
 0x18d   :  { %2458 = vmatpush3.bf16.msra.mxu0 %v2457_v40  ;;  %881 = vmatprep.mubr.f32.mxu0 %v3285_v48  ;;  %v2508_v40 = vpack.c.bf16 %v1030_v30, %v1029_v29  ;;  %v2517_v29 = vpack.c.bf16 %v1036_v23, %v1035_v7  ;;  %v1037_v30 = vld [vmem:[#allocation8 + $0x100] sm:$0xff]  ;;  %v1052_v7 = vld [vmem:[#allocation8 + $0x178] sm:$0xff] }
 0x18e   :  { %2460 = vmatprep.subr.bf16.mxu0 %v2459_v41  ;;  %v308_v41 = vld [vmem:[#allocation2 + $0x38] sm:$0xfe]  ;;  %v2520_v35 = vpack.c.bf16 %v1038_v31, %v1037_v30  ;;  %v1419_v23 = vld [vmem:[#allocation9 + $0x380] sm:$0xff] }
 0x18f   :  { %v337_v52 = vrot.slane %v308_v41, 1  ;;  %v1403_v31 = vld [vmem:[#allocation9 + $0x300] sm:$0xff] }
 0x191   :  { %2462 = vmatpush3.bf16.msra.mxu0 %v2461_v49  ;;  %v338_v49 = vrot.slane %v3254_v57, 1 }
 0x192   :  { %2464 = vmatprep.subr.bf16.mxu0 %v2463_v50  ;;  %v3301_v50 = vsel %vm323_vm2, %v328_v38, %v332_v34 }
 0x193   :  { %v3311_v38 = vsel %vm323_vm2, %v337_v52, %v338_v49  ;;  %v3320_v27 = vsel %vm323_vm2, %v338_v49, %v342_v1  ;;  %v1043_v49 = vld [vmem:[#allocation8 + $0x130] sm:$0xff]  ;;  %v1044_v52 = vld [vmem:[#allocation8 + $0x138] sm:$0xff]  ;;  %v1050_v1 = vld [vmem:[#allocation8 + $0x168] sm:$0xff] }
 0x194   :  { %v2529_v55 = vpack.c.bf16 %v1044_v52, %v1043_v49  ;;  %v1423_v49 = vld [vmem:[#allocation9 + $0x3a0] sm:$0xff]  ;;  %v1424_v52 = vld [vmem:[#allocation9 + $0x3a8] sm:$0xff] }
 0x195   :  { %2466 = vmatpush3.bf16.msra.mxu0 %v2465_v59  ;;  %v1033_v59 = vld [vmem:[#allocation8 + $0xe0] sm:$0xff] }
 0x196   :  { %2468 = vmatprep.subr.bf16.mxu0 %v2467_v60  ;;  %v1034_v60 = vld [vmem:[#allocation8 + $0xe8] sm:$0xff] }
 0x199   :  { %2470 = vmatpush3.bf16.msra.mxu0 %v2469_v4  ;;  %v309_v4 = vld [vmem:[#allocation2 + $0x50] sm:$0x1] }
 0x19a   :  { %2472 = vmatprep.subr.bf16.mxu0 %v2471_v6  ;;  %v2514_v6 = vpack.c.bf16 %v1034_v60, %v1033_v59  ;;  %v1047_v59 = vld [vmem:[#allocation8 + $0x150] sm:$0xff]  ;;  %v1048_v60 = vld [vmem:[#allocation8 + $0x158] sm:$0xff] }
 0x19d   :  { %2474 = vmatpush3.bf16.msra.mxu0 %v2473_v26  ;;  %v340_v26 = vrot.slane %v309_v4, 1  ;;  %v2538_v4 = vpack.c.bf16 %v1050_v1, %v1049_v63  ;;  %v1425_v63 = vld [vmem:[#allocation9 + $0x3b0] sm:$0xff]  ;;  %v1426_v1 = vld [vmem:[#allocation9 + $0x3b8] sm:$0xff] }
 0x19e   :  { %2507 = vmatprep.subr.bf16.mxu0 %v2933_v0 }
 0x19f   :  { %v3325_v34 = vsel %vm323_vm2, %v335_v61, %v340_v26  ;;  %v2535_v61 = vpack.c.bf16 %v1048_v60, %v1047_v59  ;;  %v1420_v26 = vld [vmem:[#allocation9 + $0x388] sm:$0xff]  ;;  %v2615_v59 = vpack.c.bf16 %v1424_v52, %v1423_v49  ;;  %v1407_v60 = vld [vmem:[#allocation9 + $0x320] sm:$0xff]  ;;  %v1429_v49 = vld [vmem:[#allocation9 + $0x3d0] sm:$0xff] }
 0x1a0   :  { %882 = vmatmul.mubr.f32.vlgmr.msra.gmra.mrb[16].mxu0 %v3294_v46  ;;  %v2607_v30 = vpack.c.bf16 %v1420_v26, %v1419_v23  ;;  %v2619_v23 = vpack.c.bf16 %v1426_v1, %v1425_v63  ;;  %v1409_v26 = vld [vmem:[#allocation9 + $0x330] sm:$0xff]  ;;  %v1430_v52 = vld [vmem:[#allocation9 + $0x3d8] sm:$0xff]  ;;  %v1432_v63 = vld [vmem:[#allocation9 + $0x3e8] sm:$0xff] }
 0x1a1   :  { %886 = vmatprep.mubr.f32.mxu0 %v3301_v50  ;;  %2509 = vmatpush1.bf16.msra.mxu0 %v2508_v40  ;;  %v1040_v40 = vld [vmem:[#allocation8 + $0x118] sm:$0xff] }
 0x1a2   :  { %2510 = vmatprep.subr.bf16.mxu0 %v2933_v0  ;;  %v2523_v41 = vpack.c.bf16 %v1040_v40, %v1039_v39  ;;  %v1421_v39 = vld [vmem:[#allocation9 + $0x390] sm:$0xff]  ;;  %v1422_v40 = vld [vmem:[#allocation9 + $0x398] sm:$0xff] }
 0x1a3   :  { %v2611_v42 = vpack.c.bf16 %v1422_v40, %v1421_v39 }
 0x1a4   :  { %887 = vmatmul.mubr.f32.gmra.mrb[18].mxu0 %v3307_v62 }
 0x1a5   :  { %891 = vmatprep.mubr.f32.mxu0 %v3311_v38  ;;  %2512 = vmatpush1.bf16.msra.mxu0 %v2511_v56  ;;  %v1046_v56 = vld [vmem:[#allocation8 + $0x148] sm:$0xff] }
 0x1a6   :  { %2513 = vmatprep.subr.bf16.mxu0 %v2933_v0 }
 0x1a8   :  { %892 = vmatmul.mubr.f32.gmra.mrb[20].mxu0 %v3316_v25 }
 0x1a9   :  { %896 = vmatprep.mubr.f32.mxu0 %v3320_v27  ;;  %2515 = vmatpush1.bf16.msra.mxu0 %v2514_v6  ;;  %v1051_v6 = vld [vmem:[#allocation8 + $0x170] sm:$0xff] }
 0x1aa   :  { %2516 = vmatprep.subr.bf16.mxu0 %v2933_v0 }
 0x1ac   :  { %897 = vmatmul.mubr.f32.gmra.mrb[22].mxu0 %v3325_v34 }
 0x1ad   :  { %2518 = vmatpush1.bf16.msra.mxu0 %v2517_v29  ;;  %1838 = vmatprep.mubr.msk.f32.mxu0 %vm154_vm0, %v3131_v3  ;;  %v1045_v3 = vld [vmem:[#allocation8 + $0x140] sm:$0xff]  ;;  %v2541_v29 = vpack.c.bf16 %v1052_v7, %v1051_v6  ;;  %v3348_v6 = vpop.f32.mrb[0].mxu1 }
 0x1ae   :  { %2519 = vmatprep.subr.bf16.mxu0 %v2933_v0  ;;  %v2532_v58 = vpack.c.bf16 %v1046_v56, %v1045_v3  ;;  %v364_v3 = vld [vmem:[#allocation11 + $0x58] sm:$0xff] }
 0x1b1   :  { %2521 = vmatpush1.bf16.msra.mxu0 %v2520_v35  ;;  %v1404_v35 = vld [vmem:[#allocation9 + $0x308] sm:$0xff] }
 0x1b2   :  { %2522 = vmatprep.subr.bf16.mxu0 %v2933_v0 }
 0x1b5   :  { %2524 = vmatpush1.bf16.msra.mxu0 %v2523_v41  ;;  %v2609_v41 = vpack.c.bf16 %v1404_v35, %v1403_v31  ;;  %v1427_v31 = vld [vmem:[#allocation9 + $0x3c0] sm:$0xff]  ;;  %v367_v35 = vld [vmem:[#allocation11 + $0x70] sm:$0xff] }
 0x1b6   :  { %2525 = vmatprep.subr.bf16.mxu0 %v2933_v0 }
 0x1b9   :  { %2527 = vmatpush1.bf16.msra.mxu0 %v2526_v47  ;;  %v1406_v47 = vld [vmem:[#allocation9 + $0x318] sm:$0xff] }
 0x1ba   :  { %2528 = vmatprep.subr.bf16.mxu0 %v2933_v0  ;;  %v2613_v56 = vpack.c.bf16 %v1406_v47, %v1405_v43  ;;  %v1412_v43 = vld [vmem:[#allocation9 + $0x348] sm:$0xff] }
 0x1bd   :  { %2530 = vmatpush1.bf16.msra.mxu0 %v2529_v55  ;;  %v363_v55 = vld [vmem:[#allocation11 + $0x50] sm:$0xff] }
 0x1be   :  { %2531 = vmatprep.subr.bf16.mxu0 %v2933_v0 }
 0x1c1   :  { %2533 = vmatpush1.bf16.msra.mxu0 %v2532_v58  ;;  %v3341_v58 = vpack.c.bf16 %v364_v3, %v363_v55  ;;  %v2627_v3 = vpack.c.bf16 %v1430_v52, %v1429_v49  ;;  %v763_v49 = vld [vmem:[#allocation12 + $0x8] sm:$0xff] }
 0x1c2   :  { %2534 = vmatprep.subr.bf16.mxu0 %v2933_v0 }
 0x1c3   :  { %2432 = vmatprep.subr.bf16.mxu1 %v3341_v58 }
 0x1c4   :  { %2434 = vmatpush3.bf16.msra.mxu1 %v3341_v58 }
 0x1c5   :  { %2536 = vmatpush1.bf16.msra.mxu0 %v2535_v61  ;;  %v1408_v61 = vld [vmem:[#allocation9 + $0x328] sm:$0xff] }
 0x1c6   :  { %2537 = vmatprep.subr.bf16.mxu0 %v2933_v0 }
 0x1c9   :  { %2539 = vmatpush1.bf16.msra.mxu0 %v2538_v4  ;;  %v366_v4 = vld [vmem:[#allocation11 + $0x68] sm:$0xff] }
 0x1ca   :  { %2540 = vmatprep.subr.bf16.mxu0 %v2933_v0 }
 0x1cd   :  { %2542 = vmatpush1.bf16.msra.mxu0 %v2541_v29  ;;  %v1410_v29 = vld [vmem:[#allocation9 + $0x338] sm:$0xff] }
 0x1ce   :  { %2608 = vmatprep.subr.bf16.mxu0 %v2607_v30  ;;  %v501_v30 = vpop.f32.mrb[1].mxu1  ;;  %v2621_v39 = vpack.c.bf16 %v1410_v29, %v1409_v26  ;;  %v1433_v29 = vld [vmem:[#allocation9 + $0x3f0] sm:$0xff] }
 0x1cf   :  { %v3359_v47 = vpop.f32.mrb[2].mxu1  ;;  %v1434_v30 = vld [vmem:[#allocation9 + $0x3f8] sm:$0xff] }
 0x1d0   :  { %1118 = vmatmul.mubr.f32.vlgmr.msra.gmra.mrb[24].mxu0 %v3138_v5  ;;  %v365_v5 = vld [vmem:[#allocation11 + $0x60] sm:$0xff] }
 0x1d1   :  { %2610 = vmatpush3.bf16.msra.mxu0 %v2609_v41  ;;  %1839 = vmatprep.mubr.msk.f32.mxu0 %vm154_vm0, %v3144_v9  ;;  %v2617_v9 = vpack.c.bf16 %v1408_v61, %v1407_v60  ;;  %v3350_v7 = vpack.c.bf16 %v366_v4, %v365_v5  ;;  %v1431_v61 = vld [vmem:[#allocation9 + $0x3e0] sm:$0xff] }
 0x1d2   :  { %2612 = vmatprep.subr.bf16.mxu0 %v2611_v42  ;;  %v1411_v42 = vld [vmem:[#allocation9 + $0x340] sm:$0xff]  ;;  %v2631_v4 = vpack.c.bf16 %v1432_v63, %v1431_v61 }
 0x1d3   :  { %2436 = vmatprep.subr.bf16.mxu1 %v3350_v7 }
 0x1d4   :  { %1123 = vmatmul.mubr.f32.gmra.mrb[26].mxu0 %v3151_v10  ;;  %v1428_v10 = vld [vmem:[#allocation9 + $0x3c8] sm:$0xff]  ;;  %2438 = vmatpush3.bf16.msra.mxu1 %v3350_v7 }
 0x1d5   :  { %2614 = vmatpush3.bf16.msra.mxu0 %v2613_v56  ;;  %1840 = vmatprep.mubr.msk.f32.mxu0 %vm154_vm0, %v3157_v11  ;;  %v368_v11 = vld [vmem:[#allocation11 + $0x78] sm:$0xff]  ;;  %v2623_v41 = vpack.c.bf16 %v1428_v10, %v1427_v31  ;;  %v1413_v56 = vld [vmem:[#allocation9 + $0x350] sm:$0xff] }
 0x1d6   :  { %2616 = vmatprep.subr.bf16.mxu0 %v2615_v59  ;;  %v3357_v40 = vpack.c.bf16 %v368_v11, %v367_v35  ;;  %v1414_v59 = vld [vmem:[#allocation9 + $0x358] sm:$0xff]  ;;  %v1417_v35 = vld [vmem:[#allocation9 + $0x370] sm:$0xff] }
 0x1d7   :  { %v1418_v11 = vld [vmem:[#allocation9 + $0x378] sm:$0xff] }
 0x1d8   :  { %1128 = vmatmul.mubr.f32.gmra.mrb[28].mxu0 %v3164_v12  ;;  %v506_v12 = vpop.f32.mrb[3].mxu1  ;;  %2440 = vmatprep.subr.bf16.mxu1 %v3357_v40 }
 0x1d9   :  { %2618 = vmatpush3.bf16.msra.mxu0 %v2617_v9  ;;  %1841 = vmatprep.mubr.msk.f32.mxu0 %vm154_vm0, %v3170_v13  ;;  %v2625_v13 = vpack.c.bf16 %v1412_v43, %v1411_v42  ;;  %v3366_v55 = vpop.f32.mrb[4].mxu1  ;;  %v1415_v9 = vld [vmem:[#allocation9 + $0x360] sm:$0xff] }
 0x1da   :  { %2620 = vmatprep.subr.bf16.mxu0 %v2619_v23  ;;  %2442 = vmatpush3.bf16.msra.mxu1 %v3357_v40  ;;  %v511_v60 = vpop.f32.mrb[5].mxu1  ;;  %v1416_v23 = vld [vmem:[#allocation9 + $0x368] sm:$0xff]  ;;  %v762_v43 = vld [vmem:[#allocation12] sm:$0xff] }
 0x1db   :  { %2476 = vmatprep.subr.bf16.mxu1 %v3245_v44  ;;  %v3369_v1 = vpop.f32.mrb[6].mxu1 }
 0x1dc   :  { %1133 = vmatmul.mubr.f32.gmra.mrb[30].mxu0 %v3177_v14  ;;  %v516_v14 = vpop.f32.mrb[7].mxu1 }
 0x1dd   :  { %2622 = vmatpush3.bf16.msra.mxu0 %v2621_v39  ;;  %1842 = vmatprep.mubr.msk.f32.mxu0 %vm154_vm0, %v3183_v15  ;;  %v2629_v15 = vpack.c.bf16 %v1414_v59, %v1413_v56  ;;  %v519_v5 = vpop.f32.mrb[8].mxu1  ;;  %v2637_v39 = vpack.c.bf16 %v1418_v11, %v1417_v35 }
 0x1de   :  { %2624 = vmatprep.subr.bf16.mxu0 %v2623_v41  ;;  %v521_v26 = vpop.f32.mrb[9].mxu1 }
 0x1df   :  { %v524_v31 = vpop.f32.mrb[10].mxu1 }
 0x1e0   :  { %1138 = vmatmul.mubr.f32.gmra.mrb[32].mxu0 %v3190_v16  ;;  %v526_v10 = vpop.f32.mrb[11].mxu1  ;;  %v2633_v16 = vpack.c.bf16 %v1416_v23, %v1415_v9 }
 0x1e1   :  { %2626 = vmatpush3.bf16.msra.mxu0 %v2625_v13  ;;  %1843 = vmatprep.mubr.msk.f32.mxu0 %vm154_vm0, %v3196_v17  ;;  %v2635_v17 = vpack.c.bf16 %v1434_v30, %v1433_v29  ;;  %v1175_v30 = vld [vmem:[#allocation9 + $0x180] sm:$0xff] }
 0x1e2   :  { %2628 = vmatprep.subr.bf16.mxu0 %v2627_v3 }
 0x1e4   :  { %1143 = vmatmul.mubr.f32.gmra.mrb[34].mxu0 %v3203_v18  ;;  %v3390_v18 = vpop.f32.mrb[12].mxu1 }
 0x1e5   :  { %2630 = vmatpush3.bf16.msra.mxu0 %v2629_v15  ;;  %1844 = vmatprep.mubr.msk.f32.mxu0 %vm154_vm0, %v3209_v19  ;;  %v531_v19 = vpop.f32.mrb[13].mxu1 }
 0x1e6   :  { %2632 = vmatprep.subr.bf16.mxu0 %v2631_v4 }
 0x1e8   :  { %1148 = vmatmul.mubr.f32.gmra.mrb[36].mxu0 %v3214_v20  ;;  %v3392_v20 = vpop.f32.mrb[14].mxu1 }
 0x1e9   :  { %2634 = vmatpush3.bf16.msra.mxu0 %v2633_v16  ;;  %1845 = vmatprep.mubr.msk.f32.mxu0 %vm154_vm0, %v3222_v21  ;;  %v536_v21 = vpop.f32.mrb[15].mxu1 }
 0x1ea   :  { %2636 = vmatprep.subr.bf16.mxu0 %v2635_v17  ;;  %v1159_v21 = vld [vmem:[#allocation9 + $0x100] sm:$0xff] }
 0x1ec   :  { %1153 = vmatmul.mubr.f32.gmra.mrb[38].mxu0 %v3227_v22 }
 0x1ed   :  { %2638 = vmatpush3.bf16.msra.mxu0 %v2637_v39  ;;  %1499 = vmatprep.mubr.f32.mxu0 %v3285_v48 }
 0x1ee   :  { %2671 = vmatprep.subr.bf16.mxu0 %v2933_v0 }
 0x1f0   :  { %1500 = vmatmul.mubr.f32.vlgmr.msra.gmra.mrb[40].mxu0 %v3294_v46 }
 0x1f1   :  { %1504 = vmatprep.mubr.f32.mxu0 %v3301_v50  ;;  %v3397_v50 = vld [vmem:[%s3635_s5] ss:$0 sm:$0xff] }
 0x1f4   :  { %1505 = vmatmul.mubr.f32.gmra.mrb[42].mxu0 %v3307_v62 }
 0x1f5   :  { %1509 = vmatprep.mubr.f32.mxu0 %v3311_v38 }
 0x1f8   :  { %1510 = vmatmul.mubr.f32.gmra.mrb[44].mxu0 %v3316_v25 }
 0x1f9   :  { %1514 = vmatprep.mubr.f32.mxu0 %v3320_v27 }
 0x1fc   :  { %1515 = vmatmul.mubr.f32.gmra.mrb[46].mxu0 %v3325_v34 }
 0x1fd   :  { %2304 = vmatprep.mubr.msk.f32.mxu0 %vm2935_vm3, %v2934_v53  ;;  %v1625_v53 = vld [vmem:[#allocation12 + $0x38] sm:$0xff] }
 0x253   :  { %v1879_v22 = vpop.f32.mrb[8].mxu0 }
 0x254   :  { %v1880_v48 = vpop.f32.mrb[9].mxu0 }
 0x255   :  { %v1881_v46 = vadd.f32 %v1880_v48, %v1879_v22  ;;  %v1160_v22 = vld [vmem:[#allocation9 + $0x108] sm:$0xff]  ;;  %v1177_v48 = vld [vmem:[#allocation9 + $0x190] sm:$0xff] }
 0x257   :  { %v655_v62 = vadd.f32 %v1881_v46, %v3348_v6  ;;  %v1882_v38 = vpop.f32.mrb[10].mxu0  ;;  %v1178_v46 = vld [vmem:[#allocation9 + $0x198] sm:$0xff] }
 0x258   :  { %v1883_v25 = vpop.f32.mrb[11].mxu0 }
 0x259   :  { %v665_v27 = vadd.f32 %v3397_v50, %v655_v62  ;;  %v1884_v34 = vadd.f32 %v1883_v25, %v1882_v38 }
 0x25b   :  { %754 = vst [vmem:[#allocation14] sm:$0xff] %v665_v27  ;;  %v656_v41 = vadd.f32 %v1884_v34, %v3359_v47  ;;  %2152 = vmatprep.mubr.f32.mxu1 %v665_v27  ;;  %v1885_v42 = vpop.f32.mrb[12].mxu0  ;;  %v764_v3 = vmul.f32 %v762_v43, %v665_v27  ;;  %v1006_v27 = vld [vmem:[#allocation12 + $0x20] sm:$0xff]  ;;  %v2545_v34 = vpack.c.bf16 %v1160_v22, %v1159_v21  ;;  %v1166_v21 = vld [vmem:[#allocation9 + $0x138] sm:$0xff] }
 0x25c   :  { %v1886_v52 = vpop.f32.mrb[13].mxu0  ;;  %v1183_v22 = vld [vmem:[#allocation9 + $0x1c0] sm:$0xff] }
 0x25d   :  { %v666_v12 = vadd.f32 %v3397_v50, %v656_v41  ;;  %v1887_v13 = vadd.f32 %v1886_v52, %v1885_v42  ;;  %v1007_v41 = vld [vmem:[#allocation12 + $0x28] sm:$0xff]  ;;  %v1161_v42 = vld [vmem:[#allocation9 + $0x110] sm:$0xff]  ;;  %v2547_v52 = vpack.c.bf16 %v1178_v46, %v1177_v48 }
 0x25e   :  { %v1184_v48 = vld [vmem:[#allocation9 + $0x1c8] sm:$0xff] }
 0x25f   :  { %755 = vst [vmem:[#allocation14 + $0x8] sm:$0xff] %v666_v12  ;;  %v765_v56 = vmul.f32 %v763_v49, %v666_v12  ;;  %2153 = vmatmul.mubr.f32.vlgmr.msra.gmra.mrb[16].mxu1 %v666_v12  ;;  %v1888_v6 = vpop.f32.mrb[14].mxu0  ;;  %v657_v59 = vadd.f32 %v1887_v13, %v519_v5  ;;  %v1162_v12 = vld [vmem:[#allocation9 + $0x118] sm:$0xff]  ;;  %v1179_v13 = vld [vmem:[#allocation9 + $0x1a0] sm:$0xff] }
 0x260   :  { %2478 = vmatpush3.bf16.msra.mxu1 %v3245_v44  ;;  %v1889_v60 = vpop.f32.mrb[15].mxu0 }
 0x261   :  { %v768_v61 = vadd.f32 %v765_v56, %v764_v3  ;;  %2480 = vmatprep.subr.bf16.mxu1 %v3249_v51  ;;  %v667_v47 = vadd.f32 %v3397_v50, %v657_v59  ;;  %v1890_v63 = vadd.f32 %v1889_v60, %v1888_v6  ;;  %v1180_v3 = vld [vmem:[#allocation9 + $0x1a8] sm:$0xff] }
 0x263   :  { %756 = vst [vmem:[#allocation14 + $0x40] sm:$0xff] %v667_v47  ;;  %v658_v14 = vadd.f32 %v1890_v63, %v524_v31  ;;  %2155 = vmatprep.mubr.f32.mxu1 %v667_v47  ;;  %v766_v15 = vmul.f32 %v762_v43, %v667_v47  ;;  %v1176_v31 = vld [vmem:[#allocation9 + $0x188] sm:$0xff]  ;;  %v769_v17 = vrot.slane %v768_v61, 4  ;;  %v2549_v47 = vpack.c.bf16 %v1162_v12, %v1161_v42  ;;  %v1186_v12 = vld [vmem:[#allocation9 + $0x1d8] sm:$0xff] }
 0x264   :  { %2482 = vmatpush3.bf16.msra.mxu1 %v3249_v51  ;;  %v2543_v19 = vpack.c.bf16 %v1176_v31, %v1175_v30  ;;  %v2551_v63 = vpack.c.bf16 %v1180_v3, %v1179_v13 }
 0x265   :  { %v668_v4 = vadd.f32 %v3397_v50, %v658_v14  ;;  %2484 = vmatprep.subr.bf16.mxu1 %v3261_v2  ;;  %v1163_v14 = vld [vmem:[#allocation9 + $0x120] sm:$0xff] }
 0x267   :  { %757 = vst [vmem:[#allocation14 + $0x48] sm:$0xff] %v668_v4  ;;  %v767_v5 = vmul.f32 %v763_v49, %v668_v4  ;;  %2156 = vmatmul.mubr.f32.gmra.mrb[18].mxu1 %v668_v4 }
 0x268   :  { %2486 = vmatpush3.bf16.msra.mxu1 %v3261_v2 }
 0x269   :  { %v3410_v9 = vadd.f32 %v767_v5, %v766_v15  ;;  %2488 = vmatprep.subr.bf16.mxu1 %v3270_v32 }
 0x26b   :  { %v776_v15 = vrot.slane %v3410_v9, 4 }
 0x26c   :  { %2490 = vmatpush3.bf16.msra.mxu1 %v3270_v32 }
 0x26d   :  { %2492 = vmatprep.subr.bf16.mxu1 %v3279_v45 }
 0x270   :  { %2494 = vmatpush3.bf16.msra.mxu1 %v3279_v45 }
 0x271   :  { %2496 = vmatprep.subr.bf16.mxu1 %v3341_v58 }
 0x273   :  { %v1943_v23 = vpop.f32.mrb[16].mxu0 }
 0x274   :  { %v1944_v26 = vpop.f32.mrb[17].mxu0  ;;  %2498 = vmatpush3.bf16.msra.mxu1 %v3341_v58 }
 0x275   :  { %v1945_v29 = vadd.f32 %v1944_v26, %v1943_v23  ;;  %2500 = vmatprep.subr.bf16.mxu1 %v3350_v7  ;;  %v1164_v26 = vld [vmem:[#allocation9 + $0x128] sm:$0xff] }
 0x277   :  { %v902_v10 = vadd.f32 %v1945_v29, %v3366_v55  ;;  %v1946_v16 = vpop.f32.mrb[18].mxu0  ;;  %v770_v55 = vadd.f32 %v769_v17, %v768_v61  ;;  %v1181_v29 = vld [vmem:[#allocation9 + $0x1b0] sm:$0xff] }
 0x278   :  { %v1947_v35 = vpop.f32.mrb[19].mxu0  ;;  %2502 = vmatpush3.bf16.msra.mxu1 %v3350_v7  ;;  %v1165_v17 = vld [vmem:[#allocation9 + $0x130] sm:$0xff] }
 0x279   :  { %v1948_v11 = vadd.f32 %v1947_v35, %v1946_v16  ;;  %v906_v39 = vadd.f32 %v3397_v50, %v902_v10  ;;  %2504 = vmatprep.subr.bf16.mxu1 %v3357_v40  ;;  %v771_v60 = vrot.slane %v770_v55, 2  ;;  %v2553_v10 = vpack.c.bf16 %v1164_v26, %v1163_v14  ;;  %v1171_v26 = vld [vmem:[#allocation9 + $0x160] sm:$0xff] }
 0x27b   :  { %v903_v62 = vadd.f32 %v1948_v11, %v3369_v1  ;;  %v1949_v38 = vpop.f32.mrb[20].mxu0  ;;  %2190 = vmatprep.mubr.f32.mxu1 %v906_v39  ;;  %996 = vst [vmem:[#allocation14 + $0x20] sm:$0xff] %v906_v39  ;;  %v1008_v56 = vmul.f32 %v1006_v27, %v906_v39  ;;  %v772_v35 = vadd.f32 %v771_v60, %v770_v55  ;;  %v1167_v55 = vld [vmem:[#allocation9 + $0x140] sm:$0xff] }
 0x27c   :  { %v1950_v25 = vpop.f32.mrb[21].mxu0  ;;  %2506 = vmatpush3.bf16.msra.mxu1 %v3357_v40  ;;  %v777_v11 = vadd.f32 %v776_v15, %v3410_v9 }
 0x27d   :  { %v907_v43 = vadd.f32 %v3397_v50, %v903_v62  ;;  %v1951_v49 = vadd.f32 %v1950_v25, %v1949_v38  ;;  %2544 = vmatprep.subr.bf16.mxu1 %v2543_v19  ;;  %v2557_v38 = vpack.c.bf16 %v1166_v21, %v1165_v17  ;;  %v2559_v25 = vpack.c.bf16 %v1184_v48, %v1183_v22 }
 0x27e   :  { %v778_v9 = vrot.slane %v777_v11, 2 }
 0x27f   :  { %997 = vst [vmem:[#allocation14 + $0x28] sm:$0xff] %v907_v43  ;;  %v904_v1 = vadd.f32 %v1951_v49, %v3390_v18  ;;  %v1952_v6 = vpop.f32.mrb[22].mxu0  ;;  %2191 = vmatmul.mubr.f32.vlgmr.msra.gmra.mrb[20].mxu1 %v907_v43  ;;  %v1009_v59 = vmul.f32 %v1007_v41, %v907_v43  ;;  %v1182_v18 = vld [vmem:[#allocation9 + $0x1b8] sm:$0xff]  ;;  %v1168_v49 = vld [vmem:[#allocation9 + $0x148] sm:$0xff] }
 0x280   :  { %v1953_v61 = vpop.f32.mrb[23].mxu0  ;;  %2546 = vmatpush3.bf16.msra.mxu1 %v2545_v34  ;;  %v2555_v16 = vpack.c.bf16 %v1182_v18, %v1181_v29  ;;  %v773_v34 = vrot.slane %v772_v35, 1  ;;  %v1172_v29 = vld [vmem:[#allocation9 + $0x168] sm:$0xff]  ;;  %v1189_v18 = vld [vmem:[#allocation9 + $0x1f0] sm:$0xff] }
 0x281   :  { %v908_v4 = vadd.f32 %v3397_v50, %v904_v1  ;;  %v1954_v5 = vadd.f32 %v1953_v61, %v1952_v6  ;;  %v1012_v23 = vadd.f32 %v1009_v59, %v1008_v56  ;;  %2548 = vmatprep.subr.bf16.mxu1 %v2547_v52  ;;  %v1185_v52 = vld [vmem:[#allocation9 + $0x1d0] sm:$0xff]  ;;  %v779_v56 = vadd.f32 %v778_v9, %v777_v11  ;;  %v1170_v59 = vld [vmem:[#allocation9 + $0x158] sm:$0xff]  ;;  %v1187_v61 = vld [vmem:[#allocation9 + $0x1e0] sm:$0xff] }
 0x282   :  { %v2563_v3 = vpack.c.bf16 %v1186_v12, %v1185_v52  ;;  %v774_v1 = vadd.f32 %v773_v34, %v772_v35  ;;  %v1169_v6 = vld [vmem:[#allocation9 + $0x150] sm:$0xff] }
 0x283   :  { %998 = vst [vmem:[#allocation14 + $0x60] sm:$0xff] %v908_v4  ;;  %v905_v30 = vadd.f32 %v1954_v5, %v3392_v20  ;;  %v1013_v31 = vrot.slane %v1012_v23, 4  ;;  %2193 = vmatprep.mubr.f32.mxu1 %v908_v4  ;;  %v1010_v46 = vmul.f32 %v1006_v27, %v908_v4  ;;  %v2565_v15 = vpack.c.bf16 %v1170_v59, %v1169_v6  ;;  %v1173_v11 = vld [vmem:[#allocation9 + $0x170] sm:$0xff] }
 0x284   :  { %2550 = vmatpush3.bf16.msra.mxu1 %v2549_v47  ;;  %v1188_v47 = vld [vmem:[#allocation9 + $0x1e8] sm:$0xff]  ;;  %v780_v4 = vrot.slane %v779_v56, 1 }
 0x285   :  { %v909_v39 = vadd.f32 %v3397_v50, %v905_v30  ;;  %v1014_v19 = vadd.f32 %v1013_v31, %v1012_v23  ;;  %2552 = vmatprep.subr.bf16.mxu1 %v2551_v63  ;;  %v2567_v23 = vpack.c.bf16 %v1188_v47, %v1187_v61  ;;  %v1190_v30 = vld [vmem:[#allocation9 + $0x1f8] sm:$0xff] }
 0x286   :  { %v2571_v35 = vpack.c.bf16 %v1190_v30, %v1189_v18  ;;  %v1652_v30 = vld [vmem:[%s3637_s7 + $0x20] sm:$0xff] }
 0x287   :  { %999 = vst [vmem:[#allocation14 + $0x68] sm:$0xff] %v909_v39  ;;  %v1011_v62 = vmul.f32 %v1007_v41, %v909_v39  ;;  %v1015_v20 = vrot.slane %v1014_v19, 2  ;;  %2194 = vmatmul.mubr.f32.gmra.mrb[22].mxu1 %v909_v39  ;;  %v2561_v41 = vpack.c.bf16 %v1168_v49, %v1167_v55  ;;  %v1174_v39 = vld [vmem:[#allocation9 + $0x178] sm:$0xff] }
 0x288   :  { %1255 = vmatprep.mubr.f32.mxu1 %v3232_v24  ;;  %2554 = vmatpush3.bf16.msra.mxu1 %v2553_v10  ;;  %v2569_v10 = vpack.c.bf16 %v1172_v29, %v1171_v26  ;;  %v2573_v21 = vpack.c.bf16 %v1174_v39, %v1173_v11  ;;  %v1650_v26 = vld [vmem:[%s3637_s7 + $0x10] sm:$0xff]  ;;  %v1651_v29 = vld [vmem:[%s3637_s7 + $0x18] sm:$0xff]  ;;  %v1656_v11 = vld [vmem:[%s3637_s7 + $0x40] sm:$0xff] }
 0x289   :  { %v1016_v42 = vadd.f32 %v1015_v20, %v1014_v19  ;;  %v1019_v43 = vadd.f32 %v1011_v62, %v1010_v46  ;;  %2556 = vmatprep.subr.bf16.mxu1 %v2555_v16  ;;  %v781_v16 = vadd.f32 %v780_v4, %v779_v56  ;;  %v1648_v4 = vld [vmem:[%s3637_s7] sm:$0xff]  ;;  %v2675_v18 = vpack.c.bf16 %v1651_v29, %v1650_v26  ;;  %v1657_v39 = vld [vmem:[%s3637_s7 + $0x48] sm:$0xff]  ;;  %v1380_v26 = vld [vmem:[#allocation12 + $0x10] sm:$0xff] }
 0x28b   :  { %v1017_v13 = vrot.slane %v1016_v42, 1  ;;  %v1020_v27 = vrot.slane %v1019_v43, 4 }
 0x28c   :  { %2558 = vmatpush3.bf16.msra.mxu1 %v2557_v38 }
 0x28d   :  { %v1021_v24 = vadd.f32 %v1020_v27, %v1019_v43  ;;  %2560 = vmatprep.subr.bf16.mxu1 %v2559_v25  ;;  %v1018_v60 = vadd.f32 %v1017_v13, %v1016_v42 }
 0x28f   :  { %v1022_v63 = vrot.slane %v1021_v24, 2  ;;  %v3433_v14 = vadd.f32 %v1018_v60, %v774_v1 }
 0x290   :  { %2562 = vmatpush3.bf16.msra.mxu1 %v2561_v41 }
 0x291   :  { %v1023_v5 = vadd.f32 %v1022_v63, %v1021_v24  ;;  %2564 = vmatprep.subr.bf16.mxu1 %v2563_v3 }
 0x293   :  { %v1024_v31 = vrot.slane %v1023_v5, 1 }
 0x294   :  { %2566 = vmatpush3.bf16.msra.mxu1 %v2565_v15 }
 0x295   :  { %v1025_v17 = vadd.f32 %v1024_v31, %v1023_v5  ;;  %2568 = vmatprep.subr.bf16.mxu1 %v2567_v23  ;;  %v1649_v5 = vld [vmem:[%s3637_s7 + $0x8] sm:$0xff] }
 0x296   :  { %v2672_v23 = vpack.c.bf16 %v1649_v5, %v1648_v4  ;;  %v1653_v31 = vld [vmem:[%s3637_s7 + $0x28] sm:$0xff] }
 0x297   :  { %v3435_v19 = vadd.f32 %v1025_v17, %v781_v16  ;;  %v1654_v16 = vld [vmem:[%s3637_s7 + $0x30] sm:$0xff]  ;;  %v1655_v17 = vld [vmem:[%s3637_s7 + $0x38] sm:$0xff] }
 0x298   :  { %2570 = vmatpush3.bf16.msra.mxu1 %v2569_v10  ;;  %2673 = vmatpush3.bf16.msra.mxu0 %v2672_v23  ;;  %v2678_v10 = vpack.c.bf16 %v1653_v31, %v1652_v30  ;;  %v1381_v23 = vld [vmem:[#allocation12 + $0x18] sm:$0xff] }
 0x299   :  { %2572 = vmatprep.subr.bf16.mxu1 %v2571_v35  ;;  %2674 = vmatprep.subr.bf16.mxu0 %v2933_v0  ;;  %v2681_v35 = vpack.c.bf16 %v1655_v17, %v1654_v16 }
 0x29c   :  { %2574 = vmatpush3.bf16.msra.mxu1 %v2573_v21  ;;  %2676 = vmatpush3.bf16.msra.mxu0 %v2675_v18  ;;  %v2684_v21 = vpack.c.bf16 %v1657_v39, %v1656_v11 }
 0x29d   :  { %2576 = vmatprep.subr.bf16.mxu1 %v3245_v44  ;;  %2677 = vmatprep.subr.bf16.mxu0 %v2933_v0 }
 0x29f   :  { %1256 = vmatmul.mubr.f32.vlgmr.msra.gmra.mrb[24].mxu1 %v3251_v54 }
 0x2a0   :  { %1260 = vmatprep.mubr.f32.mxu1 %v3237_v28  ;;  %2578 = vmatpush3.bf16.msra.mxu1 %v3245_v44 }
 0x2a1   :  { %2580 = vmatprep.subr.bf16.mxu1 %v3249_v51  ;;  %2679 = vmatpush3.bf16.msra.mxu0 %v2678_v10 }
 0x2a2   :  { %2680 = vmatprep.subr.bf16.mxu0 %v2933_v0 }
 0x2a3   :  { %1261 = vmatmul.mubr.f32.gmra.mrb[26].mxu1 %v3241_v36  ;;  %v3443_v22 = vpop.f32.mrb[24].mxu0 }
 0x2a4   :  { %1265 = vmatprep.mubr.f32.mxu1 %v3243_v37  ;;  %v1121_v48 = vpop.f32.mrb[25].mxu0  ;;  %2582 = vmatpush3.bf16.msra.mxu1 %v3249_v51 }
 0x2a5   :  { %2584 = vmatprep.subr.bf16.mxu1 %v3261_v2  ;;  %2682 = vmatpush3.bf16.msra.mxu0 %v2681_v35  ;;  %v1658_v48 = vld [vmem:[%s3637_s7 + $0x50] sm:$0xff] }
 0x2a6   :  { %2683 = vmatprep.subr.bf16.mxu0 %v2933_v0 }
 0x2a7   :  { %1266 = vmatmul.mubr.f32.gmra.mrb[28].mxu1 %v3272_v33  ;;  %v3449_v54 = vpop.f32.mrb[26].mxu0 }
 0x2a8   :  { %1270 = vmatprep.mubr.f32.mxu1 %v3254_v57  ;;  %v1126_v28 = vpop.f32.mrb[27].mxu0  ;;  %2586 = vmatpush3.bf16.msra.mxu1 %v3261_v2 }
 0x2a9   :  { %2588 = vmatprep.subr.bf16.mxu1 %v3270_v32  ;;  %2685 = vmatpush3.bf16.msra.mxu0 %v2684_v21  ;;  %v1659_v28 = vld [vmem:[%s3637_s7 + $0x58] sm:$0xff] }
 0x2aa   :  { %2686 = vmatprep.subr.bf16.mxu0 %v2933_v0 }
 0x2ab   :  { %1271 = vmatmul.mubr.f32.gmra.mrb[30].mxu1 %v3264_v8  ;;  %v1129_v36 = vpop.f32.mrb[28].mxu0 }
 0x2ac   :  { %v1131_v37 = vpop.f32.mrb[29].mxu0  ;;  %2590 = vmatpush3.bf16.msra.mxu1 %v3270_v32 }
 0x2ad   :  { %2592 = vmatprep.subr.bf16.mxu1 %v3279_v45  ;;  %v1660_v37 = vld [vmem:[%s3637_s7 + $0x60] sm:$0xff] }
 0x2af   :  { %v1134_v46 = vpop.f32.mrb[30].mxu0 }
 0x2b0   :  { %v1136_v62 = vpop.f32.mrb[31].mxu0  ;;  %2594 = vmatpush3.bf16.msra.mxu1 %v3279_v45 }
 0x2b1   :  { %2596 = vmatprep.subr.bf16.mxu1 %v3341_v58 }
 0x2b3   :  { %v3459_v57 = vpop.f32.mrb[32].mxu0 }
 0x2b4   :  { %v1141_v33 = vpop.f32.mrb[33].mxu0  ;;  %2598 = vmatpush3.bf16.msra.mxu1 %v3341_v58 }
 0x2b5   :  { %2600 = vmatprep.subr.bf16.mxu1 %v3350_v7  ;;  %v1662_v33 = vld [vmem:[%s3637_s7 + $0x70] sm:$0xff] }
 0x2b7   :  { %v3463_v8 = vpop.f32.mrb[34].mxu0 }
 0x2b8   :  { %v1146_v20 = vpop.f32.mrb[35].mxu0  ;;  %2602 = vmatpush3.bf16.msra.mxu1 %v3350_v7 }
 0x2b9   :  { %2604 = vmatprep.subr.bf16.mxu1 %v3357_v40  ;;  %v1663_v20 = vld [vmem:[%s3637_s7 + $0x78] sm:$0xff] }
 0x2bb   :  { %v1149_v38 = vpop.f32.mrb[36].mxu0 }
 0x2bc   :  { %v1151_v25 = vpop.f32.mrb[37].mxu0  ;;  %2606 = vmatpush3.bf16.msra.mxu1 %v3357_v40 }
 0x2bd   :  { %2640 = vmatprep.subr.bf16.mxu1 %v3245_v44 }
 0x2bf   :  { %v1154_v55 = vpop.f32.mrb[38].mxu0 }
 0x2c0   :  { %v1156_v34 = vpop.f32.mrb[39].mxu0 }
 0x2c3   :  { %v2071_v9 = vpop.f32.mrb[40].mxu0 }
 0x2c4   :  { %v2072_v42 = vpop.f32.mrb[41].mxu0 }
 0x2c5   :  { %v2073_v43 = vadd.f32 %v2072_v42, %v2071_v9 }
 0x2c7   :  { %v1520_v49 = vadd.f32 %v2073_v43, %v1129_v36  ;;  %v2074_v52 = vpop.f32.mrb[42].mxu0  ;;  %v2687_v36 = vpack.c.bf16 %v1659_v28, %v1658_v48 }
 0x2c8   :  { %v2075_v12 = vpop.f32.mrb[43].mxu0 }
 0x2c9   :  { %v2076_v13 = vadd.f32 %v2075_v12, %v2074_v52  ;;  %v3470_v27 = vadd.f32 %v3397_v50, %v1520_v49  ;;  %2688 = vmatpush3.bf16.msra.mxu0 %v2687_v36 }
 0x2ca   :  { %2689 = vmatprep.subr.bf16.mxu0 %v2933_v0 }
 0x2cb   :  { %v1521_v41 = vadd.f32 %v2076_v13, %v1134_v46  ;;  %v2077_v3 = vpop.f32.mrb[44].mxu0  ;;  %1614 = vst [vmem:[#allocation14 + $0x30] sm:$0xff] %v3470_v27  ;;  %v1661_v46 = vld [vmem:[%s3637_s7 + $0x68] sm:$0xff]  ;;  %s2936_s7 = smov [#allocation14]  }
 0x2cc   :  { %v2078_v1 = vpop.f32.mrb[45].mxu0  ;;  %v2690_v62 = vpack.c.bf16 %v1661_v46, %v1660_v37  ;;  %s1779_s22 = sshll.u32 %s2936_s7, 4  ;;  %s1780_s22 = int_to_ptr.vmem [resolvable:$true] %s1779_s22 }
 0x2cd   :  { %v3474_v56 = vadd.f32 %v3397_v50, %v1521_v41  ;;  %v2079_v24 = vadd.f32 %v2078_v1, %v2077_v3  ;;  %v1624_v1 = vld [vmem:[#allocation12 + $0x30] sm:$0xff]  ;;  %s2845_s9 = scalar_lea.vmem %s1780_s22, 2048  ;;  %p2850_p7 = scmp.lt.s32.totalorder %s1780_s22, %s1780_s22 }
 0x2ce   :  { %2691 = vmatpush3.bf16.msra.mxu0 %v2690_v62  ;;  %v1626_v5 = vmul.f32 %v1624_v1, %v3470_v27  ;;  %p2846_p6 = scmp.ne.s32.totalorder %s1780_s22, %s2845_s9  ;;  %p2851_p8 = scmp.lt.s32.totalorder %s2845_s9, %s2845_s9 }
 0x2cf   :  { %1615 = vst [vmem:[#allocation14 + $0x38] sm:$0xff] %v3474_v56  ;;  %v1522_v6 = vadd.f32 %v2079_v24, %v1149_v38  ;;  %v2080_v59 = vpop.f32.mrb[46].mxu0  ;;  %2692 = vmatprep.subr.bf16.mxu0 %v2933_v0  ;;  %v2693_v38 = vpack.c.bf16 %v1663_v20, %v1662_v33 }
 0x2d0   :  { %v2081_v60 = vpop.f32.mrb[47].mxu0  ;;  %p2852_p9 = por %p2851_p8, %p2850_p7 }
 0x2d1   :  { %v3478_v61 = vadd.f32 %v3397_v50, %v1522_v6  ;;  %v2082_v47 = vadd.f32 %v2081_v60, %v2080_v59  ;;  %v1627_v6 = vmul.f32 %v1625_v53, %v3474_v56 }
 0x2d2   :  { %2694 = vmatpush3.bf16.msra.mxu0 %v2693_v38  ;;  %p2853_p10 = pnand %p2852_p9, %p2846_p6 }
 0x2d3   :  { %1616 = vst [vmem:[#allocation14 + $0x70] sm:$0xff] %v3478_v61  ;;  %v1523_v63 = vadd.f32 %v2082_v47, %v1154_v55  ;;  %v1628_v29 = vmul.f32 %v1624_v1, %v3478_v61  ;;  %v1630_v31 = vadd.f32 %v1627_v6, %v1626_v5 }
 0x2d5   :  { %v3482_v15 = vadd.f32 %v3397_v50, %v1523_v63  ;;  %v1631_v28 = vrot.slane %v1630_v31, 4 }
 0x2d7   :  { %1617 = vst [vmem:[#allocation14 + $0x78] sm:$0xff] %v3482_v15  ;;  %v1629_v47 = vmul.f32 %v1625_v53, %v3482_v15  ;;  %v1632_v62 = vadd.f32 %v1631_v28, %v1630_v31 }
 0x2d9   :  { %v1637_v10 = vadd.f32 %v1629_v47, %v1628_v29 }
 0x2db   :  { %v1638_v36 = vrot.slane %v1637_v10, 4 }
 0x2dd   :  { %v1639_v33 = vadd.f32 %v1638_v36, %v1637_v10 }
 0x332   :  { %v2154_v25 = vpop.f32.mrb[16].mxu1 }
 0x333   :  { %759 = vst [vmem:[#allocation15 + $0x8] sm:$0xff] %v2154_v25  ;;  %v735_v55 = vpop.f32.mrb[17].mxu1 }
 0x334   :  { %758 = vst [vmem:[#allocation15] sm:$0xff] %v735_v55 }
 0x33a   :  { %v2157_v34 = vpop.f32.mrb[18].mxu1 }
 0x33b   :  { %761 = vst [vmem:[#allocation15 + $0x48] sm:$0xff] %v2157_v34  ;;  %v745_v0 = vpop.f32.mrb[19].mxu1  ;;  %v1633_v34 = vrot.slane %v1632_v62, 2 }
 0x33c   :  { %760 = vst [vmem:[#allocation15 + $0x40] sm:$0xff] %v745_v0 }
 0x352   :  { %v2192_v9 = vpop.f32.mrb[20].mxu1 }
 0x353   :  { %1002 = vst [vmem:[#allocation15 + $0x28] sm:$0xff] %v2192_v9  ;;  %v976_v42 = vpop.f32.mrb[21].mxu1 }
 0x354   :  { %1001 = vst [vmem:[#allocation15 + $0x20] sm:$0xff] %v976_v42  ;;  %v1634_v42 = vadd.f32 %v1633_v34, %v1632_v62 }
 0x35a   :  { %v2195_v43 = vpop.f32.mrb[22].mxu1 }
 0x35b   :  { %1004 = vst [vmem:[#allocation15 + $0x68] sm:$0xff] %v2195_v43  ;;  %v986_v49 = vpop.f32.mrb[23].mxu1 }
 0x35c   :  { %1003 = vst [vmem:[#allocation15 + $0x60] sm:$0xff] %v986_v49 }
 0x372   :  { %v2007_v52 = vpop.f32.mrb[24].mxu1 }
 0x373   :  { %v2008_v12 = vpop.f32.mrb[25].mxu1 }
 0x374   :  { %v2009_v13 = vadd.f32 %v2008_v12, %v2007_v52  ;;  %v1635_v12 = vrot.slane %v1634_v42, 1 }
 0x376   :  { %v1276_v41 = vadd.f32 %v2009_v13, %v3443_v22  ;;  %v2010_v3 = vpop.f32.mrb[26].mxu1 }
 0x377   :  { %v2011_v24 = vpop.f32.mrb[27].mxu1 }
 0x378   :  { %v2012_v59 = vadd.f32 %v2011_v24, %v2010_v3  ;;  %v1280_v60 = vadd.f32 %v3397_v50, %v1276_v41  ;;  %v1636_v41 = vadd.f32 %v1635_v12, %v1634_v42 }
 0x37a   :  { %v1277_v63 = vadd.f32 %v2012_v59, %v3449_v54  ;;  %v2013_v4 = vpop.f32.mrb[28].mxu1  ;;  %2228 = vmatprep.mubr.f32.mxu1 %v1280_v60  ;;  %1370 = vst [vmem:[#allocation14 + $0x10] sm:$0xff] %v1280_v60  ;;  %v1382_v17 = vmul.f32 %v1380_v26, %v1280_v60 }
 0x37b   :  { %v2014_v22 = vpop.f32.mrb[29].mxu1 }
 0x37c   :  { %v1281_v18 = vadd.f32 %v3397_v50, %v1277_v63  ;;  %v2015_v30 = vadd.f32 %v2014_v22, %v2013_v4 }
 0x37e   :  { %1371 = vst [vmem:[#allocation14 + $0x18] sm:$0xff] %v1281_v18  ;;  %v1383_v16 = vmul.f32 %v1381_v23, %v1281_v18  ;;  %v1278_v54 = vadd.f32 %v2015_v30, %v3459_v57  ;;  %v2016_v35 = vpop.f32.mrb[30].mxu1  ;;  %2229 = vmatmul.mubr.f32.vlgmr.msra.gmra.mrb[32].mxu1 %v1281_v18 }
 0x37f   :  { %2642 = vmatpush3.bf16.msra.mxu1 %v3245_v44  ;;  %v2017_v11 = vpop.f32.mrb[31].mxu1 }
 0x380   :  { %v1386_v39 = vadd.f32 %v1383_v16, %v1382_v17  ;;  %v2018_v21 = vadd.f32 %v2017_v11, %v2016_v35  ;;  %2644 = vmatprep.subr.bf16.mxu1 %v3249_v51  ;;  %v1282_v48 = vadd.f32 %v3397_v50, %v1278_v54 }
 0x382   :  { %v1387_v37 = vrot.slane %v1386_v39, 4  ;;  %v1279_v46 = vadd.f32 %v2018_v21, %v3463_v8  ;;  %2231 = vmatprep.mubr.f32.mxu1 %v1282_v48  ;;  %1372 = vst [vmem:[#allocation14 + $0x50] sm:$0xff] %v1282_v48  ;;  %v1384_v38 = vmul.f32 %v1380_v26, %v1282_v48 }
 0x383   :  { %2646 = vmatpush3.bf16.msra.mxu1 %v3249_v51  ;;  %v1640_v51 = vrot.slane %v1639_v33, 2 }
 0x384   :  { %v1388_v57 = vadd.f32 %v1387_v37, %v1386_v39  ;;  %2648 = vmatprep.subr.bf16.mxu1 %v3261_v2  ;;  %v1283_v44 = vadd.f32 %v3397_v50, %v1279_v46 }
 0x385   :  { %v1641_v52 = vadd.f32 %v1640_v51, %v1639_v33 }
 0x386   :  { %v1389_v20 = vrot.slane %v1388_v57, 2  ;;  %2232 = vmatmul.mubr.f32.gmra.mrb[34].mxu1 %v1283_v44  ;;  %1373 = vst [vmem:[#allocation14 + $0x58] sm:$0xff] %v1283_v44  ;;  %v1385_v25 = vmul.f32 %v1381_v23, %v1283_v44 }
 0x387   :  { %2650 = vmatpush3.bf16.msra.mxu1 %v3261_v2  ;;  %2266 = vmatprep.mubr.f32.mxu1 %v3470_v27  ;;  %v1642_v53 = vrot.slane %v1641_v52, 1 }
 0x388   :  { %v1390_v8 = vadd.f32 %v1389_v20, %v1388_v57  ;;  %v1393_v55 = vadd.f32 %v1385_v25, %v1384_v38  ;;  %2652 = vmatprep.subr.bf16.mxu1 %v3270_v32 }
 0x389   :  { %v1643_v1 = vadd.f32 %v1642_v53, %v1641_v52 }
 0x38a   :  { %v1391_v0 = vrot.slane %v1390_v8, 1  ;;  %v1394_v9 = vrot.slane %v1393_v55, 4 }
 0x38b   :  { %2654 = vmatpush3.bf16.msra.mxu1 %v3270_v32 }
 0x38c   :  { %v1395_v50 = vadd.f32 %v1394_v9, %v1393_v55  ;;  %2656 = vmatprep.subr.bf16.mxu1 %v3279_v45  ;;  %v1392_v43 = vadd.f32 %v1391_v0, %v1390_v8 }
 0x38e   :  { %v1396_v49 = vrot.slane %v1395_v50, 2  ;;  %v1400_v2 = vadd.f32 %v1392_v43, %v3433_v14 }
 0x38f   :  { %2658 = vmatpush3.bf16.msra.mxu1 %v3279_v45 }
 0x390   :  { %v1397_v27 = vadd.f32 %v1396_v49, %v1395_v50  ;;  %2660 = vmatprep.subr.bf16.mxu1 %v3341_v58  ;;  %v1644_v24 = vadd.f32 %v1636_v41, %v1400_v2 }
 0x392   :  { %v1398_v13 = vrot.slane %v1397_v27, 1  ;;  %v1646_v14 = vmul.f32 0.0011111111, %v1644_v24 }
 0x393   :  { %2662 = vmatpush3.bf16.msra.mxu1 %v3341_v58 }
 0x394   :  { %2664 = vmatprep.subr.bf16.mxu1 %v3350_v7  ;;  %v1399_v32 = vadd.f32 %v1398_v13, %v1397_v27 }
 0x396   :  { %v1401_v3 = vadd.f32 %v1399_v32, %v3435_v19 }
 0x397   :  { %2666 = vmatpush3.bf16.msra.mxu1 %v3350_v7 }
 0x398   :  { %2668 = vmatprep.subr.bf16.mxu1 %v3357_v40  ;;  %v1645_v45 = vadd.f32 %v1643_v1, %v1401_v3 }
 0x39a   :  { %v1647_v6 = vmul.f32 0.0011111111, %v1645_v45 }
 0x39b   :  { %2670 = vmatpush3.bf16.msra.mxu1 %v3357_v40 }
 0x39c   :  { %v1674_v59 = vsel %vm1673_vm4, %v1647_v6, %v1646_v14 }
 0x39d   :  { %2305 = vmatmul.mubr.f32.vlgmr.msra.gmra.mrb[48].mxu0 %v1674_v59 }
 0x39e   :  { %2267 = vmatmul.mubr.f32.vlgmr.msra.gmra.mrb[36].mxu1 %v3474_v56 }
 0x39f   :  { %2269 = vmatprep.mubr.f32.mxu1 %v3478_v61 }
 0x3a2   :  { %2270 = vmatmul.mubr.f32.gmra.mrb[38].mxu1 %v3482_v15 }
 0x3a3   :  { %2856 = shalt.err (!%p2853_p10)
}
 0x3a4   :  { %s2857_s27 = scalar_lea.hbm %s3640_s10, 2048 }
 0x3a5   :  { %p2858_p11 = scmp.ne.s32.totalorder %s3640_s10, %s2857_s27  ;;  %p2861_p12 = scmp.lt.u32.totalorder %s2857_s27, %s3640_s10 }
 0x3a7   :  { %p2863_p13 = pnand %p2861_p12, %p2858_p11 }
 0x3a9   :  { %2866 = shalt.err (!%p2863_p13)
}
 0x3aa   :  { %1785 = dma.vmem_to_hbm [thread:$0]  %s1780_s22, 2048, %s3640_s10, [#allocation5], %s2924_s13, %s2924_s13, %s2925_s14   ;;  %v2937_v56 = vmov 1966171168   ;;  %v1750_v15 = vlaneseq  ;;  %vm1771_vm5 = vcmask 57344  }
 0x3ab   :  { %v1748_v61 = vunpack.c.l.s4 %v2937_v56  ;;  %v1846_v63 = vld [vmem:[%s3638_s8] ss:$0 sm:$0xff]  ;;  %s2938_s10 = smov [#allocation15]   ;;  %s2939_s5 = smov [#allocation17]  }
 0x3ac   :  { %v1751_v47 = vshrl.u32 %v1750_v15, 7  ;;  %s1791_s17 = sshll.u32 %s2938_s10, 4  ;;  %s1803_s19 = sshll.u32 %s2939_s5, 4  ;;  %s1792_s17 = int_to_ptr.vmem [resolvable:$true] %s1791_s17  ;;  %s3593_s19 = int_to_ptr.vmem [resolvable:$true] %s1803_s19 }
 0x3ad   :  { %v1749_v60 = vunpack.c.0.s8 %v1748_v61  ;;  %s2867_s8 = scalar_lea.vmem %s1792_s17, 2048  ;;  %p2872_p1 = scmp.lt.s32.totalorder %s1792_s17, %s1792_s17 }
 0x3ae   :  { %p2868_p0 = scmp.ne.s32.totalorder %s1792_s17, %s2867_s8  ;;  %p2873_p2 = scmp.lt.s32.totalorder %s2867_s8, %s2867_s8 }
 0x3af   :  { %v1752_v4 = vsub.s32 %v1749_v60, %v1751_v47 }
 0x3b0   :  { %p2874_p3 = por %p2873_p2, %p2872_p1 }
 0x3b2   :  { %p2875_p4 = pnand %p2874_p3, %p2868_p0 }
 0x451   :  { %v2230_v58 = vpop.f32.mrb[32].mxu1 }
 0x452   :  { %1376 = vst [vmem:[#allocation15 + $0x18] sm:$0xff] %v2230_v58  ;;  %v1350_v7 = vpop.f32.mrb[33].mxu1 }
 0x453   :  { %1375 = vst [vmem:[#allocation15 + $0x10] sm:$0xff] %v1350_v7 }
 0x459   :  { %v2233_v40 = vpop.f32.mrb[34].mxu1 }
 0x45a   :  { %1378 = vst [vmem:[#allocation15 + $0x58] sm:$0xff] %v2233_v40  ;;  %v1360_v19 = vpop.f32.mrb[35].mxu1 }
 0x45b   :  { %1377 = vst [vmem:[#allocation15 + $0x50] sm:$0xff] %v1360_v19 }
 0x470   :  { %v1742_v5 = vpop.f32.mrb[48].mxu0 }
 0x471   :  { %v2268_v23 = vpop.f32.mrb[36].mxu1  ;;  %v1743_v26 = vadd.f32 %v1846_v63, %v1742_v5  ;;  %v2306_v22 = vpop.f32.mrb[49].mxu0 }
 0x472   :  { %1620 = vst [vmem:[#allocation15 + $0x38] sm:$0xff] %v2268_v23  ;;  %v1594_v29 = vpop.f32.mrb[37].mxu1 }
 0x473   :  { %v1753_v18 = vrot.slane %v1743_v26, %v1752_v4  ;;  %1619 = vst [vmem:[#allocation15 + $0x30] sm:$0xff] %v1594_v29 }
 0x475   :  { %v1754_v30 = vcombine.high %v1753_v18, %v1753_v18  ;;  %v1761_v31 = vrot.slane %v1753_v18, %v1752_v4  ;;  %v2271_v10 = vpop.f32.mrb[38].mxu1 }
 0x476   :  { %1622 = vst [vmem:[#allocation15 + $0x78] sm:$0xff] %v2271_v10  ;;  %v1604_v16 = vpop.f32.mrb[39].mxu1 }
 0x477   :  { %v1768_v17 = vrot.slane %v1754_v30, %v1752_v4  ;;  %1621 = vst [vmem:[#allocation15 + $0x70] sm:$0xff] %v1604_v16  ;;  %1772 = vst.msk [vmem:[#allocation17] sm:$0x1] %vm1771_vm5, %v1761_v31 }
 0x478   :  { %2878 = shalt.err (!%p2875_p4)
}
 0x479   :  { %s2879_s20 = scalar_lea.hbm %s3641_s11, 2048 }
 0x47a   :  { %p2880_p5 = scmp.ne.s32.totalorder %s3641_s11, %s2879_s20  ;;  %p2883_p6 = scmp.lt.u32.totalorder %s2879_s20, %s3641_s11 }
 0x47c   :  { %p2885_p7 = pnand %p2883_p6, %p2880_p5 }
 0x47e   :  { %2888 = shalt.err (!%p2885_p7)
}
 0x47f   :  { %1797 = dma.vmem_to_hbm [thread:$0]  %s1792_s17, 2048, %s3641_s11, [#allocation16], %s2924_s13, %s2924_s13, %s2925_s14   ;;  %1773 = vst.msk [vmem:[#allocation17 + $0x1] sm:$0x1] %vm1771_vm5, %v1768_v17 }
 0x480   :  { %s2889_s9 = scalar_lea.vmem %s3593_s19, 32  ;;  %p2894_p9 = scmp.lt.s32.totalorder %s3593_s19, %s3593_s19 }
 0x481   :  { %p2890_p8 = scmp.ne.s32.totalorder %s3593_s19, %s2889_s9  ;;  %p2895_p10 = scmp.lt.s32.totalorder %s2889_s9, %s2889_s9 }
 0x483   :  { %p2896_p11 = por %p2895_p10, %p2894_p9 }
 0x485   :  { %p2897_p12 = pnand %p2896_p11, %p2890_p8 }
 0x487   :  { %2900 = shalt.err (!%p2897_p12)
}
 0x488   :  { %s2901_s27 = scalar_lea.hbm %s3642_s12, 32 }
 0x489   :  { %p2902_p13 = scmp.ne.s32.totalorder %s3642_s12, %s2901_s27  ;;  %p2905_p0 = scmp.lt.u32.totalorder %s2901_s27, %s3642_s12 }
 0x48b   :  { %p2907_p1 = pnand %p2905_p0, %p2902_p13 }
 0x48d   :  { %2910 = shalt.err (!%p2907_p1)
}
 0x48e   :  { %s2940_s13 = smov 1  }
 0x48f   :  { %1809 = dma.vmem_to_hbm [thread:$0]  %s3593_s19, 32, %s3642_s12, [#allocation16], %s2929_s18, %s2929_s18, %s2940_s13  }
 0x490   :  { %2919 = dma.done.wait [#allocation5], 2048  }
 0x491   :  { %2920 = vsyncadd [#allocation5], 4294965248 }
 0x492   :  { %2921 = dma.done.wait [#allocation16], 2080  }
 0x493   :  { %2922 = vsyncadd [#allocation16], 4294965216 }
 0x494   :  { %1819 = vsyncpa [#allocation4], 1 }
 0x495   :  { %1820 = vsyncpa [#allocation7], 1 }
 0x496   :  { %1821 = vsyncpa [#allocation10], 1 }
 0x497   :  { %1822 = vsyncpa [#allocation13], 1 }
 0x498   :  { %1823 = vsyncpa [#allocation5], 1 }
 0x499   :  { %1824 = vsyncpa [#allocation16], 1 }

// kernel: tpu_custom_call.1
= control target key start
LH: loop header
LB: loop body
LE: loop exit
PB: predicated region body
PF: predicated region fallthrough
CT: control target
= control target key end

     0   :  { %18 = vsyncpa [#allocation4], 0  ;;  %s3630_s0 = inlined_call_operand.hbm [shape: f32[2,16,192], index: 0, kind: input, shape index: {}]   ;;  %s3631_s1 = inlined_call_operand.vmem [shape: f32[2,2,16,192], index: 1, kind: input, shape index: {}]   ;;  %s3632_s2 = inlined_call_operand.hbm [shape: f32[192,128], index: 2, kind: input, shape index: {}]   ;;  %s3633_s3 = inlined_call_operand.hbm [shape: f32[2,192,128], index: 3, kind: input, shape index: {}]   ;;  %s3634_s4 = inlined_call_operand.hbm [shape: f32[2,2,256,128], index: 4, kind: input, shape index: {}]   ;;  %s3635_s5 = inlined_call_operand.vmem [shape: f32[1,128], index: 5, kind: input, shape index: {}]   ;;  %s3636_s6 = inlined_call_operand.hbm [shape: f32[128,128], index: 6, kind: input, shape index: {}]   ;;  %s3637_s7 = inlined_call_operand.vmem [shape: f32[128,8], index: 7, kind: input, shape index: {}]   ;;  %s3638_s8 = inlined_call_operand.vmem [shape: f32[1,8], index: 8, kind: input, shape index: {}]   ;;  %s3639_s9 = inlined_call_operand.hbm [shape: f32[2,2,16,128], index: 9, kind: input, shape index: {}]   ;;  %s3640_s10 = inlined_call_operand.hbm [shape: f32[2,2,2,16,128], index: 10, kind: output, shape index: {0}]   ;;  %s3641_s11 = inlined_call_operand.hbm [shape: f32[2,2,2,16,128], index: 11, kind: output, shape index: {1}]   ;;  %s3642_s12 = inlined_call_operand.hbm [shape: f32[2,1,8], index: 12, kind: output, shape index: {2}]  }
   0x1   :  { %19 = vsyncpa [#allocation7], 0 }
   0x2   :  { %20 = vsyncpa [#allocation10], 0 }
   0x3   :  { %21 = vsyncpa [#allocation13], 0 }
   0x4   :  { %22 = vsyncpa [#allocation5], 0 }
   0x5   :  { %23 = vsyncpa [#allocation16], 0  ;;  %s2923_s21 = smov [#allocation6]   ;;  %s2713_s25 = scalar_lea.hbm %s3632_s2, 3072 }
   0x6   :  { %s43_s22 = sshll.u32 %s2923_s21, 4  ;;  %p2714_p0 = scmp.ne.s32.totalorder %s3632_s2, %s2713_s25  ;;  %s44_s22 = int_to_ptr.vmem [resolvable:$true] %s43_s22 }
   0x7   :  { %p2717_p1 = scmp.lt.u32.totalorder %s2713_s25, %s3632_s2 }
   0x9   :  { %p2719_p2 = pnand %p2717_p1, %p2714_p0 }
   0xb   :  { %2722 = shalt.err (!%p2719_p2)
}
   0xc   :  { %s2723_s30 = scalar_lea.vmem %s44_s22, 3072  ;;  %p2728_p4 = scmp.lt.s32.totalorder %s44_s22, %s44_s22 }
   0xd   :  { %p2724_p3 = scmp.ne.s32.totalorder %s44_s22, %s2723_s30  ;;  %p2729_p5 = scmp.lt.s32.totalorder %s2723_s30, %s2723_s30 }
   0xf   :  { %p2730_p6 = por %p2729_p5, %p2728_p4 }
  0x11   :  { %p2731_p7 = pnand %p2730_p6, %p2724_p3 }
  0x13   :  { %2734 = shalt.err (!%p2731_p7)
}
  0x14   :  { %s2924_s13 = smov 128   ;;  %s2925_s14 = smov 8  }
  0x15   :  { %49 = dma.hbm_to_vmem [thread:$0]  %s3632_s2, 3072, %s44_s22, [#allocation7], %s2924_s13, %s2924_s13, %s2925_s14  }
  0x16   :  { %s2926_s17 = smov [#allocation9]   ;;  %s2927_s19 = smov [#allocation3]  }
  0x17   :  { %s67_s18 = sshll.u32 %s2926_s17, 4  ;;  %s29_s20 = sshll.u32 %s2927_s19, 4  ;;  %s68_s18 = int_to_ptr.vmem [resolvable:$true] %s67_s18  ;;  %s30_s20 = int_to_ptr.vmem [resolvable:$true] %s29_s20 }
  0x18   :  { %s2735_s24 = scalar_lea.hbm %s3634_s4, 16384 }
  0x19   :  { %p2736_p8 = scmp.ne.s32.totalorder %s3634_s4, %s2735_s24  ;;  %p2739_p9 = scmp.lt.u32.totalorder %s2735_s24, %s3634_s4 }
  0x1b   :  { %p2741_p10 = pnand %p2739_p9, %p2736_p8 }
  0x1d   :  { %2744 = shalt.err (!%p2741_p10)
}
  0x1e   :  { %s2745_s2 = scalar_lea.vmem %s68_s18, 16384  ;;  %p2750_p12 = scmp.lt.s32.totalorder %s68_s18, %s68_s18 }
  0x1f   :  { %p2746_p11 = scmp.ne.s32.totalorder %s68_s18, %s2745_s2  ;;  %p2751_p13 = scmp.lt.s32.totalorder %s2745_s2, %s2745_s2 }
  0x21   :  { %p2752_p0 = por %p2751_p13, %p2750_p12 }
  0x23   :  { %p2753_p1 = pnand %p2752_p0, %p2746_p11 }
  0x25   :  { %2756 = shalt.err (!%p2753_p1)
}
  0x26   :  { %73 = dma.hbm_to_vmem [thread:$0]  %s3634_s4, 16384, %s68_s18, [#allocation10], %s2924_s13, %s2924_s13, %s2925_s14  }
  0x27   :  { %s2757_s16 = scalar_lea.hbm %s3630_s0, 1024 }
  0x28   :  { %p2758_p2 = scmp.ne.s32.totalorder %s3630_s0, %s2757_s16  ;;  %p2761_p3 = scmp.lt.u32.totalorder %s2757_s16, %s3630_s0 }
  0x2a   :  { %p2763_p4 = pnand %p2761_p3, %p2758_p2 }
  0x2c   :  { %2766 = shalt.err (!%p2763_p4)
}
  0x2d   :  { %s2767_s24 = scalar_lea.vmem %s30_s20, 1024  ;;  %p2772_p6 = scmp.lt.s32.totalorder %s30_s20, %s30_s20 }
  0x2e   :  { %p2768_p5 = scmp.ne.s32.totalorder %s30_s20, %s2767_s24  ;;  %p2773_p7 = scmp.lt.s32.totalorder %s2767_s24, %s2767_s24 }
  0x30   :  { %p2774_p8 = por %p2773_p7, %p2772_p6 }
  0x32   :  { %p2775_p9 = pnand %p2774_p8, %p2768_p5 }
  0x34   :  { %2778 = shalt.err (!%p2775_p9)
}
  0x35   :  { %s2928_s4 = smov 256   ;;  %s2929_s18 = smov 16  }
  0x36   :  { %35 = dma.hbm_to_vmem [thread:$0]  %s3630_s0, 1024, %s30_s20, [#allocation4], %s2928_s4, %s2928_s4, %s2929_s18  }
  0x37   :  { %s2930_s27 = smov [#allocation8]   ;;  %s2931_s2 = smov [#allocation11]  }
  0x38   :  { %s55_s28 = sshll.u32 %s2930_s27, 4  ;;  %s81_s22 = sshll.u32 %s2931_s2, 4  ;;  %s56_s28 = int_to_ptr.vmem [resolvable:$true] %s55_s28  ;;  %s82_s22 = int_to_ptr.vmem [resolvable:$true] %s81_s22 }
  0x39   :  { %s2779_s15 = scalar_lea.hbm %s3633_s3, 6144 }
  0x3a   :  { %p2780_p10 = scmp.ne.s32.totalorder %s3633_s3, %s2779_s15  ;;  %p2783_p11 = scmp.lt.u32.totalorder %s2779_s15, %s3633_s3 }
  0x3c   :  { %p2785_p12 = pnand %p2783_p11, %p2780_p10 }
  0x3e   :  { %2788 = shalt.err (!%p2785_p12)
}
  0x3f   :  { %s2789_s0 = scalar_lea.vmem %s56_s28, 6144  ;;  %p2794_p0 = scmp.lt.s32.totalorder %s56_s28, %s56_s28 }
  0x40   :  { %p2790_p13 = scmp.ne.s32.totalorder %s56_s28, %s2789_s0  ;;  %p2795_p1 = scmp.lt.s32.totalorder %s2789_s0, %s2789_s0 }
  0x42   :  { %p2796_p2 = por %p2795_p1, %p2794_p0 }
  0x44   :  { %p2797_p3 = pnand %p2796_p2, %p2790_p13 }
  0x46   :  { %2800 = shalt.err (!%p2797_p3)
}
  0x47   :  { %61 = dma.hbm_to_vmem [thread:$0]  %s3633_s3, 6144, %s56_s28, [#allocation7], %s2924_s13, %s2924_s13, %s2925_s14  }
  0x48   :  { %s2801_s25 = scalar_lea.hbm %s3636_s6, 2048 }
  0x49   :  { %p2802_p4 = scmp.ne.s32.totalorder %s3636_s6, %s2801_s25  ;;  %p2805_p5 = scmp.lt.u32.totalorder %s2801_s25, %s3636_s6 }
  0x4b   :  { %p2807_p6 = pnand %p2805_p5, %p2802_p4 }
  0x4d   :  { %2810 = shalt.err (!%p2807_p6)
}
  0x4e   :  { %s2811_s30 = scalar_lea.vmem %s82_s22, 2048  ;;  %p2816_p8 = scmp.lt.s32.totalorder %s82_s22, %s82_s22 }
  0x4f   :  { %p2812_p7 = scmp.ne.s32.totalorder %s82_s22, %s2811_s30  ;;  %p2817_p9 = scmp.lt.s32.totalorder %s2811_s30, %s2811_s30 }
  0x51   :  { %p2818_p10 = por %p2817_p9, %p2816_p8 }
  0x53   :  { %p2819_p11 = pnand %p2818_p10, %p2812_p7 }
  0x55   :  { %2822 = shalt.err (!%p2819_p11)
}
  0x56   :  { %87 = dma.hbm_to_vmem [thread:$0]  %s3636_s6, 2048, %s82_s22, [#allocation10], %s2924_s13, %s2924_s13, %s2925_s14  }
  0x57   :  { %s2932_s15 = smov [#allocation12]   ;;  %s2823_s21 = scalar_lea.hbm %s3639_s9, 1024 }
  0x58   :  { %s97_s16 = sshll.u32 %s2932_s15, 4  ;;  %p2824_p12 = scmp.ne.s32.totalorder %s3639_s9, %s2823_s21  ;;  %s98_s16 = int_to_ptr.vmem [resolvable:$true] %s97_s16 }
  0x59   :  { %p2827_p13 = scmp.lt.u32.totalorder %s2823_s21, %s3639_s9 }
  0x5b   :  { %p2829_p0 = pnand %p2827_p13, %p2824_p12 }
  0x5d   :  { %2832 = shalt.err (!%p2829_p0)
}
  0x5e   :  { %s2833_s4 = scalar_lea.vmem %s98_s16, 1024  ;;  %p2838_p2 = scmp.lt.s32.totalorder %s98_s16, %s98_s16 }
  0x5f   :  { %p2834_p1 = scmp.ne.s32.totalorder %s98_s16, %s2833_s4  ;;  %p2839_p3 = scmp.lt.s32.totalorder %s2833_s4, %s2833_s4 }
  0x61   :  { %p2840_p4 = por %p2839_p3, %p2838_p2 }
  0x63   :  { %p2841_p5 = pnand %p2840_p4, %p2834_p1 }
  0x65   :  { %2844 = shalt.err (!%p2841_p5)
}
  0x66   :  { %103 = dma.hbm_to_vmem [thread:$0]  %s3639_s9, 1024, %s98_s16, [#allocation13], %s2924_s13, %s2924_s13, %s2925_s14  }
  0x67   :  { %2911 = dma.done.wait [#allocation4], 1024  }
  0x68   :  { %2912 = vsyncadd [#allocation4], 4294966272 }
  0x69   :  { %2913 = dma.done.wait [#allocation7], 9216  }
  0x6a   :  { %2914 = vsyncadd [#allocation7], 4294958080 }
  0x6b   :  { %2915 = dma.done.wait [#allocation10], 18432  }
  0x6c   :  { %2916 = vsyncadd [#allocation10], 4294948864 }
  0x6d   :  { %2917 = dma.done.wait [#allocation13], 1024  }
  0x6e   :  { %2918 = vsyncadd [#allocation13], 4294966272  ;;  %v2933_v0 = vmov 0.0|0.0   ;;  %v130_v1 = vld [vmem:[#allocation6] sm:$0xff]  ;;  %v131_v2 = vld [vmem:[#allocation6 + $0x8] sm:$0xff]  ;;  %vm154_vm0 = vcmask 523264  }
  0x6f   :  { %2307 = vmatprep.subr.bf16.mxu0 %v2933_v0  ;;  %2343 = vmatprep.subr.bf16.mxu1 %v2933_v0  ;;  %v132_v3 = vld [vmem:[#allocation6 + $0x10] sm:$0xff]  ;;  %v2308_v4 = vpack.c.bf16 %v131_v2, %v130_v1  ;;  %v133_v5 = vld [vmem:[#allocation6 + $0x18] sm:$0xff]  ;;  %v134_v7 = vld [vmem:[#allocation6 + $0x20] sm:$0xff]  ;;  %vm272_vm1 = vcmask 1040384   ;;  %vm323_vm2 = vcmask 1046528   ;;  %vm2935_vm3 = vmmov 0  }
  0x70   :  { %v2311_v6 = vpack.c.bf16 %v133_v5, %v132_v3  ;;  %v135_v8 = vld [vmem:[#allocation6 + $0x28] sm:$0xff]  ;;  %v136_v10 = vld [vmem:[#allocation6 + $0x30] sm:$0xff]  ;;  %v137_v11 = vld [vmem:[#allocation6 + $0x38] sm:$0xff]  ;;  %vm1673_vm4 = vcmask 1041409  }
  0x71   :  { %2309 = vmatpush1.bf16.msra.mxu0 %v2308_v4  ;;  %v2314_v9 = vpack.c.bf16 %v135_v8, %v134_v7  ;;  %v123_v12 = vld [vmem:[#allocation3 + $0x8] sm:$0xff]  ;;  %v385_v13 = vld [vmem:[#allocation8] sm:$0xff]  ;;  %v2317_v14 = vpack.c.bf16 %v137_v11, %v136_v10  ;;  %v387_v16 = vld [vmem:[#allocation8 + $0x10] sm:$0xff] }
  0x72   :  { %2310 = vmatprep.subr.bf16.mxu0 %v2933_v0  ;;  %1825 = vmatprep.mubr.msk.f32.mxu0 %vm154_vm0, %v123_v12  ;;  %v386_v15 = vld [vmem:[#allocation8 + $0x8] sm:$0xff]  ;;  %v388_v17 = vld [vmem:[#allocation8 + $0x18] sm:$0xff]  ;;  %v138_v18 = vld [vmem:[#allocation6 + $0x40] sm:$0xff] }
  0x73   :  { %v139_v19 = vld [vmem:[#allocation6 + $0x48] sm:$0xff]  ;;  %v2344_v20 = vpack.c.bf16 %v386_v15, %v385_v13  ;;  %v2347_v21 = vpack.c.bf16 %v388_v17, %v387_v16  ;;  %v389_v23 = vld [vmem:[#allocation8 + $0x20] sm:$0xff]  ;;  %v140_v25 = vld [vmem:[#allocation6 + $0x50] sm:$0xff] }
  0x74   :  { %v2320_v22 = vpack.c.bf16 %v139_v19, %v138_v18  ;;  %v390_v24 = vld [vmem:[#allocation8 + $0x28] sm:$0xff]  ;;  %v141_v26 = vld [vmem:[#allocation6 + $0x58] sm:$0xff]  ;;  %v391_v29 = vld [vmem:[#allocation8 + $0x30] sm:$0xff] }
  0x75   :  { %2312 = vmatpush1.bf16.msra.mxu0 %v2311_v6  ;;  %2345 = vmatpush1.bf16.msra.mxu1 %v2344_v20  ;;  %v2350_v27 = vpack.c.bf16 %v390_v24, %v389_v23  ;;  %v2323_v28 = vpack.c.bf16 %v141_v26, %v140_v25  ;;  %v392_v30 = vld [vmem:[#allocation8 + $0x38] sm:$0xff]  ;;  %v142_v31 = vld [vmem:[#allocation6 + $0x60] sm:$0xff]  ;;  %v143_v32 = vld [vmem:[#allocation6 + $0x68] sm:$0xff] }
  0x76   :  { %2313 = vmatprep.subr.bf16.mxu0 %v2933_v0  ;;  %2346 = vmatprep.subr.bf16.mxu1 %v2933_v0  ;;  %v2353_v33 = vpack.c.bf16 %v392_v30, %v391_v29  ;;  %v2326_v34 = vpack.c.bf16 %v143_v32, %v142_v31  ;;  %v393_v35 = vld [vmem:[#allocation8 + $0x40] sm:$0xff]  ;;  %v394_v36 = vld [vmem:[#allocation8 + $0x48] sm:$0xff]  ;;  %v144_v37 = vld [vmem:[#allocation6 + $0x70] sm:$0xff] }
  0x77   :  { %v145_v38 = vld [vmem:[#allocation6 + $0x78] sm:$0xff]  ;;  %v2356_v39 = vpack.c.bf16 %v394_v36, %v393_v35  ;;  %v395_v41 = vld [vmem:[#allocation8 + $0x50] sm:$0xff]  ;;  %v146_v43 = vld [vmem:[#allocation6 + $0x80] sm:$0xff] }
  0x78   :  { %v2329_v40 = vpack.c.bf16 %v145_v38, %v144_v37  ;;  %v396_v42 = vld [vmem:[#allocation8 + $0x58] sm:$0xff]  ;;  %v147_v44 = vld [vmem:[#allocation6 + $0x88] sm:$0xff]  ;;  %v397_v47 = vld [vmem:[#allocation8 + $0x60] sm:$0xff] }
  0x79   :  { %2315 = vmatpush1.bf16.msra.mxu0 %v2314_v9  ;;  %2348 = vmatpush1.bf16.msra.mxu1 %v2347_v21  ;;  %v2359_v45 = vpack.c.bf16 %v396_v42, %v395_v41  ;;  %v2332_v46 = vpack.c.bf16 %v147_v44, %v146_v43  ;;  %v398_v48 = vld [vmem:[#allocation8 + $0x68] sm:$0xff]  ;;  %v148_v49 = vld [vmem:[#allocation6 + $0x90] sm:$0xff]  ;;  %v149_v50 = vld [vmem:[#allocation6 + $0x98] sm:$0xff] }
  0x7a   :  { %2316 = vmatprep.subr.bf16.mxu0 %v2933_v0  ;;  %2349 = vmatprep.subr.bf16.mxu1 %v2933_v0  ;;  %v2362_v51 = vpack.c.bf16 %v398_v48, %v397_v47  ;;  %v2335_v52 = vpack.c.bf16 %v149_v50, %v148_v49  ;;  %v399_v53 = vld [vmem:[#allocation8 + $0x70] sm:$0xff]  ;;  %v400_v54 = vld [vmem:[#allocation8 + $0x78] sm:$0xff]  ;;  %v150_v55 = vld [vmem:[#allocation6 + $0xa0] sm:$0xff] }
  0x7b   :  { %v151_v56 = vld [vmem:[#allocation6 + $0xa8] sm:$0xff]  ;;  %v2365_v57 = vpack.c.bf16 %v400_v54, %v399_v53  ;;  %v401_v59 = vld [vmem:[#allocation8 + $0x80] sm:$0xff]  ;;  %v152_v61 = vld [vmem:[#allocation6 + $0xb0] sm:$0xff]  ;;  %v2934_v53 = vmov 0.0  }
  0x7c   :  { %v2338_v58 = vpack.c.bf16 %v151_v56, %v150_v55  ;;  %v402_v60 = vld [vmem:[#allocation8 + $0x88] sm:$0xff]  ;;  %v153_v62 = vld [vmem:[#allocation6 + $0xb8] sm:$0xff]  ;;  %v554_v63 = vld [vmem:[#allocation9 + $0x80] sm:$0xff]  ;;  %256 = vst [vmem:[#allocation2] sm:$0xff] %v2934_v53 }
  0x7d   :  { %2318 = vmatpush1.bf16.msra.mxu0 %v2317_v14  ;;  %2351 = vmatpush1.bf16.msra.mxu1 %v2350_v27  ;;  %v555_v1 = vld [vmem:[#allocation9 + $0x88] sm:$0xff]  ;;  %v2368_v2 = vpack.c.bf16 %v402_v60, %v401_v59  ;;  %v2341_v3 = vpack.c.bf16 %v153_v62, %v152_v61  ;;  %v538_v5 = vld [vmem:[#allocation9] sm:$0xff]  ;;  %v556_v7 = vld [vmem:[#allocation9 + $0x90] sm:$0xff]  ;;  %260 = vst [vmem:[#allocation2 + $0x20] sm:$0x3] %v2934_v53 }
  0x7e   :  { %2319 = vmatprep.subr.bf16.mxu0 %v2933_v0  ;;  %2352 = vmatprep.subr.bf16.mxu1 %v2933_v0  ;;  %v2379_v4 = vpack.c.bf16 %v555_v1, %v554_v63  ;;  %v539_v6 = vld [vmem:[#allocation9 + $0x8] sm:$0xff]  ;;  %v557_v8 = vld [vmem:[#allocation9 + $0x98] sm:$0xff]  ;;  %v122_v9 = vld [vmem:[#allocation3] sm:$0xff]  ;;  %261 = vst [vmem:[#allocation2 + $0x28] sm:$0x3] %v2934_v53 }
  0x7f   :  { %v2381_v10 = vpack.c.bf16 %v539_v6, %v538_v5  ;;  %v125_v11 = vld [vmem:[#allocation3 + $0x18] sm:$0xff]  ;;  %v2383_v12 = vpack.c.bf16 %v557_v8, %v556_v7  ;;  %v540_v13 = vld [vmem:[#allocation9 + $0x10] sm:$0xff]  ;;  %v558_v15 = vld [vmem:[#allocation9 + $0xa0] sm:$0xff]  ;;  %262 = vst [vmem:[#allocation2 + $0x30] sm:$0xff] %v2934_v53 }
  0x80   :  { %v541_v14 = vld [vmem:[#allocation9 + $0x18] sm:$0xff]  ;;  %v559_v16 = vld [vmem:[#allocation9 + $0xa8] sm:$0xff]  ;;  %v124_v17 = vld [vmem:[#allocation3 + $0x10] sm:$0xff]  ;;  %266 = vst [vmem:[#allocation2 + $0x50] sm:$0x3] %v2934_v53 }
  0x81   :  { %2321 = vmatpush1.bf16.msra.mxu0 %v2320_v22  ;;  %2354 = vmatpush1.bf16.msra.mxu1 %v2353_v33  ;;  %v2385_v18 = vpack.c.bf16 %v541_v14, %v540_v13  ;;  %v127_v19 = vld [vmem:[#allocation3 + $0x28] sm:$0xff]  ;;  %v2387_v20 = vpack.c.bf16 %v559_v16, %v558_v15  ;;  %v542_v21 = vld [vmem:[#allocation9 + $0x20] sm:$0xff]  ;;  %v560_v23 = vld [vmem:[#allocation9 + $0xb0] sm:$0xff]  ;;  %267 = vst [vmem:[#allocation2 + $0x58] sm:$0x3] %v2934_v53 }
  0x82   :  { %2322 = vmatprep.subr.bf16.mxu0 %v2933_v0  ;;  %2355 = vmatprep.subr.bf16.mxu1 %v2933_v0  ;;  %v543_v22 = vld [vmem:[#allocation9 + $0x28] sm:$0xff]  ;;  %v561_v24 = vld [vmem:[#allocation9 + $0xb8] sm:$0xff]  ;;  %v126_v25 = vld [vmem:[#allocation3 + $0x20] sm:$0xff] }
  0x83   :  { %v2389_v26 = vpack.c.bf16 %v543_v22, %v542_v21  ;;  %v129_v27 = vld [vmem:[#allocation3 + $0x38] sm:$0xff]  ;;  %v544_v29 = vld [vmem:[#allocation9 + $0x30] sm:$0xff]  ;;  %v562_v31 = vld [vmem:[#allocation9 + $0xc0] sm:$0xff] }
  0x84   :  { %v545_v30 = vld [vmem:[#allocation9 + $0x38] sm:$0xff]  ;;  %v563_v32 = vld [vmem:[#allocation9 + $0xc8] sm:$0xff]  ;;  %v128_v33 = vld [vmem:[#allocation3 + $0x30] sm:$0xff] }
  0x85   :  { %2324 = vmatpush1.bf16.msra.mxu0 %v2323_v28  ;;  %2357 = vmatpush1.bf16.msra.mxu1 %v2356_v39  ;;  %v2391_v28 = vpack.c.bf16 %v561_v24, %v560_v23  ;;  %v2395_v35 = vpack.c.bf16 %v563_v32, %v562_v31  ;;  %v546_v36 = vld [vmem:[#allocation9 + $0x40] sm:$0xff]  ;;  %v547_v37 = vld [vmem:[#allocation9 + $0x48] sm:$0xff]  ;;  %v403_v39 = vld [vmem:[#allocation8 + $0x90] sm:$0xff] }
  0x86   :  { %2325 = vmatprep.subr.bf16.mxu0 %v2933_v0  ;;  %2358 = vmatprep.subr.bf16.mxu1 %v2933_v0  ;;  %v2397_v38 = vpack.c.bf16 %v547_v37, %v546_v36  ;;  %v564_v42 = vld [vmem:[#allocation9 + $0xd0] sm:$0xff]  ;;  %v565_v43 = vld [vmem:[#allocation9 + $0xd8] sm:$0xff]  ;;  %v405_v47 = vld [vmem:[#allocation8 + $0xa0] sm:$0xff] }
  0x87   :  { %v2399_v44 = vpack.c.bf16 %v565_v43, %v564_v42  ;;  %v406_v49 = vld [vmem:[#allocation8 + $0xa8] sm:$0xff]  ;;  %v550_v55 = vld [vmem:[#allocation9 + $0x60] sm:$0xff]  ;;  %v408_v59 = vld [vmem:[#allocation8 + $0xb8] sm:$0xff] }
  0x88   :  { %v2374_v50 = vpack.c.bf16 %v406_v49, %v405_v47  ;;  %v551_v56 = vld [vmem:[#allocation9 + $0x68] sm:$0xff]  ;;  %v568_v61 = vld [vmem:[#allocation9 + $0xf0] sm:$0xff]  ;;  %v569_v62 = vld [vmem:[#allocation9 + $0xf8] sm:$0xff] }
  0x89   :  { %2327 = vmatpush1.bf16.msra.mxu0 %v2326_v34  ;;  %2360 = vmatpush1.bf16.msra.mxu1 %v2359_v45  ;;  %v2393_v34 = vpack.c.bf16 %v545_v30, %v544_v29  ;;  %v548_v45 = vld [vmem:[#allocation9 + $0x50] sm:$0xff]  ;;  %v2407_v63 = vpack.c.bf16 %v569_v62, %v568_v61  ;;  %v3138_v5 = vld [vmem:[%s3631_s1] sm:$0xff]  ;;  %v802_v7 = vld [vmem:[#allocation9 + $0x288] sm:$0xff] }
  0x8a   :  { %2328 = vmatprep.subr.bf16.mxu0 %v2933_v0  ;;  %2361 = vmatprep.subr.bf16.mxu1 %v2933_v0  ;;  %v552_v1 = vld [vmem:[#allocation9 + $0x70] sm:$0xff]  ;;  %v801_v6 = vld [vmem:[#allocation9 + $0x280] sm:$0xff]  ;;  %v3170_v13 = vld [vmem:[%s3631_s1 + $0x38] sm:$0xff] }
  0x8b   :  { %v2443_v8 = vpack.c.bf16 %v802_v7, %v801_v6  ;;  %v3177_v14 = vld [vmem:[%s3631_s1 + $0x30] sm:$0xff]  ;;  %v3183_v15 = vld [vmem:[%s3631_s1 + $0x48] sm:$0xff]  ;;  %v3190_v16 = vld [vmem:[%s3631_s1 + $0x40] sm:$0xff] }
  0x8c   :  { %v3222_v21 = vld [vmem:[%s3631_s1 + $0x78] sm:$0xff]  ;;  %v3227_v22 = vld [vmem:[%s3631_s1 + $0x70] sm:$0xff]  ;;  %v785_v31 = vld [vmem:[#allocation9 + $0x200] sm:$0xff] }
  0x8d   :  { %2330 = vmatpush1.bf16.msra.mxu0 %v2329_v40  ;;  %2363 = vmatpush1.bf16.msra.mxu1 %v2362_v51  ;;  %v404_v40 = vld [vmem:[#allocation8 + $0x98] sm:$0xff]  ;;  %v566_v51 = vld [vmem:[#allocation9 + $0xe0] sm:$0xff]  ;;  %v786_v32 = vld [vmem:[#allocation9 + $0x208] sm:$0xff] }
  0x8e   :  { %2331 = vmatprep.subr.bf16.mxu0 %v2933_v0  ;;  %2364 = vmatprep.subr.bf16.mxu1 %v2933_v0  ;;  %v2371_v41 = vpack.c.bf16 %v404_v40, %v403_v39  ;;  %v353_v39 = vld [vmem:[#allocation11] sm:$0xff]  ;;  %v354_v40 = vld [vmem:[#allocation11 + $0x8] sm:$0xff]  ;;  %v2445_v42 = vpack.c.bf16 %v786_v32, %v785_v31  ;;  %v787_v43 = vld [vmem:[#allocation9 + $0x210] sm:$0xff] }
  0x8f   :  { %v805_v49 = vld [vmem:[#allocation9 + $0x2a0] sm:$0xff]  ;;  %v359_v6 = vld [vmem:[#allocation11 + $0x30] sm:$0xff]  ;;  %v360_v7 = vld [vmem:[#allocation11 + $0x38] sm:$0xff] }
  0x90   :  { %v789_v62 = vld [vmem:[#allocation9 + $0x220] sm:$0xff]  ;;  %v810_v31 = vld [vmem:[#allocation9 + $0x2c8] sm:$0xff]  ;;  %v3270_v32 = vpack.c.bf16 %v360_v7, %v359_v6  ;;  %v799_v7 = vld [vmem:[#allocation9 + $0x270] sm:$0xff] }
  0x91   :  { %2333 = vmatpush1.bf16.msra.mxu0 %v2332_v46  ;;  %2366 = vmatpush1.bf16.msra.mxu1 %v2365_v57  ;;  %v549_v46 = vld [vmem:[#allocation9 + $0x58] sm:$0xff]  ;;  %v407_v57 = vld [vmem:[#allocation8 + $0xb0] sm:$0xff] }
  0x92   :  { %2334 = vmatprep.subr.bf16.mxu0 %v2933_v0  ;;  %2367 = vmatprep.subr.bf16.mxu1 %v2933_v0  ;;  %v2401_v48 = vpack.c.bf16 %v549_v46, %v548_v45  ;;  %v2377_v60 = vpack.c.bf16 %v408_v59, %v407_v57  ;;  %v356_v45 = vld [vmem:[#allocation11 + $0x18] sm:$0xff] }
  0x95   :  { %2336 = vmatpush1.bf16.msra.mxu0 %v2335_v52  ;;  %2369 = vmatpush1.bf16.msra.mxu1 %v2368_v2  ;;  %v567_v52 = vld [vmem:[#allocation9 + $0xe8] sm:$0xff]  ;;  %v553_v2 = vld [vmem:[#allocation9 + $0x78] sm:$0xff] }
  0x96   :  { %2337 = vmatprep.subr.bf16.mxu0 %v2933_v0  ;;  %2370 = vmatprep.subr.bf16.mxu1 %v2933_v0  ;;  %v2403_v54 = vpack.c.bf16 %v567_v52, %v566_v51 }
  0x99   :  { %2339 = vmatpush1.bf16.msra.mxu0 %v2338_v58  ;;  %2372 = vmatpush1.bf16.msra.mxu1 %v2371_v41  ;;  %v2405_v58 = vpack.c.bf16 %v551_v56, %v550_v55  ;;  %v355_v41 = vld [vmem:[#allocation11 + $0x10] sm:$0xff]  ;;  %v357_v55 = vld [vmem:[#allocation11 + $0x20] sm:$0xff]  ;;  %v358_v56 = vld [vmem:[#allocation11 + $0x28] sm:$0xff] }
  0x9a   :  { %2340 = vmatprep.subr.bf16.mxu0 %v2933_v0  ;;  %2373 = vmatprep.subr.bf16.mxu1 %v2933_v0  ;;  %v3249_v51 = vpack.c.bf16 %v356_v45, %v355_v41 }
  0x9d   :  { %2342 = vmatpush1.bf16.msra.mxu0 %v2341_v3  ;;  %2375 = vmatpush1.bf16.msra.mxu1 %v2374_v50  ;;  %v3131_v3 = vld [vmem:[%s3631_s1 + $0x8] sm:$0xff] }
  0x9e   :  { %2380 = vmatprep.subr.bf16.mxu0 %v2379_v4  ;;  %2376 = vmatprep.subr.bf16.mxu1 %v2933_v0  ;;  %v2409_v4 = vpack.c.bf16 %v553_v2, %v552_v1  ;;  %v806_v50 = vld [vmem:[#allocation9 + $0x2a8] sm:$0xff]  ;;  %v807_v1 = vld [vmem:[#allocation9 + $0x2b0] sm:$0xff]  ;;  %v3261_v2 = vpack.c.bf16 %v358_v56, %v357_v55  ;;  %v796_v55 = vld [vmem:[#allocation9 + $0x258] sm:$0xff] }
  0x9f   :  { %1829 = vmatprep.mubr.msk.f32.mxu1 %vm154_vm0, %v3131_v3  ;;  %v2451_v61 = vpack.c.bf16 %v806_v50, %v805_v49  ;;  %v813_v56 = vld [vmem:[#allocation9 + $0x2e0] sm:$0xff] }
  0xa0   :  { %232 = vmatmul.mubr.f32.vlgmr.msra.gmra.mrb[0].mxu0 %v122_v9  ;;  %v3144_v9 = vld [vmem:[%s3631_s1 + $0x18] sm:$0xff] }
  0xa1   :  { %1826 = vmatprep.mubr.msk.f32.mxu0 %vm154_vm0, %v125_v11  ;;  %2382 = vmatpush3.bf16.msra.mxu0 %v2381_v10  ;;  %v3151_v10 = vld [vmem:[%s3631_s1 + $0x10] sm:$0xff]  ;;  %v3157_v11 = vld [vmem:[%s3631_s1 + $0x28] sm:$0xff] }
  0xa2   :  { %2384 = vmatprep.subr.bf16.mxu0 %v2383_v12  ;;  %2378 = vmatpush1.bf16.msra.mxu1 %v2377_v60  ;;  %v3164_v12 = vld [vmem:[%s3631_s1 + $0x20] sm:$0xff] }
  0xa4   :  { %237 = vmatmul.mubr.f32.gmra.mrb[2].mxu0 %v124_v17  ;;  %v3196_v17 = vld [vmem:[%s3631_s1 + $0x58] sm:$0xff] }
  0xa5   :  { %1827 = vmatprep.mubr.msk.f32.mxu0 %vm154_vm0, %v127_v19  ;;  %2386 = vmatpush3.bf16.msra.mxu0 %v2385_v18  ;;  %v3203_v18 = vld [vmem:[%s3631_s1 + $0x50] sm:$0xff]  ;;  %v3209_v19 = vld [vmem:[%s3631_s1 + $0x68] sm:$0xff] }
  0xa6   :  { %2388 = vmatprep.subr.bf16.mxu0 %v2387_v20  ;;  %498 = vmatmul.mubr.f32.vlgmr.msra.gmra.mrb[0].mxu1 %v3138_v5  ;;  %v3214_v20 = vld [vmem:[%s3631_s1 + $0x60] sm:$0xff] }
  0xa7   :  { %1830 = vmatprep.mubr.msk.f32.mxu1 %vm154_vm0, %v3144_v9 }
  0xa8   :  { %242 = vmatmul.mubr.f32.gmra.mrb[4].mxu0 %v126_v25 }
  0xa9   :  { %1828 = vmatprep.mubr.msk.f32.mxu0 %vm154_vm0, %v129_v27  ;;  %2390 = vmatpush3.bf16.msra.mxu0 %v2389_v26 }
  0xaa   :  { %2392 = vmatprep.subr.bf16.mxu0 %v2391_v28  ;;  %503 = vmatmul.mubr.f32.gmra.mrb[2].mxu1 %v3151_v10 }
  0xab   :  { %1831 = vmatprep.mubr.msk.f32.mxu1 %vm154_vm0, %v3157_v11 }
  0xac   :  { %247 = vmatmul.mubr.f32.gmra.mrb[6].mxu0 %v128_v33 }
  0xad   :  { %2394 = vmatpush3.bf16.msra.mxu0 %v2393_v34  ;;  %v803_v34 = vld [vmem:[#allocation9 + $0x290] sm:$0xff] }
  0xae   :  { %2396 = vmatprep.subr.bf16.mxu0 %v2395_v35  ;;  %508 = vmatmul.mubr.f32.gmra.mrb[4].mxu1 %v3164_v12  ;;  %v804_v35 = vld [vmem:[#allocation9 + $0x298] sm:$0xff] }
  0xaf   :  { %1832 = vmatprep.mubr.msk.f32.mxu1 %vm154_vm0, %v3170_v13  ;;  %v2447_v47 = vpack.c.bf16 %v804_v35, %v803_v34  ;;  %v361_v34 = vld [vmem:[#allocation11 + $0x40] sm:$0xff]  ;;  %v362_v35 = vld [vmem:[#allocation11 + $0x48] sm:$0xff] }
  0xb0   :  { %v3279_v45 = vpack.c.bf16 %v362_v35, %v361_v34 }
  0xb1   :  { %2398 = vmatpush3.bf16.msra.mxu0 %v2397_v38 }
  0xb2   :  { %2400 = vmatprep.subr.bf16.mxu0 %v2399_v44  ;;  %513 = vmatmul.mubr.f32.gmra.mrb[6].mxu1 %v3177_v14  ;;  %v3245_v44 = vpack.c.bf16 %v354_v40, %v353_v39 }
  0xb3   :  { %1833 = vmatprep.mubr.msk.f32.mxu1 %vm154_vm0, %v3183_v15 }
  0xb4   :  { %2412 = vmatprep.subr.bf16.mxu1 %v3245_v44 }
  0xb5   :  { %2402 = vmatpush3.bf16.msra.mxu0 %v2401_v48  ;;  %v788_v48 = vld [vmem:[#allocation9 + $0x218] sm:$0xff]  ;;  %2414 = vmatpush3.bf16.msra.mxu1 %v3245_v44 }
  0xb6   :  { %2404 = vmatprep.subr.bf16.mxu0 %v2403_v54  ;;  %518 = vmatmul.mubr.f32.gmra.mrb[8].mxu1 %v3190_v16  ;;  %v2449_v59 = vpack.c.bf16 %v788_v48, %v787_v43  ;;  %v794_v43 = vld [vmem:[#allocation9 + $0x248] sm:$0xff] }
  0xb7   :  { %1834 = vmatprep.mubr.msk.f32.mxu1 %vm154_vm0, %v3196_v17  ;;  %2416 = vmatprep.subr.bf16.mxu1 %v3249_v51 }
  0xb9   :  { %2406 = vmatpush3.bf16.msra.mxu0 %v2405_v58  ;;  %2418 = vmatpush3.bf16.msra.mxu1 %v3249_v51 }
  0xba   :  { %2408 = vmatprep.subr.bf16.mxu0 %v2407_v63  ;;  %523 = vmatmul.mubr.f32.gmra.mrb[10].mxu1 %v3203_v18  ;;  %v790_v63 = vld [vmem:[#allocation9 + $0x228] sm:$0xff] }
  0xbb   :  { %1835 = vmatprep.mubr.msk.f32.mxu1 %vm154_vm0, %v3209_v19  ;;  %2420 = vmatprep.subr.bf16.mxu1 %v3261_v2 }
  0xbd   :  { %2410 = vmatpush3.bf16.msra.mxu0 %v2409_v4  ;;  %v808_v4 = vld [vmem:[#allocation9 + $0x2b8] sm:$0xff]  ;;  %2422 = vmatpush3.bf16.msra.mxu1 %v3261_v2 }
  0xbe   :  { %2444 = vmatprep.subr.bf16.mxu0 %v2443_v8  ;;  %528 = vmatmul.mubr.f32.gmra.mrb[12].mxu1 %v3214_v20 }
  0xbf   :  { %1836 = vmatprep.mubr.msk.f32.mxu1 %vm154_vm0, %v3222_v21  ;;  %2424 = vmatprep.subr.bf16.mxu1 %v3270_v32 }
  0xc1   :  { %2426 = vmatpush3.bf16.msra.mxu1 %v3270_v32 }
  0xc2   :  { %533 = vmatmul.mubr.f32.gmra.mrb[14].mxu1 %v3227_v22  ;;  %2428 = vmatprep.subr.bf16.mxu1 %v3279_v45 }
  0xc5   :  { %2430 = vmatpush3.bf16.msra.mxu1 %v3279_v45 }
 0x173   :  { %v233_v23 = vpop.f32.mrb[0].mxu0 }
 0x174   :  { %v3232_v24 = vmax.f32 %v233_v23, 0.0  ;;  %v235_v25 = vpop.f32.mrb[1].mxu0  ;;  %v2453_v23 = vpack.c.bf16 %v790_v63, %v789_v62  ;;  %v798_v62 = vld [vmem:[#allocation9 + $0x268] sm:$0xff]  ;;  %v815_v63 = vld [vmem:[#allocation9 + $0x2f0] sm:$0xff] }
 0x175   :  { %v791_v25 = vld [vmem:[#allocation9 + $0x230] sm:$0xff] }
 0x176   :  { %v273_v26 = vrot.slane %v3232_v24, 7  ;;  %291 = vst [vmem:[#allocation2 + $0x8] sm:$0xff] %v3232_v24  ;;  %634 = vmatprep.mubr.f32.mxu0 %v3232_v24 }
 0x177   :  { %v238_v27 = vpop.f32.mrb[2].mxu0 }
 0x178   :  { %285 = vst [vmem:[#allocation2] sm:$0xfe] %v273_v26  ;;  %v3237_v28 = vmax.f32 %v238_v27, 0.0  ;;  %v240_v29 = vpop.f32.mrb[3].mxu0  ;;  %v2455_v27 = vpack.c.bf16 %v808_v4, %v807_v1  ;;  %v816_v1 = vld [vmem:[#allocation9 + $0x2f8] sm:$0xff] }
 0x179   :  { %v792_v29 = vld [vmem:[#allocation9 + $0x238] sm:$0xff]  ;;  %v2471_v6 = vpack.c.bf16 %v816_v1, %v815_v63 }
 0x17a   :  { %v274_v30 = vrot.slane %v3237_v28, 7  ;;  %v2457_v40 = vpack.c.bf16 %v792_v29, %v791_v25  ;;  %v1029_v29 = vld [vmem:[#allocation8 + $0xc0] sm:$0xff] }
 0x17b   :  { %v243_v33 = vpop.f32.mrb[4].mxu0 }
 0x17c   :  { %v3241_v36 = vsel %vm272_vm1, %v273_v26, %v274_v30  ;;  %287 = vst [vmem:[#allocation2 + $0x20] sm:$0x1] %v274_v30  ;;  %v3243_v37 = vmax.f32 %v243_v33, 0.0  ;;  %v245_v38 = vpop.f32.mrb[5].mxu0  ;;  %v809_v30 = vld [vmem:[#allocation9 + $0x2c0] sm:$0xff] }
 0x17d   :  { %v304_v26 = vld [vmem:[#allocation2 + $0x8] sm:$0xfe]  ;;  %v328_v38 = vrot.slane %v3237_v28, 1  ;;  %v2459_v41 = vpack.c.bf16 %v810_v31, %v809_v30 }
 0x17e   :  { %v276_v46 = vrot.slane %v3243_v37, 7  ;;  %293 = vst [vmem:[#allocation2 + $0x38] sm:$0xff] %v3243_v37  ;;  %v327_v39 = vrot.slane %v304_v26, 1  ;;  %v1030_v30 = vld [vmem:[#allocation8 + $0xc8] sm:$0xff] }
 0x17f   :  { %v248_v52 = vpop.f32.mrb[6].mxu0  ;;  %v3251_v54 = vld [vmem:[#allocation2] sm:$0xff] }
 0x180   :  { %288 = vst [vmem:[#allocation2 + $0x30] sm:$0xfe] %v276_v46  ;;  %v3254_v57 = vmax.f32 %v248_v52, 0.0  ;;  %635 = vmatmul.mubr.f32.vlgmr.msra.gmra.mrb[8].mxu0 %v3251_v54  ;;  %v250_v58 = vpop.f32.mrb[7].mxu0  ;;  %v3285_v48 = vsel %vm323_vm2, %v327_v39, %v328_v38  ;;  %v795_v52 = vld [vmem:[#allocation9 + $0x250] sm:$0xff]  ;;  %v325_v39 = vrot.slane %v3241_v36, 1 }
 0x181   :  { %2446 = vmatpush3.bf16.msra.mxu0 %v2445_v42  ;;  %639 = vmatprep.mubr.f32.mxu0 %v3237_v28  ;;  %v793_v42 = vld [vmem:[#allocation9 + $0x240] sm:$0xff]  ;;  %v814_v58 = vld [vmem:[#allocation9 + $0x2e8] sm:$0xff] }
 0x182   :  { %v277_v60 = vrot.slane %v3254_v57, 7  ;;  %2448 = vmatprep.subr.bf16.mxu0 %v2447_v47  ;;  %v812_v47 = vld [vmem:[#allocation9 + $0x2d8] sm:$0xff]  ;;  %v2461_v49 = vpack.c.bf16 %v794_v43, %v793_v42  ;;  %v303_v25 = vld [vmem:[#allocation2] sm:$0xfe]  ;;  %v1031_v42 = vld [vmem:[#allocation8 + $0xd0] sm:$0xff] }
 0x183   :  { %v324_v31 = vrot.slane %v303_v25, 1  ;;  %v305_v35 = vld [vmem:[#allocation2 + $0x20] sm:$0x1]  ;;  %v1032_v43 = vld [vmem:[#allocation8 + $0xd8] sm:$0xff] }
 0x184   :  { %v3264_v8 = vsel %vm272_vm1, %v276_v46, %v277_v60  ;;  %290 = vst [vmem:[#allocation2 + $0x50] sm:$0x1] %v277_v60  ;;  %640 = vmatmul.mubr.f32.gmra.mrb[10].mxu0 %v3241_v36  ;;  %v811_v46 = vld [vmem:[#allocation9 + $0x2d0] sm:$0xff]  ;;  %v2467_v60 = vpack.c.bf16 %v814_v58, %v813_v56  ;;  %v2511_v56 = vpack.c.bf16 %v1032_v43, %v1031_v42  ;;  %v310_v58 = vld [vmem:[#allocation2 + $0x58] sm:$0x1]  ;;  %v1041_v42 = vld [vmem:[#allocation8 + $0x120] sm:$0xff] }
 0x185   :  { %2450 = vmatpush3.bf16.msra.mxu0 %v2449_v59  ;;  %644 = vmatprep.mubr.f32.mxu0 %v3243_v37  ;;  %v2463_v50 = vpack.c.bf16 %v812_v47, %v811_v46  ;;  %v2465_v59 = vpack.c.bf16 %v796_v55, %v795_v52  ;;  %v3294_v46 = vsel %vm323_vm2, %v324_v31, %v325_v39  ;;  %v330_v47 = vrot.slane %v305_v35, 1  ;;  %v1038_v31 = vld [vmem:[#allocation8 + $0x108] sm:$0xff] }
 0x186   :  { %2452 = vmatprep.subr.bf16.mxu0 %v2451_v61  ;;  %v797_v61 = vld [vmem:[#allocation9 + $0x260] sm:$0xff]  ;;  %v342_v1 = vrot.slane %v310_v58, 1  ;;  %v1042_v43 = vld [vmem:[#allocation8 + $0x128] sm:$0xff] }
 0x187   :  { %v3272_v33 = vld [vmem:[#allocation2 + $0x30] sm:$0xff]  ;;  %v2469_v4 = vpack.c.bf16 %v798_v62, %v797_v61  ;;  %v335_v61 = vrot.slane %v3264_v8, 1  ;;  %v3307_v62 = vsel %vm323_vm2, %v325_v39, %v330_v47  ;;  %v2526_v47 = vpack.c.bf16 %v1042_v43, %v1041_v42 }
 0x188   :  { %645 = vmatmul.mubr.f32.gmra.mrb[12].mxu0 %v3272_v33  ;;  %v307_v55 = vld [vmem:[#allocation2 + $0x30] sm:$0xfe] }
 0x189   :  { %2454 = vmatpush3.bf16.msra.mxu0 %v2453_v23  ;;  %649 = vmatprep.mubr.f32.mxu0 %v3254_v57  ;;  %v800_v23 = vld [vmem:[#allocation9 + $0x278] sm:$0xff]  ;;  %v334_v63 = vrot.slane %v307_v55, 1  ;;  %v1039_v39 = vld [vmem:[#allocation8 + $0x110] sm:$0xff] }
 0x18a   :  { %2456 = vmatprep.subr.bf16.mxu0 %v2455_v27  ;;  %v2473_v26 = vpack.c.bf16 %v800_v23, %v799_v7  ;;  %v306_v27 = vld [vmem:[#allocation2 + $0x28] sm:$0x1]  ;;  %v1035_v7 = vld [vmem:[#allocation8 + $0xf0] sm:$0xff]  ;;  %v1036_v23 = vld [vmem:[#allocation8 + $0xf8] sm:$0xff] }
 0x18b   :  { %v332_v34 = vrot.slane %v306_v27, 1  ;;  %v3316_v25 = vsel %vm323_vm2, %v334_v63, %v335_v61  ;;  %v1049_v63 = vld [vmem:[#allocation8 + $0x160] sm:$0xff]  ;;  %v1405_v43 = vld [vmem:[#allocation9 + $0x310] sm:$0xff] }
 0x18c   :  { %650 = vmatmul.mubr.f32.gmra.mrb[14].mxu0 %v3264_v8 }
 0x18d   :  { %2458 = vmatpush3.bf16.msra.mxu0 %v2457_v40  ;;  %881 = vmatprep.mubr.f32.mxu0 %v3285_v48  ;;  %v2508_v40 = vpack.c.bf16 %v1030_v30, %v1029_v29  ;;  %v2517_v29 = vpack.c.bf16 %v1036_v23, %v1035_v7  ;;  %v1037_v30 = vld [vmem:[#allocation8 + $0x100] sm:$0xff]  ;;  %v1052_v7 = vld [vmem:[#allocation8 + $0x178] sm:$0xff] }
 0x18e   :  { %2460 = vmatprep.subr.bf16.mxu0 %v2459_v41  ;;  %v308_v41 = vld [vmem:[#allocation2 + $0x38] sm:$0xfe]  ;;  %v2520_v35 = vpack.c.bf16 %v1038_v31, %v1037_v30  ;;  %v1419_v23 = vld [vmem:[#allocation9 + $0x380] sm:$0xff] }
 0x18f   :  { %v337_v52 = vrot.slane %v308_v41, 1  ;;  %v1403_v31 = vld [vmem:[#allocation9 + $0x300] sm:$0xff] }
 0x191   :  { %2462 = vmatpush3.bf16.msra.mxu0 %v2461_v49  ;;  %v338_v49 = vrot.slane %v3254_v57, 1 }
 0x192   :  { %2464 = vmatprep.subr.bf16.mxu0 %v2463_v50  ;;  %v3301_v50 = vsel %vm323_vm2, %v328_v38, %v332_v34 }
 0x193   :  { %v3311_v38 = vsel %vm323_vm2, %v337_v52, %v338_v49  ;;  %v3320_v27 = vsel %vm323_vm2, %v338_v49, %v342_v1  ;;  %v1043_v49 = vld [vmem:[#allocation8 + $0x130] sm:$0xff]  ;;  %v1044_v52 = vld [vmem:[#allocation8 + $0x138] sm:$0xff]  ;;  %v1050_v1 = vld [vmem:[#allocation8 + $0x168] sm:$0xff] }
 0x194   :  { %v2529_v55 = vpack.c.bf16 %v1044_v52, %v1043_v49  ;;  %v1423_v49 = vld [vmem:[#allocation9 + $0x3a0] sm:$0xff]  ;;  %v1424_v52 = vld [vmem:[#allocation9 + $0x3a8] sm:$0xff] }
 0x195   :  { %2466 = vmatpush3.bf16.msra.mxu0 %v2465_v59  ;;  %v1033_v59 = vld [vmem:[#allocation8 + $0xe0] sm:$0xff] }
 0x196   :  { %2468 = vmatprep.subr.bf16.mxu0 %v2467_v60  ;;  %v1034_v60 = vld [vmem:[#allocation8 + $0xe8] sm:$0xff] }
 0x199   :  { %2470 = vmatpush3.bf16.msra.mxu0 %v2469_v4  ;;  %v309_v4 = vld [vmem:[#allocation2 + $0x50] sm:$0x1] }
 0x19a   :  { %2472 = vmatprep.subr.bf16.mxu0 %v2471_v6  ;;  %v2514_v6 = vpack.c.bf16 %v1034_v60, %v1033_v59  ;;  %v1047_v59 = vld [vmem:[#allocation8 + $0x150] sm:$0xff]  ;;  %v1048_v60 = vld [vmem:[#allocation8 + $0x158] sm:$0xff] }
 0x19d   :  { %2474 = vmatpush3.bf16.msra.mxu0 %v2473_v26  ;;  %v340_v26 = vrot.slane %v309_v4, 1  ;;  %v2538_v4 = vpack.c.bf16 %v1050_v1, %v1049_v63  ;;  %v1425_v63 = vld [vmem:[#allocation9 + $0x3b0] sm:$0xff]  ;;  %v1426_v1 = vld [vmem:[#allocation9 + $0x3b8] sm:$0xff] }
 0x19e   :  { %2507 = vmatprep.subr.bf16.mxu0 %v2933_v0 }
 0x19f   :  { %v3325_v34 = vsel %vm323_vm2, %v335_v61, %v340_v26  ;;  %v2535_v61 = vpack.c.bf16 %v1048_v60, %v1047_v59  ;;  %v1420_v26 = vld [vmem:[#allocation9 + $0x388] sm:$0xff]  ;;  %v2615_v59 = vpack.c.bf16 %v1424_v52, %v1423_v49  ;;  %v1407_v60 = vld [vmem:[#allocation9 + $0x320] sm:$0xff]  ;;  %v1429_v49 = vld [vmem:[#allocation9 + $0x3d0] sm:$0xff] }
 0x1a0   :  { %882 = vmatmul.mubr.f32.vlgmr.msra.gmra.mrb[16].mxu0 %v3294_v46  ;;  %v2607_v30 = vpack.c.bf16 %v1420_v26, %v1419_v23  ;;  %v2619_v23 = vpack.c.bf16 %v1426_v1, %v1425_v63  ;;  %v1409_v26 = vld [vmem:[#allocation9 + $0x330] sm:$0xff]  ;;  %v1430_v52 = vld [vmem:[#allocation9 + $0x3d8] sm:$0xff]  ;;  %v1432_v63 = vld [vmem:[#allocation9 + $0x3e8] sm:$0xff] }
 0x1a1   :  { %886 = vmatprep.mubr.f32.mxu0 %v3301_v50  ;;  %2509 = vmatpush1.bf16.msra.mxu0 %v2508_v40  ;;  %v1040_v40 = vld [vmem:[#allocation8 + $0x118] sm:$0xff] }
 0x1a2   :  { %2510 = vmatprep.subr.bf16.mxu0 %v2933_v0  ;;  %v2523_v41 = vpack.c.bf16 %v1040_v40, %v1039_v39  ;;  %v1421_v39 = vld [vmem:[#allocation9 + $0x390] sm:$0xff]  ;;  %v1422_v40 = vld [vmem:[#allocation9 + $0x398] sm:$0xff] }
 0x1a3   :  { %v2611_v42 = vpack.c.bf16 %v1422_v40, %v1421_v39 }
 0x1a4   :  { %887 = vmatmul.mubr.f32.gmra.mrb[18].mxu0 %v3307_v62 }
 0x1a5   :  { %891 = vmatprep.mubr.f32.mxu0 %v3311_v38  ;;  %2512 = vmatpush1.bf16.msra.mxu0 %v2511_v56  ;;  %v1046_v56 = vld [vmem:[#allocation8 + $0x148] sm:$0xff] }
 0x1a6   :  { %2513 = vmatprep.subr.bf16.mxu0 %v2933_v0 }
 0x1a8   :  { %892 = vmatmul.mubr.f32.gmra.mrb[20].mxu0 %v3316_v25 }
 0x1a9   :  { %896 = vmatprep.mubr.f32.mxu0 %v3320_v27  ;;  %2515 = vmatpush1.bf16.msra.mxu0 %v2514_v6  ;;  %v1051_v6 = vld [vmem:[#allocation8 + $0x170] sm:$0xff] }
 0x1aa   :  { %2516 = vmatprep.subr.bf16.mxu0 %v2933_v0 }
 0x1ac   :  { %897 = vmatmul.mubr.f32.gmra.mrb[22].mxu0 %v3325_v34 }
 0x1ad   :  { %2518 = vmatpush1.bf16.msra.mxu0 %v2517_v29  ;;  %1838 = vmatprep.mubr.msk.f32.mxu0 %vm154_vm0, %v3131_v3  ;;  %v1045_v3 = vld [vmem:[#allocation8 + $0x140] sm:$0xff]  ;;  %v2541_v29 = vpack.c.bf16 %v1052_v7, %v1051_v6  ;;  %v3348_v6 = vpop.f32.mrb[0].mxu1 }
 0x1ae   :  { %2519 = vmatprep.subr.bf16.mxu0 %v2933_v0  ;;  %v2532_v58 = vpack.c.bf16 %v1046_v56, %v1045_v3  ;;  %v364_v3 = vld [vmem:[#allocation11 + $0x58] sm:$0xff] }
 0x1b1   :  { %2521 = vmatpush1.bf16.msra.mxu0 %v2520_v35  ;;  %v1404_v35 = vld [vmem:[#allocation9 + $0x308] sm:$0xff] }
 0x1b2   :  { %2522 = vmatprep.subr.bf16.mxu0 %v2933_v0 }
 0x1b5   :  { %2524 = vmatpush1.bf16.msra.mxu0 %v2523_v41  ;;  %v2609_v41 = vpack.c.bf16 %v1404_v35, %v1403_v31  ;;  %v1427_v31 = vld [vmem:[#allocation9 + $0x3c0] sm:$0xff]  ;;  %v367_v35 = vld [vmem:[#allocation11 + $0x70] sm:$0xff] }
 0x1b6   :  { %2525 = vmatprep.subr.bf16.mxu0 %v2933_v0 }
 0x1b9   :  { %2527 = vmatpush1.bf16.msra.mxu0 %v2526_v47  ;;  %v1406_v47 = vld [vmem:[#allocation9 + $0x318] sm:$0xff] }
 0x1ba   :  { %2528 = vmatprep.subr.bf16.mxu0 %v2933_v0  ;;  %v2613_v56 = vpack.c.bf16 %v1406_v47, %v1405_v43  ;;  %v1412_v43 = vld [vmem:[#allocation9 + $0x348] sm:$0xff] }
 0x1bd   :  { %2530 = vmatpush1.bf16.msra.mxu0 %v2529_v55  ;;  %v363_v55 = vld [vmem:[#allocation11 + $0x50] sm:$0xff] }
 0x1be   :  { %2531 = vmatprep.subr.bf16.mxu0 %v2933_v0 }
 0x1c1   :  { %2533 = vmatpush1.bf16.msra.mxu0 %v2532_v58  ;;  %v3341_v58 = vpack.c.bf16 %v364_v3, %v363_v55  ;;  %v2627_v3 = vpack.c.bf16 %v1430_v52, %v1429_v49  ;;  %v763_v49 = vld [vmem:[#allocation12 + $0x8] sm:$0xff] }
 0x1c2   :  { %2534 = vmatprep.subr.bf16.mxu0 %v2933_v0 }
 0x1c3   :  { %2432 = vmatprep.subr.bf16.mxu1 %v3341_v58 }
 0x1c4   :  { %2434 = vmatpush3.bf16.msra.mxu1 %v3341_v58 }
 0x1c5   :  { %2536 = vmatpush1.bf16.msra.mxu0 %v2535_v61  ;;  %v1408_v61 = vld [vmem:[#allocation9 + $0x328] sm:$0xff] }
 0x1c6   :  { %2537 = vmatprep.subr.bf16.mxu0 %v2933_v0 }
 0x1c9   :  { %2539 = vmatpush1.bf16.msra.mxu0 %v2538_v4  ;;  %v366_v4 = vld [vmem:[#allocation11 + $0x68] sm:$0xff] }
 0x1ca   :  { %2540 = vmatprep.subr.bf16.mxu0 %v2933_v0 }
 0x1cd   :  { %2542 = vmatpush1.bf16.msra.mxu0 %v2541_v29  ;;  %v1410_v29 = vld [vmem:[#allocation9 + $0x338] sm:$0xff] }
 0x1ce   :  { %2608 = vmatprep.subr.bf16.mxu0 %v2607_v30  ;;  %v501_v30 = vpop.f32.mrb[1].mxu1  ;;  %v2621_v39 = vpack.c.bf16 %v1410_v29, %v1409_v26  ;;  %v1433_v29 = vld [vmem:[#allocation9 + $0x3f0] sm:$0xff] }
 0x1cf   :  { %v3359_v47 = vpop.f32.mrb[2].mxu1  ;;  %v1434_v30 = vld [vmem:[#allocation9 + $0x3f8] sm:$0xff] }
 0x1d0   :  { %1118 = vmatmul.mubr.f32.vlgmr.msra.gmra.mrb[24].mxu0 %v3138_v5  ;;  %v365_v5 = vld [vmem:[#allocation11 + $0x60] sm:$0xff] }
 0x1d1   :  { %2610 = vmatpush3.bf16.msra.mxu0 %v2609_v41  ;;  %1839 = vmatprep.mubr.msk.f32.mxu0 %vm154_vm0, %v3144_v9  ;;  %v2617_v9 = vpack.c.bf16 %v1408_v61, %v1407_v60  ;;  %v3350_v7 = vpack.c.bf16 %v366_v4, %v365_v5  ;;  %v1431_v61 = vld [vmem:[#allocation9 + $0x3e0] sm:$0xff] }
 0x1d2   :  { %2612 = vmatprep.subr.bf16.mxu0 %v2611_v42  ;;  %v1411_v42 = vld [vmem:[#allocation9 + $0x340] sm:$0xff]  ;;  %v2631_v4 = vpack.c.bf16 %v1432_v63, %v1431_v61 }
 0x1d3   :  { %2436 = vmatprep.subr.bf16.mxu1 %v3350_v7 }
 0x1d4   :  { %1123 = vmatmul.mubr.f32.gmra.mrb[26].mxu0 %v3151_v10  ;;  %v1428_v10 = vld [vmem:[#allocation9 + $0x3c8] sm:$0xff]  ;;  %2438 = vmatpush3.bf16.msra.mxu1 %v3350_v7 }
 0x1d5   :  { %2614 = vmatpush3.bf16.msra.mxu0 %v2613_v56  ;;  %1840 = vmatprep.mubr.msk.f32.mxu0 %vm154_vm0, %v3157_v11  ;;  %v368_v11 = vld [vmem:[#allocation11 + $0x78] sm:$0xff]  ;;  %v2623_v41 = vpack.c.bf16 %v1428_v10, %v1427_v31  ;;  %v1413_v56 = vld [vmem:[#allocation9 + $0x350] sm:$0xff] }
 0x1d6   :  { %2616 = vmatprep.subr.bf16.mxu0 %v2615_v59  ;;  %v3357_v40 = vpack.c.bf16 %v368_v11, %v367_v35  ;;  %v1414_v59 = vld [vmem:[#allocation9 + $0x358] sm:$0xff]  ;;  %v1417_v35 = vld [vmem:[#allocation9 + $0x370] sm:$0xff] }
 0x1d7   :  { %v1418_v11 = vld [vmem:[#allocation9 + $0x378] sm:$0xff] }
 0x1d8   :  { %1128 = vmatmul.mubr.f32.gmra.mrb[28].mxu0 %v3164_v12  ;;  %v506_v12 = vpop.f32.mrb[3].mxu1  ;;  %2440 = vmatprep.subr.bf16.mxu1 %v3357_v40 }
 0x1d9   :  { %2618 = vmatpush3.bf16.msra.mxu0 %v2617_v9  ;;  %1841 = vmatprep.mubr.msk.f32.mxu0 %vm154_vm0, %v3170_v13  ;;  %v2625_v13 = vpack.c.bf16 %v1412_v43, %v1411_v42  ;;  %v3366_v55 = vpop.f32.mrb[4].mxu1  ;;  %v1415_v9 = vld [vmem:[#allocation9 + $0x360] sm:$0xff] }
 0x1da   :  { %2620 = vmatprep.subr.bf16.mxu0 %v2619_v23  ;;  %2442 = vmatpush3.bf16.msra.mxu1 %v3357_v40  ;;  %v511_v60 = vpop.f32.mrb[5].mxu1  ;;  %v1416_v23 = vld [vmem:[#allocation9 + $0x368] sm:$0xff]  ;;  %v762_v43 = vld [vmem:[#allocation12] sm:$0xff] }
 0x1db   :  { %2476 = vmatprep.subr.bf16.mxu1 %v3245_v44  ;;  %v3369_v1 = vpop.f32.mrb[6].mxu1 }
 0x1dc   :  { %1133 = vmatmul.mubr.f32.gmra.mrb[30].mxu0 %v3177_v14  ;;  %v516_v14 = vpop.f32.mrb[7].mxu1 }
 0x1dd   :  { %2622 = vmatpush3.bf16.msra.mxu0 %v2621_v39  ;;  %1842 = vmatprep.mubr.msk.f32.mxu0 %vm154_vm0, %v3183_v15  ;;  %v2629_v15 = vpack.c.bf16 %v1414_v59, %v1413_v56  ;;  %v519_v5 = vpop.f32.mrb[8].mxu1  ;;  %v2637_v39 = vpack.c.bf16 %v1418_v11, %v1417_v35 }
 0x1de   :  { %2624 = vmatprep.subr.bf16.mxu0 %v2623_v41  ;;  %v521_v26 = vpop.f32.mrb[9].mxu1 }
 0x1df   :  { %v524_v31 = vpop.f32.mrb[10].mxu1 }
 0x1e0   :  { %1138 = vmatmul.mubr.f32.gmra.mrb[32].mxu0 %v3190_v16  ;;  %v526_v10 = vpop.f32.mrb[11].mxu1  ;;  %v2633_v16 = vpack.c.bf16 %v1416_v23, %v1415_v9 }
 0x1e1   :  { %2626 = vmatpush3.bf16.msra.mxu0 %v2625_v13  ;;  %1843 = vmatprep.mubr.msk.f32.mxu0 %vm154_vm0, %v3196_v17  ;;  %v2635_v17 = vpack.c.bf16 %v1434_v30, %v1433_v29  ;;  %v1175_v30 = vld [vmem:[#allocation9 + $0x180] sm:$0xff] }
 0x1e2   :  { %2628 = vmatprep.subr.bf16.mxu0 %v2627_v3 }
 0x1e4   :  { %1143 = vmatmul.mubr.f32.gmra.mrb[34].mxu0 %v3203_v18  ;;  %v3390_v18 = vpop.f32.mrb[12].mxu1 }
 0x1e5   :  { %2630 = vmatpush3.bf16.msra.mxu0 %v2629_v15  ;;  %1844 = vmatprep.mubr.msk.f32.mxu0 %vm154_vm0, %v3209_v19  ;;  %v531_v19 = vpop.f32.mrb[13].mxu1 }
 0x1e6   :  { %2632 = vmatprep.subr.bf16.mxu0 %v2631_v4 }
 0x1e8   :  { %1148 = vmatmul.mubr.f32.gmra.mrb[36].mxu0 %v3214_v20  ;;  %v3392_v20 = vpop.f32.mrb[14].mxu1 }
 0x1e9   :  { %2634 = vmatpush3.bf16.msra.mxu0 %v2633_v16  ;;  %1845 = vmatprep.mubr.msk.f32.mxu0 %vm154_vm0, %v3222_v21  ;;  %v536_v21 = vpop.f32.mrb[15].mxu1 }
 0x1ea   :  { %2636 = vmatprep.subr.bf16.mxu0 %v2635_v17  ;;  %v1159_v21 = vld [vmem:[#allocation9 + $0x100] sm:$0xff] }
 0x1ec   :  { %1153 = vmatmul.mubr.f32.gmra.mrb[38].mxu0 %v3227_v22 }
 0x1ed   :  { %2638 = vmatpush3.bf16.msra.mxu0 %v2637_v39  ;;  %1499 = vmatprep.mubr.f32.mxu0 %v3285_v48 }
 0x1ee   :  { %2671 = vmatprep.subr.bf16.mxu0 %v2933_v0 }
 0x1f0   :  { %1500 = vmatmul.mubr.f32.vlgmr.msra.gmra.mrb[40].mxu0 %v3294_v46 }
 0x1f1   :  { %1504 = vmatprep.mubr.f32.mxu0 %v3301_v50  ;;  %v3397_v50 = vld [vmem:[%s3635_s5] ss:$0 sm:$0xff] }
 0x1f4   :  { %1505 = vmatmul.mubr.f32.gmra.mrb[42].mxu0 %v3307_v62 }
 0x1f5   :  { %1509 = vmatprep.mubr.f32.mxu0 %v3311_v38 }
 0x1f8   :  { %1510 = vmatmul.mubr.f32.gmra.mrb[44].mxu0 %v3316_v25 }
 0x1f9   :  { %1514 = vmatprep.mubr.f32.mxu0 %v3320_v27 }
 0x1fc   :  { %1515 = vmatmul.mubr.f32.gmra.mrb[46].mxu0 %v3325_v34 }
 0x1fd   :  { %2304 = vmatprep.mubr.msk.f32.mxu0 %vm2935_vm3, %v2934_v53  ;;  %v1625_v53 = vld [vmem:[#allocation12 + $0x38] sm:$0xff] }
 0x253   :  { %v1879_v22 = vpop.f32.mrb[8].mxu0 }
 0x254   :  { %v1880_v48 = vpop.f32.mrb[9].mxu0 }
 0x255   :  { %v1881_v46 = vadd.f32 %v1880_v48, %v1879_v22  ;;  %v1160_v22 = vld [vmem:[#allocation9 + $0x108] sm:$0xff]  ;;  %v1177_v48 = vld [vmem:[#allocation9 + $0x190] sm:$0xff] }
 0x257   :  { %v655_v62 = vadd.f32 %v1881_v46, %v3348_v6  ;;  %v1882_v38 = vpop.f32.mrb[10].mxu0  ;;  %v1178_v46 = vld [vmem:[#allocation9 + $0x198] sm:$0xff] }
 0x258   :  { %v1883_v25 = vpop.f32.mrb[11].mxu0 }
 0x259   :  { %v665_v27 = vadd.f32 %v3397_v50, %v655_v62  ;;  %v1884_v34 = vadd.f32 %v1883_v25, %v1882_v38 }
 0x25b   :  { %754 = vst [vmem:[#allocation14] sm:$0xff] %v665_v27  ;;  %v656_v41 = vadd.f32 %v1884_v34, %v3359_v47  ;;  %2152 = vmatprep.mubr.f32.mxu1 %v665_v27  ;;  %v1885_v42 = vpop.f32.mrb[12].mxu0  ;;  %v764_v3 = vmul.f32 %v762_v43, %v665_v27  ;;  %v1006_v27 = vld [vmem:[#allocation12 + $0x20] sm:$0xff]  ;;  %v2545_v34 = vpack.c.bf16 %v1160_v22, %v1159_v21  ;;  %v1166_v21 = vld [vmem:[#allocation9 + $0x138] sm:$0xff] }
 0x25c   :  { %v1886_v52 = vpop.f32.mrb[13].mxu0  ;;  %v1183_v22 = vld [vmem:[#allocation9 + $0x1c0] sm:$0xff] }
 0x25d   :  { %v666_v12 = vadd.f32 %v3397_v50, %v656_v41  ;;  %v1887_v13 = vadd.f32 %v1886_v52, %v1885_v42  ;;  %v1007_v41 = vld [vmem:[#allocation12 + $0x28] sm:$0xff]  ;;  %v1161_v42 = vld [vmem:[#allocation9 + $0x110] sm:$0xff]  ;;  %v2547_v52 = vpack.c.bf16 %v1178_v46, %v1177_v48 }
 0x25e   :  { %v1184_v48 = vld [vmem:[#allocation9 + $0x1c8] sm:$0xff] }
 0x25f   :  { %755 = vst [vmem:[#allocation14 + $0x8] sm:$0xff] %v666_v12  ;;  %v765_v56 = vmul.f32 %v763_v49, %v666_v12  ;;  %2153 = vmatmul.mubr.f32.vlgmr.msra.gmra.mrb[16].mxu1 %v666_v12  ;;  %v1888_v6 = vpop.f32.mrb[14].mxu0  ;;  %v657_v59 = vadd.f32 %v1887_v13, %v519_v5  ;;  %v1162_v12 = vld [vmem:[#allocation9 + $0x118] sm:$0xff]  ;;  %v1179_v13 = vld [vmem:[#allocation9 + $0x1a0] sm:$0xff] }
 0x260   :  { %2478 = vmatpush3.bf16.msra.mxu1 %v3245_v44  ;;  %v1889_v60 = vpop.f32.mrb[15].mxu0 }
 0x261   :  { %v768_v61 = vadd.f32 %v765_v56, %v764_v3  ;;  %2480 = vmatprep.subr.bf16.mxu1 %v3249_v51  ;;  %v667_v47 = vadd.f32 %v3397_v50, %v657_v59  ;;  %v1890_v63 = vadd.f32 %v1889_v60, %v1888_v6  ;;  %v1180_v3 = vld [vmem:[#allocation9 + $0x1a8] sm:$0xff] }
 0x263   :  { %756 = vst [vmem:[#allocation14 + $0x40] sm:$0xff] %v667_v47  ;;  %v658_v14 = vadd.f32 %v1890_v63, %v524_v31  ;;  %2155 = vmatprep.mubr.f32.mxu1 %v667_v47  ;;  %v766_v15 = vmul.f32 %v762_v43, %v667_v47  ;;  %v1176_v31 = vld [vmem:[#allocation9 + $0x188] sm:$0xff]  ;;  %v769_v17 = vrot.slane %v768_v61, 4  ;;  %v2549_v47 = vpack.c.bf16 %v1162_v12, %v1161_v42  ;;  %v1186_v12 = vld [vmem:[#allocation9 + $0x1d8] sm:$0xff] }
 0x264   :  { %2482 = vmatpush3.bf16.msra.mxu1 %v3249_v51  ;;  %v2543_v19 = vpack.c.bf16 %v1176_v31, %v1175_v30  ;;  %v2551_v63 = vpack.c.bf16 %v1180_v3, %v1179_v13 }
 0x265   :  { %v668_v4 = vadd.f32 %v3397_v50, %v658_v14  ;;  %2484 = vmatprep.subr.bf16.mxu1 %v3261_v2  ;;  %v1163_v14 = vld [vmem:[#allocation9 + $0x120] sm:$0xff] }
 0x267   :  { %757 = vst [vmem:[#allocation14 + $0x48] sm:$0xff] %v668_v4  ;;  %v767_v5 = vmul.f32 %v763_v49, %v668_v4  ;;  %2156 = vmatmul.mubr.f32.gmra.mrb[18].mxu1 %v668_v4 }
 0x268   :  { %2486 = vmatpush3.bf16.msra.mxu1 %v3261_v2 }
 0x269   :  { %v3410_v9 = vadd.f32 %v767_v5, %v766_v15  ;;  %2488 = vmatprep.subr.bf16.mxu1 %v3270_v32 }
 0x26b   :  { %v776_v15 = vrot.slane %v3410_v9, 4 }
 0x26c   :  { %2490 = vmatpush3.bf16.msra.mxu1 %v3270_v32 }
 0x26d   :  { %2492 = vmatprep.subr.bf16.mxu1 %v3279_v45 }
 0x270   :  { %2494 = vmatpush3.bf16.msra.mxu1 %v3279_v45 }
 0x271   :  { %2496 = vmatprep.subr.bf16.mxu1 %v3341_v58 }
 0x273   :  { %v1943_v23 = vpop.f32.mrb[16].mxu0 }
 0x274   :  { %v1944_v26 = vpop.f32.mrb[17].mxu0  ;;  %2498 = vmatpush3.bf16.msra.mxu1 %v3341_v58 }
 0x275   :  { %v1945_v29 = vadd.f32 %v1944_v26, %v1943_v23  ;;  %2500 = vmatprep.subr.bf16.mxu1 %v3350_v7  ;;  %v1164_v26 = vld [vmem:[#allocation9 + $0x128] sm:$0xff] }
 0x277   :  { %v902_v10 = vadd.f32 %v1945_v29, %v3366_v55  ;;  %v1946_v16 = vpop.f32.mrb[18].mxu0  ;;  %v770_v55 = vadd.f32 %v769_v17, %v768_v61  ;;  %v1181_v29 = vld [vmem:[#allocation9 + $0x1b0] sm:$0xff] }
 0x278   :  { %v1947_v35 = vpop.f32.mrb[19].mxu0  ;;  %2502 = vmatpush3.bf16.msra.mxu1 %v3350_v7  ;;  %v1165_v17 = vld [vmem:[#allocation9 + $0x130] sm:$0xff] }
 0x279   :  { %v1948_v11 = vadd.f32 %v1947_v35, %v1946_v16  ;;  %v906_v39 = vadd.f32 %v3397_v50, %v902_v10  ;;  %2504 = vmatprep.subr.bf16.mxu1 %v3357_v40  ;;  %v771_v60 = vrot.slane %v770_v55, 2  ;;  %v2553_v10 = vpack.c.bf16 %v1164_v26, %v1163_v14  ;;  %v1171_v26 = vld [vmem:[#allocation9 + $0x160] sm:$0xff] }
 0x27b   :  { %v903_v62 = vadd.f32 %v1948_v11, %v3369_v1  ;;  %v1949_v38 = vpop.f32.mrb[20].mxu0  ;;  %2190 = vmatprep.mubr.f32.mxu1 %v906_v39  ;;  %996 = vst [vmem:[#allocation14 + $0x20] sm:$0xff] %v906_v39  ;;  %v1008_v56 = vmul.f32 %v1006_v27, %v906_v39  ;;  %v772_v35 = vadd.f32 %v771_v60, %v770_v55  ;;  %v1167_v55 = vld [vmem:[#allocation9 + $0x140] sm:$0xff] }
 0x27c   :  { %v1950_v25 = vpop.f32.mrb[21].mxu0  ;;  %2506 = vmatpush3.bf16.msra.mxu1 %v3357_v40  ;;  %v777_v11 = vadd.f32 %v776_v15, %v3410_v9 }
 0x27d   :  { %v907_v43 = vadd.f32 %v3397_v50, %v903_v62  ;;  %v1951_v49 = vadd.f32 %v1950_v25, %v1949_v38  ;;  %2544 = vmatprep.subr.bf16.mxu1 %v2543_v19  ;;  %v2557_v38 = vpack.c.bf16 %v1166_v21, %v1165_v17  ;;  %v2559_v25 = vpack.c.bf16 %v1184_v48, %v1183_v22 }
 0x27e   :  { %v778_v9 = vrot.slane %v777_v11, 2 }
 0x27f   :  { %997 = vst [vmem:[#allocation14 + $0x28] sm:$0xff] %v907_v43  ;;  %v904_v1 = vadd.f32 %v1951_v49, %v3390_v18  ;;  %v1952_v6 = vpop.f32.mrb[22].mxu0  ;;  %2191 = vmatmul.mubr.f32.vlgmr.msra.gmra.mrb[20].mxu1 %v907_v43  ;;  %v1009_v59 = vmul.f32 %v1007_v41, %v907_v43  ;;  %v1182_v18 = vld [vmem:[#allocation9 + $0x1b8] sm:$0xff]  ;;  %v1168_v49 = vld [vmem:[#allocation9 + $0x148] sm:$0xff] }
 0x280   :  { %v1953_v61 = vpop.f32.mrb[23].mxu0  ;;  %2546 = vmatpush3.bf16.msra.mxu1 %v2545_v34  ;;  %v2555_v16 = vpack.c.bf16 %v1182_v18, %v1181_v29  ;;  %v773_v34 = vrot.slane %v772_v35, 1  ;;  %v1172_v29 = vld [vmem:[#allocation9 + $0x168] sm:$0xff]  ;;  %v1189_v18 = vld [vmem:[#allocation9 + $0x1f0] sm:$0xff] }
 0x281   :  { %v908_v4 = vadd.f32 %v3397_v50, %v904_v1  ;;  %v1954_v5 = vadd.f32 %v1953_v61, %v1952_v6  ;;  %v1012_v23 = vadd.f32 %v1009_v59, %v1008_v56  ;;  %2548 = vmatprep.subr.bf16.mxu1 %v2547_v52  ;;  %v1185_v52 = vld [vmem:[#allocation9 + $0x1d0] sm:$0xff]  ;;  %v779_v56 = vadd.f32 %v778_v9, %v777_v11  ;;  %v1170_v59 = vld [vmem:[#allocation9 + $0x158] sm:$0xff]  ;;  %v1187_v61 = vld [vmem:[#allocation9 + $0x1e0] sm:$0xff] }
 0x282   :  { %v2563_v3 = vpack.c.bf16 %v1186_v12, %v1185_v52  ;;  %v774_v1 = vadd.f32 %v773_v34, %v772_v35  ;;  %v1169_v6 = vld [vmem:[#allocation9 + $0x150] sm:$0xff] }
 0x283   :  { %998 = vst [vmem:[#allocation14 + $0x60] sm:$0xff] %v908_v4  ;;  %v905_v30 = vadd.f32 %v1954_v5, %v3392_v20  ;;  %v1013_v31 = vrot.slane %v1012_v23, 4  ;;  %2193 = vmatprep.mubr.f32.mxu1 %v908_v4  ;;  %v1010_v46 = vmul.f32 %v1006_v27, %v908_v4  ;;  %v2565_v15 = vpack.c.bf16 %v1170_v59, %v1169_v6  ;;  %v1173_v11 = vld [vmem:[#allocation9 + $0x170] sm:$0xff] }
 0x284   :  { %2550 = vmatpush3.bf16.msra.mxu1 %v2549_v47  ;;  %v1188_v47 = vld [vmem:[#allocation9 + $0x1e8] sm:$0xff]  ;;  %v780_v4 = vrot.slane %v779_v56, 1 }
 0x285   :  { %v909_v39 = vadd.f32 %v3397_v50, %v905_v30  ;;  %v1014_v19 = vadd.f32 %v1013_v31, %v1012_v23  ;;  %2552 = vmatprep.subr.bf16.mxu1 %v2551_v63  ;;  %v2567_v23 = vpack.c.bf16 %v1188_v47, %v1187_v61  ;;  %v1190_v30 = vld [vmem:[#allocation9 + $0x1f8] sm:$0xff] }
 0x286   :  { %v2571_v35 = vpack.c.bf16 %v1190_v30, %v1189_v18  ;;  %v1652_v30 = vld [vmem:[%s3637_s7 + $0x20] sm:$0xff] }
 0x287   :  { %999 = vst [vmem:[#allocation14 + $0x68] sm:$0xff] %v909_v39  ;;  %v1011_v62 = vmul.f32 %v1007_v41, %v909_v39  ;;  %v1015_v20 = vrot.slane %v1014_v19, 2  ;;  %2194 = vmatmul.mubr.f32.gmra.mrb[22].mxu1 %v909_v39  ;;  %v2561_v41 = vpack.c.bf16 %v1168_v49, %v1167_v55  ;;  %v1174_v39 = vld [vmem:[#allocation9 + $0x178] sm:$0xff] }
 0x288   :  { %1255 = vmatprep.mubr.f32.mxu1 %v3232_v24  ;;  %2554 = vmatpush3.bf16.msra.mxu1 %v2553_v10  ;;  %v2569_v10 = vpack.c.bf16 %v1172_v29, %v1171_v26  ;;  %v2573_v21 = vpack.c.bf16 %v1174_v39, %v1173_v11  ;;  %v1650_v26 = vld [vmem:[%s3637_s7 + $0x10] sm:$0xff]  ;;  %v1651_v29 = vld [vmem:[%s3637_s7 + $0x18] sm:$0xff]  ;;  %v1656_v11 = vld [vmem:[%s3637_s7 + $0x40] sm:$0xff] }
 0x289   :  { %v1016_v42 = vadd.f32 %v1015_v20, %v1014_v19  ;;  %v1019_v43 = vadd.f32 %v1011_v62, %v1010_v46  ;;  %2556 = vmatprep.subr.bf16.mxu1 %v2555_v16  ;;  %v781_v16 = vadd.f32 %v780_v4, %v779_v56  ;;  %v1648_v4 = vld [vmem:[%s3637_s7] sm:$0xff]  ;;  %v2675_v18 = vpack.c.bf16 %v1651_v29, %v1650_v26  ;;  %v1657_v39 = vld [vmem:[%s3637_s7 + $0x48] sm:$0xff]  ;;  %v1380_v26 = vld [vmem:[#allocation12 + $0x10] sm:$0xff] }
 0x28b   :  { %v1017_v13 = vrot.slane %v1016_v42, 1  ;;  %v1020_v27 = vrot.slane %v1019_v43, 4 }
 0x28c   :  { %2558 = vmatpush3.bf16.msra.mxu1 %v2557_v38 }
 0x28d   :  { %v1021_v24 = vadd.f32 %v1020_v27, %v1019_v43  ;;  %2560 = vmatprep.subr.bf16.mxu1 %v2559_v25  ;;  %v1018_v60 = vadd.f32 %v1017_v13, %v1016_v42 }
 0x28f   :  { %v1022_v63 = vrot.slane %v1021_v24, 2  ;;  %v3433_v14 = vadd.f32 %v1018_v60, %v774_v1 }
 0x290   :  { %2562 = vmatpush3.bf16.msra.mxu1 %v2561_v41 }
 0x291   :  { %v1023_v5 = vadd.f32 %v1022_v63, %v1021_v24  ;;  %2564 = vmatprep.subr.bf16.mxu1 %v2563_v3 }
 0x293   :  { %v1024_v31 = vrot.slane %v1023_v5, 1 }
 0x294   :  { %2566 = vmatpush3.bf16.msra.mxu1 %v2565_v15 }
 0x295   :  { %v1025_v17 = vadd.f32 %v1024_v31, %v1023_v5  ;;  %2568 = vmatprep.subr.bf16.mxu1 %v2567_v23  ;;  %v1649_v5 = vld [vmem:[%s3637_s7 + $0x8] sm:$0xff] }
 0x296   :  { %v2672_v23 = vpack.c.bf16 %v1649_v5, %v1648_v4  ;;  %v1653_v31 = vld [vmem:[%s3637_s7 + $0x28] sm:$0xff] }
 0x297   :  { %v3435_v19 = vadd.f32 %v1025_v17, %v781_v16  ;;  %v1654_v16 = vld [vmem:[%s3637_s7 + $0x30] sm:$0xff]  ;;  %v1655_v17 = vld [vmem:[%s3637_s7 + $0x38] sm:$0xff] }
 0x298   :  { %2570 = vmatpush3.bf16.msra.mxu1 %v2569_v10  ;;  %2673 = vmatpush3.bf16.msra.mxu0 %v2672_v23  ;;  %v2678_v10 = vpack.c.bf16 %v1653_v31, %v1652_v30  ;;  %v1381_v23 = vld [vmem:[#allocation12 + $0x18] sm:$0xff] }
 0x299   :  { %2572 = vmatprep.subr.bf16.mxu1 %v2571_v35  ;;  %2674 = vmatprep.subr.bf16.mxu0 %v2933_v0  ;;  %v2681_v35 = vpack.c.bf16 %v1655_v17, %v1654_v16 }
 0x29c   :  { %2574 = vmatpush3.bf16.msra.mxu1 %v2573_v21  ;;  %2676 = vmatpush3.bf16.msra.mxu0 %v2675_v18  ;;  %v2684_v21 = vpack.c.bf16 %v1657_v39, %v1656_v11 }
 0x29d   :  { %2576 = vmatprep.subr.bf16.mxu1 %v3245_v44  ;;  %2677 = vmatprep.subr.bf16.mxu0 %v2933_v0 }
 0x29f   :  { %1256 = vmatmul.mubr.f32.vlgmr.msra.gmra.mrb[24].mxu1 %v3251_v54 }
 0x2a0   :  { %1260 = vmatprep.mubr.f32.mxu1 %v3237_v28  ;;  %2578 = vmatpush3.bf16.msra.mxu1 %v3245_v44 }
 0x2a1   :  { %2580 = vmatprep.subr.bf16.mxu1 %v3249_v51  ;;  %2679 = vmatpush3.bf16.msra.mxu0 %v2678_v10 }
 0x2a2   :  { %2680 = vmatprep.subr.bf16.mxu0 %v2933_v0 }
 0x2a3   :  { %1261 = vmatmul.mubr.f32.gmra.mrb[26].mxu1 %v3241_v36  ;;  %v3443_v22 = vpop.f32.mrb[24].mxu0 }
 0x2a4   :  { %1265 = vmatprep.mubr.f32.mxu1 %v3243_v37  ;;  %v1121_v48 = vpop.f32.mrb[25].mxu0  ;;  %2582 = vmatpush3.bf16.msra.mxu1 %v3249_v51 }
 0x2a5   :  { %2584 = vmatprep.subr.bf16.mxu1 %v3261_v2  ;;  %2682 = vmatpush3.bf16.msra.mxu0 %v2681_v35  ;;  %v1658_v48 = vld [vmem:[%s3637_s7 + $0x50] sm:$0xff] }
 0x2a6   :  { %2683 = vmatprep.subr.bf16.mxu0 %v2933_v0 }
 0x2a7   :  { %1266 = vmatmul.mubr.f32.gmra.mrb[28].mxu1 %v3272_v33  ;;  %v3449_v54 = vpop.f32.mrb[26].mxu0 }
 0x2a8   :  { %1270 = vmatprep.mubr.f32.mxu1 %v3254_v57  ;;  %v1126_v28 = vpop.f32.mrb[27].mxu0  ;;  %2586 = vmatpush3.bf16.msra.mxu1 %v3261_v2 }
 0x2a9   :  { %2588 = vmatprep.subr.bf16.mxu1 %v3270_v32  ;;  %2685 = vmatpush3.bf16.msra.mxu0 %v2684_v21  ;;  %v1659_v28 = vld [vmem:[%s3637_s7 + $0x58] sm:$0xff] }
 0x2aa   :  { %2686 = vmatprep.subr.bf16.mxu0 %v2933_v0 }
 0x2ab   :  { %1271 = vmatmul.mubr.f32.gmra.mrb[30].mxu1 %v3264_v8  ;;  %v1129_v36 = vpop.f32.mrb[28].mxu0 }
 0x2ac   :  { %v1131_v37 = vpop.f32.mrb[29].mxu0  ;;  %2590 = vmatpush3.bf16.msra.mxu1 %v3270_v32 }
 0x2ad   :  { %2592 = vmatprep.subr.bf16.mxu1 %v3279_v45  ;;  %v1660_v37 = vld [vmem:[%s3637_s7 + $0x60] sm:$0xff] }
 0x2af   :  { %v1134_v46 = vpop.f32.mrb[30].mxu0 }
 0x2b0   :  { %v1136_v62 = vpop.f32.mrb[31].mxu0  ;;  %2594 = vmatpush3.bf16.msra.mxu1 %v3279_v45 }
 0x2b1   :  { %2596 = vmatprep.subr.bf16.mxu1 %v3341_v58 }
 0x2b3   :  { %v3459_v57 = vpop.f32.mrb[32].mxu0 }
 0x2b4   :  { %v1141_v33 = vpop.f32.mrb[33].mxu0  ;;  %2598 = vmatpush3.bf16.msra.mxu1 %v3341_v58 }
 0x2b5   :  { %2600 = vmatprep.subr.bf16.mxu1 %v3350_v7  ;;  %v1662_v33 = vld [vmem:[%s3637_s7 + $0x70] sm:$0xff] }
 0x2b7   :  { %v3463_v8 = vpop.f32.mrb[34].mxu0 }
 0x2b8   :  { %v1146_v20 = vpop.f32.mrb[35].mxu0  ;;  %2602 = vmatpush3.bf16.msra.mxu1 %v3350_v7 }
 0x2b9   :  { %2604 = vmatprep.subr.bf16.mxu1 %v3357_v40  ;;  %v1663_v20 = vld [vmem:[%s3637_s7 + $0x78] sm:$0xff] }
 0x2bb   :  { %v1149_v38 = vpop.f32.mrb[36].mxu0 }
 0x2bc   :  { %v1151_v25 = vpop.f32.mrb[37].mxu0  ;;  %2606 = vmatpush3.bf16.msra.mxu1 %v3357_v40 }
 0x2bd   :  { %2640 = vmatprep.subr.bf16.mxu1 %v3245_v44 }
 0x2bf   :  { %v1154_v55 = vpop.f32.mrb[38].mxu0 }
 0x2c0   :  { %v1156_v34 = vpop.f32.mrb[39].mxu0 }
 0x2c3   :  { %v2071_v9 = vpop.f32.mrb[40].mxu0 }
 0x2c4   :  { %v2072_v42 = vpop.f32.mrb[41].mxu0 }
 0x2c5   :  { %v2073_v43 = vadd.f32 %v2072_v42, %v2071_v9 }
 0x2c7   :  { %v1520_v49 = vadd.f32 %v2073_v43, %v1129_v36  ;;  %v2074_v52 = vpop.f32.mrb[42].mxu0  ;;  %v2687_v36 = vpack.c.bf16 %v1659_v28, %v1658_v48 }
 0x2c8   :  { %v2075_v12 = vpop.f32.mrb[43].mxu0 }
 0x2c9   :  { %v2076_v13 = vadd.f32 %v2075_v12, %v2074_v52  ;;  %v3470_v27 = vadd.f32 %v3397_v50, %v1520_v49  ;;  %2688 = vmatpush3.bf16.msra.mxu0 %v2687_v36 }
 0x2ca   :  { %2689 = vmatprep.subr.bf16.mxu0 %v2933_v0 }
 0x2cb   :  { %v1521_v41 = vadd.f32 %v2076_v13, %v1134_v46  ;;  %v2077_v3 = vpop.f32.mrb[44].mxu0  ;;  %1614 = vst [vmem:[#allocation14 + $0x30] sm:$0xff] %v3470_v27  ;;  %v1661_v46 = vld [vmem:[%s3637_s7 + $0x68] sm:$0xff]  ;;  %s2936_s7 = smov [#allocation14]  }
 0x2cc   :  { %v2078_v1 = vpop.f32.mrb[45].mxu0  ;;  %v2690_v62 = vpack.c.bf16 %v1661_v46, %v1660_v37  ;;  %s1779_s22 = sshll.u32 %s2936_s7, 4  ;;  %s1780_s22 = int_to_ptr.vmem [resolvable:$true] %s1779_s22 }
 0x2cd   :  { %v3474_v56 = vadd.f32 %v3397_v50, %v1521_v41  ;;  %v2079_v24 = vadd.f32 %v2078_v1, %v2077_v3  ;;  %v1624_v1 = vld [vmem:[#allocation12 + $0x30] sm:$0xff]  ;;  %s2845_s9 = scalar_lea.vmem %s1780_s22, 2048  ;;  %p2850_p7 = scmp.lt.s32.totalorder %s1780_s22, %s1780_s22 }
 0x2ce   :  { %2691 = vmatpush3.bf16.msra.mxu0 %v2690_v62  ;;  %v1626_v5 = vmul.f32 %v1624_v1, %v3470_v27  ;;  %p2846_p6 = scmp.ne.s32.totalorder %s1780_s22, %s2845_s9  ;;  %p2851_p8 = scmp.lt.s32.totalorder %s2845_s9, %s2845_s9 }
 0x2cf   :  { %1615 = vst [vmem:[#allocation14 + $0x38] sm:$0xff] %v3474_v56  ;;  %v1522_v6 = vadd.f32 %v2079_v24, %v1149_v38  ;;  %v2080_v59 = vpop.f32.mrb[46].mxu0  ;;  %2692 = vmatprep.subr.bf16.mxu0 %v2933_v0  ;;  %v2693_v38 = vpack.c.bf16 %v1663_v20, %v1662_v33 }
 0x2d0   :  { %v2081_v60 = vpop.f32.mrb[47].mxu0  ;;  %p2852_p9 = por %p2851_p8, %p2850_p7 }
 0x2d1   :  { %v3478_v61 = vadd.f32 %v3397_v50, %v1522_v6  ;;  %v2082_v47 = vadd.f32 %v2081_v60, %v2080_v59  ;;  %v1627_v6 = vmul.f32 %v1625_v53, %v3474_v56 }
 0x2d2   :  { %2694 = vmatpush3.bf16.msra.mxu0 %v2693_v38  ;;  %p2853_p10 = pnand %p2852_p9, %p2846_p6 }
 0x2d3   :  { %1616 = vst [vmem:[#allocation14 + $0x70] sm:$0xff] %v3478_v61  ;;  %v1523_v63 = vadd.f32 %v2082_v47, %v1154_v55  ;;  %v1628_v29 = vmul.f32 %v1624_v1, %v3478_v61  ;;  %v1630_v31 = vadd.f32 %v1627_v6, %v1626_v5 }
 0x2d5   :  { %v3482_v15 = vadd.f32 %v3397_v50, %v1523_v63  ;;  %v1631_v28 = vrot.slane %v1630_v31, 4 }
 0x2d7   :  { %1617 = vst [vmem:[#allocation14 + $0x78] sm:$0xff] %v3482_v15  ;;  %v1629_v47 = vmul.f32 %v1625_v53, %v3482_v15  ;;  %v1632_v62 = vadd.f32 %v1631_v28, %v1630_v31 }
 0x2d9   :  { %v1637_v10 = vadd.f32 %v1629_v47, %v1628_v29 }
 0x2db   :  { %v1638_v36 = vrot.slane %v1637_v10, 4 }
 0x2dd   :  { %v1639_v33 = vadd.f32 %v1638_v36, %v1637_v10 }
 0x332   :  { %v2154_v25 = vpop.f32.mrb[16].mxu1 }
 0x333   :  { %759 = vst [vmem:[#allocation15 + $0x8] sm:$0xff] %v2154_v25  ;;  %v735_v55 = vpop.f32.mrb[17].mxu1 }
 0x334   :  { %758 = vst [vmem:[#allocation15] sm:$0xff] %v735_v55 }
 0x33a   :  { %v2157_v34 = vpop.f32.mrb[18].mxu1 }
 0x33b   :  { %761 = vst [vmem:[#allocation15 + $0x48] sm:$0xff] %v2157_v34  ;;  %v745_v0 = vpop.f32.mrb[19].mxu1  ;;  %v1633_v34 = vrot.slane %v1632_v62, 2 }
 0x33c   :  { %760 = vst [vmem:[#allocation15 + $0x40] sm:$0xff] %v745_v0 }
 0x352   :  { %v2192_v9 = vpop.f32.mrb[20].mxu1 }
 0x353   :  { %1002 = vst [vmem:[#allocation15 + $0x28] sm:$0xff] %v2192_v9  ;;  %v976_v42 = vpop.f32.mrb[21].mxu1 }
 0x354   :  { %1001 = vst [vmem:[#allocation15 + $0x20] sm:$0xff] %v976_v42  ;;  %v1634_v42 = vadd.f32 %v1633_v34, %v1632_v62 }
 0x35a   :  { %v2195_v43 = vpop.f32.mrb[22].mxu1 }
 0x35b   :  { %1004 = vst [vmem:[#allocation15 + $0x68] sm:$0xff] %v2195_v43  ;;  %v986_v49 = vpop.f32.mrb[23].mxu1 }
 0x35c   :  { %1003 = vst [vmem:[#allocation15 + $0x60] sm:$0xff] %v986_v49 }
 0x372   :  { %v2007_v52 = vpop.f32.mrb[24].mxu1 }
 0x373   :  { %v2008_v12 = vpop.f32.mrb[25].mxu1 }
 0x374   :  { %v2009_v13 = vadd.f32 %v2008_v12, %v2007_v52  ;;  %v1635_v12 = vrot.slane %v1634_v42, 1 }
 0x376   :  { %v1276_v41 = vadd.f32 %v2009_v13, %v3443_v22  ;;  %v2010_v3 = vpop.f32.mrb[26].mxu1 }
 0x377   :  { %v2011_v24 = vpop.f32.mrb[27].mxu1 }
 0x378   :  { %v2012_v59 = vadd.f32 %v2011_v24, %v2010_v3  ;;  %v1280_v60 = vadd.f32 %v3397_v50, %v1276_v41  ;;  %v1636_v41 = vadd.f32 %v1635_v12, %v1634_v42 }
 0x37a   :  { %v1277_v63 = vadd.f32 %v2012_v59, %v3449_v54  ;;  %v2013_v4 = vpop.f32.mrb[28].mxu1  ;;  %2228 = vmatprep.mubr.f32.mxu1 %v1280_v60  ;;  %1370 = vst [vmem:[#allocation14 + $0x10] sm:$0xff] %v1280_v60  ;;  %v1382_v17 = vmul.f32 %v1380_v26, %v1280_v60 }
 0x37b   :  { %v2014_v22 = vpop.f32.mrb[29].mxu1 }
 0x37c   :  { %v1281_v18 = vadd.f32 %v3397_v50, %v1277_v63  ;;  %v2015_v30 = vadd.f32 %v2014_v22, %v2013_v4 }
 0x37e   :  { %1371 = vst [vmem:[#allocation14 + $0x18] sm:$0xff] %v1281_v18  ;;  %v1383_v16 = vmul.f32 %v1381_v23, %v1281_v18  ;;  %v1278_v54 = vadd.f32 %v2015_v30, %v3459_v57  ;;  %v2016_v35 = vpop.f32.mrb[30].mxu1  ;;  %2229 = vmatmul.mubr.f32.vlgmr.msra.gmra.mrb[32].mxu1 %v1281_v18 }
 0x37f   :  { %2642 = vmatpush3.bf16.msra.mxu1 %v3245_v44  ;;  %v2017_v11 = vpop.f32.mrb[31].mxu1 }
 0x380   :  { %v1386_v39 = vadd.f32 %v1383_v16, %v1382_v17  ;;  %v2018_v21 = vadd.f32 %v2017_v11, %v2016_v35  ;;  %2644 = vmatprep.subr.bf16.mxu1 %v3249_v51  ;;  %v1282_v48 = vadd.f32 %v3397_v50, %v1278_v54 }
 0x382   :  { %v1387_v37 = vrot.slane %v1386_v39, 4  ;;  %v1279_v46 = vadd.f32 %v2018_v21, %v3463_v8  ;;  %2231 = vmatprep.mubr.f32.mxu1 %v1282_v48  ;;  %1372 = vst [vmem:[#allocation14 + $0x50] sm:$0xff] %v1282_v48  ;;  %v1384_v38 = vmul.f32 %v1380_v26, %v1282_v48 }
 0x383   :  { %2646 = vmatpush3.bf16.msra.mxu1 %v3249_v51  ;;  %v1640_v51 = vrot.slane %v1639_v33, 2 }
 0x384   :  { %v1388_v57 = vadd.f32 %v1387_v37, %v1386_v39  ;;  %2648 = vmatprep.subr.bf16.mxu1 %v3261_v2  ;;  %v1283_v44 = vadd.f32 %v3397_v50, %v1279_v46 }
 0x385   :  { %v1641_v52 = vadd.f32 %v1640_v51, %v1639_v33 }
 0x386   :  { %v1389_v20 = vrot.slane %v1388_v57, 2  ;;  %2232 = vmatmul.mubr.f32.gmra.mrb[34].mxu1 %v1283_v44  ;;  %1373 = vst [vmem:[#allocation14 + $0x58] sm:$0xff] %v1283_v44  ;;  %v1385_v25 = vmul.f32 %v1381_v23, %v1283_v44 }
 0x387   :  { %2650 = vmatpush3.bf16.msra.mxu1 %v3261_v2  ;;  %2266 = vmatprep.mubr.f32.mxu1 %v3470_v27  ;;  %v1642_v53 = vrot.slane %v1641_v52, 1 }
 0x388   :  { %v1390_v8 = vadd.f32 %v1389_v20, %v1388_v57  ;;  %v1393_v55 = vadd.f32 %v1385_v25, %v1384_v38  ;;  %2652 = vmatprep.subr.bf16.mxu1 %v3270_v32 }
 0x389   :  { %v1643_v1 = vadd.f32 %v1642_v53, %v1641_v52 }
 0x38a   :  { %v1391_v0 = vrot.slane %v1390_v8, 1  ;;  %v1394_v9 = vrot.slane %v1393_v55, 4 }
 0x38b   :  { %2654 = vmatpush3.bf16.msra.mxu1 %v3270_v32 }
 0x38c   :  { %v1395_v50 = vadd.f32 %v1394_v9, %v1393_v55  ;;  %2656 = vmatprep.subr.bf16.mxu1 %v3279_v45  ;;  %v1392_v43 = vadd.f32 %v1391_v0, %v1390_v8 }
 0x38e   :  { %v1396_v49 = vrot.slane %v1395_v50, 2  ;;  %v1400_v2 = vadd.f32 %v1392_v43, %v3433_v14 }
 0x38f   :  { %2658 = vmatpush3.bf16.msra.mxu1 %v3279_v45 }
 0x390   :  { %v1397_v27 = vadd.f32 %v1396_v49, %v1395_v50  ;;  %2660 = vmatprep.subr.bf16.mxu1 %v3341_v58  ;;  %v1644_v24 = vadd.f32 %v1636_v41, %v1400_v2 }
 0x392   :  { %v1398_v13 = vrot.slane %v1397_v27, 1  ;;  %v1646_v14 = vmul.f32 0.0011111111, %v1644_v24 }
 0x393   :  { %2662 = vmatpush3.bf16.msra.mxu1 %v3341_v58 }
 0x394   :  { %2664 = vmatprep.subr.bf16.mxu1 %v3350_v7  ;;  %v1399_v32 = vadd.f32 %v1398_v13, %v1397_v27 }
 0x396   :  { %v1401_v3 = vadd.f32 %v1399_v32, %v3435_v19 }
 0x397   :  { %2666 = vmatpush3.bf16.msra.mxu1 %v3350_v7 }
 0x398   :  { %2668 = vmatprep.subr.bf16.mxu1 %v3357_v40  ;;  %v1645_v45 = vadd.f32 %v1643_v1, %v1401_v3 }
 0x39a   :  { %v1647_v6 = vmul.f32 0.0011111111, %v1645_v45 }
 0x39b   :  { %2670 = vmatpush3.bf16.msra.mxu1 %v3357_v40 }
 0x39c   :  { %v1674_v59 = vsel %vm1673_vm4, %v1647_v6, %v1646_v14 }
 0x39d   :  { %2305 = vmatmul.mubr.f32.vlgmr.msra.gmra.mrb[48].mxu0 %v1674_v59 }
 0x39e   :  { %2267 = vmatmul.mubr.f32.vlgmr.msra.gmra.mrb[36].mxu1 %v3474_v56 }
 0x39f   :  { %2269 = vmatprep.mubr.f32.mxu1 %v3478_v61 }
 0x3a2   :  { %2270 = vmatmul.mubr.f32.gmra.mrb[38].mxu1 %v3482_v15 }
 0x3a3   :  { %2856 = shalt.err (!%p2853_p10)
}
 0x3a4   :  { %s2857_s27 = scalar_lea.hbm %s3640_s10, 2048 }
 0x3a5   :  { %p2858_p11 = scmp.ne.s32.totalorder %s3640_s10, %s2857_s27  ;;  %p2861_p12 = scmp.lt.u32.totalorder %s2857_s27, %s3640_s10 }
 0x3a7   :  { %p2863_p13 = pnand %p2861_p12, %p2858_p11 }
 0x3a9   :  { %2866 = shalt.err (!%p2863_p13)
}
 0x3aa   :  { %1785 = dma.vmem_to_hbm [thread:$0]  %s1780_s22, 2048, %s3640_s10, [#allocation5], %s2924_s13, %s2924_s13, %s2925_s14   ;;  %v2937_v56 = vmov 1966171168   ;;  %v1750_v15 = vlaneseq  ;;  %vm1771_vm5 = vcmask 57344  }
 0x3ab   :  { %v1748_v61 = vunpack.c.l.s4 %v2937_v56  ;;  %v1846_v63 = vld [vmem:[%s3638_s8] ss:$0 sm:$0xff]  ;;  %s2938_s10 = smov [#allocation15]   ;;  %s2939_s5 = smov [#allocation17]  }
 0x3ac   :  { %v1751_v47 = vshrl.u32 %v1750_v15, 7  ;;  %s1791_s17 = sshll.u32 %s2938_s10, 4  ;;  %s1803_s19 = sshll.u32 %s2939_s5, 4  ;;  %s1792_s17 = int_to_ptr.vmem [resolvable:$true] %s1791_s17  ;;  %s3593_s19 = int_to_ptr.vmem [resolvable:$true] %s1803_s19 }
 0x3ad   :  { %v1749_v60 = vunpack.c.0.s8 %v1748_v61  ;;  %s2867_s8 = scalar_lea.vmem %s1792_s17, 2048  ;;  %p2872_p1 = scmp.lt.s32.totalorder %s1792_s17, %s1792_s17 }
 0x3ae   :  { %p2868_p0 = scmp.ne.s32.totalorder %s1792_s17, %s2867_s8  ;;  %p2873_p2 = scmp.lt.s32.totalorder %s2867_s8, %s2867_s8 }
 0x3af   :  { %v1752_v4 = vsub.s32 %v1749_v60, %v1751_v47 }
 0x3b0   :  { %p2874_p3 = por %p2873_p2, %p2872_p1 }
 0x3b2   :  { %p2875_p4 = pnand %p2874_p3, %p2868_p0 }
 0x451   :  { %v2230_v58 = vpop.f32.mrb[32].mxu1 }
 0x452   :  { %1376 = vst [vmem:[#allocation15 + $0x18] sm:$0xff] %v2230_v58  ;;  %v1350_v7 = vpop.f32.mrb[33].mxu1 }
 0x453   :  { %1375 = vst [vmem:[#allocation15 + $0x10] sm:$0xff] %v1350_v7 }
 0x459   :  { %v2233_v40 = vpop.f32.mrb[34].mxu1 }
 0x45a   :  { %1378 = vst [vmem:[#allocation15 + $0x58] sm:$0xff] %v2233_v40  ;;  %v1360_v19 = vpop.f32.mrb[35].mxu1 }
 0x45b   :  { %1377 = vst [vmem:[#allocation15 + $0x50] sm:$0xff] %v1360_v19 }
 0x470   :  { %v1742_v5 = vpop.f32.mrb[48].mxu0 }
 0x471   :  { %v2268_v23 = vpop.f32.mrb[36].mxu1  ;;  %v1743_v26 = vadd.f32 %v1846_v63, %v1742_v5  ;;  %v2306_v22 = vpop.f32.mrb[49].mxu0 }
 0x472   :  { %1620 = vst [vmem:[#allocation15 + $0x38] sm:$0xff] %v2268_v23  ;;  %v1594_v29 = vpop.f32.mrb[37].mxu1 }
 0x473   :  { %v1753_v18 = vrot.slane %v1743_v26, %v1752_v4  ;;  %1619 = vst [vmem:[#allocation15 + $0x30] sm:$0xff] %v1594_v29 }
 0x475   :  { %v1754_v30 = vcombine.high %v1753_v18, %v1753_v18  ;;  %v1761_v31 = vrot.slane %v1753_v18, %v1752_v4  ;;  %v2271_v10 = vpop.f32.mrb[38].mxu1 }
 0x476   :  { %1622 = vst [vmem:[#allocation15 + $0x78] sm:$0xff] %v2271_v10  ;;  %v1604_v16 = vpop.f32.mrb[39].mxu1 }
 0x477   :  { %v1768_v17 = vrot.slane %v1754_v30, %v1752_v4  ;;  %1621 = vst [vmem:[#allocation15 + $0x70] sm:$0xff] %v1604_v16  ;;  %1772 = vst.msk [vmem:[#allocation17] sm:$0x1] %vm1771_vm5, %v1761_v31 }
 0x478   :  { %2878 = shalt.err (!%p2875_p4)
}
 0x479   :  { %s2879_s20 = scalar_lea.hbm %s3641_s11, 2048 }
 0x47a   :  { %p2880_p5 = scmp.ne.s32.totalorder %s3641_s11, %s2879_s20  ;;  %p2883_p6 = scmp.lt.u32.totalorder %s2879_s20, %s3641_s11 }
 0x47c   :  { %p2885_p7 = pnand %p2883_p6, %p2880_p5 }
 0x47e   :  { %2888 = shalt.err (!%p2885_p7)
}
 0x47f   :  { %1797 = dma.vmem_to_hbm [thread:$0]  %s1792_s17, 2048, %s3641_s11, [#allocation16], %s2924_s13, %s2924_s13, %s2925_s14   ;;  %1773 = vst.msk [vmem:[#allocation17 + $0x1] sm:$0x1] %vm1771_vm5, %v1768_v17 }
 0x480   :  { %s2889_s9 = scalar_lea.vmem %s3593_s19, 32  ;;  %p2894_p9 = scmp.lt.s32.totalorder %s3593_s19, %s3593_s19 }
 0x481   :  { %p2890_p8 = scmp.ne.s32.totalorder %s3593_s19, %s2889_s9  ;;  %p2895_p10 = scmp.lt.s32.totalorder %s2889_s9, %s2889_s9 }
 0x483   :  { %p2896_p11 = por %p2895_p10, %p2894_p9 }
 0x485   :  { %p2897_p12 = pnand %p2896_p11, %p2890_p8 }
 0x487   :  { %2900 = shalt.err (!%p2897_p12)
}
 0x488   :  { %s2901_s27 = scalar_lea.hbm %s3642_s12, 32 }
 0x489   :  { %p2902_p13 = scmp.ne.s32.totalorder %s3642_s12, %s2901_s27  ;;  %p2905_p0 = scmp.lt.u32.totalorder %s2901_s27, %s3642_s12 }
 0x48b   :  { %p2907_p1 = pnand %p2905_p0, %p2902_p13 }
 0x48d   :  { %2910 = shalt.err (!%p2907_p1)
}
 0x48e   :  { %s2940_s13 = smov 1  }
 0x48f   :  { %1809 = dma.vmem_to_hbm [thread:$0]  %s3593_s19, 32, %s3642_s12, [#allocation16], %s2929_s18, %s2929_s18, %s2940_s13  }
 0x490   :  { %2919 = dma.done.wait [#allocation5], 2048  }
 0x491   :  { %2920 = vsyncadd [#allocation5], 4294965248 }
 0x492   :  { %2921 = dma.done.wait [#allocation16], 2080  }
 0x493   :  { %2922 = vsyncadd [#allocation16], 4294965216 }
 0x494   :  { %1819 = vsyncpa [#allocation4], 1 }
 0x495   :  { %1820 = vsyncpa [#allocation7], 1 }
 0x496   :  { %1821 = vsyncpa [#allocation10], 1 }
 0x497   :  { %1822 = vsyncpa [#allocation13], 1 }
 0x498   :  { %1823 = vsyncpa [#allocation5], 1 }
 0x499   :  { %1824 = vsyncpa [#allocation16], 1 }

</bundles_post_ra>
